<compile_context>
chip_gen: v7x
topology: tpu7x:2x2x1
jax: 0.10.0
libtpu: 0.0.40
codegen_flags: <defaults>
</compile_context>

<pallas_src>
import numpy as np
import jax
import jax.numpy as jnp
from jax.experimental import pallas as pl
from jax.experimental.pallas import tpu as pltpu

MAXPAD = 4            # largest conv padding used (kernel_size=9 -> padding=4)
K9 = 2 * MAXPAD + 1   # unified 9-tap schedule shared by all three branches


def _erf(x):
    # Abramowitz & Stegun 7.1.26 (|err| < 1.5e-7); uses only exp/mul/add/div.
    a1, a2, a3, a4, a5 = (0.254829592, -0.284496736, 1.421413741,
                          -1.453152027, 1.061405429)
    p = 0.3275911
    ax = jnp.abs(x)
    t = 1.0 / (1.0 + p * ax)            # divide lands on the EUP slot
    poly = ((((a5 * t + a4) * t + a3) * t + a2) * t + a1) * t
    y = 1.0 - poly * jnp.exp(-ax * ax)
    return jnp.where(x >= 0, y, -y)


def _gelu(x):
    # erf-based GELU, matching torch.nn.GELU() default
    return 0.5 * x * (1.0 + _erf(x * 0.7071067811865476))


def multi_scale_cnn(x, params, *, batch_block=None):
    """x: (B, 1, L) float32 -> (B, H, L) float32 (inference, BN folded)."""
    B, Cin, L = x.shape
    if Cin != 1:
        raise ValueError("MultiScaleCNN kernel assumes input_channels == 1")
    H, H3 = params["wf"].shape
    H2 = params["w1"].shape[0] // 3
    Lp = L + 2 * MAXPAD

    if batch_block is None:
        BB = B
        while BB * Lp > 1024 and BB % 2 == 0:   # keep the lane slab a few vregs wide
            BB //= 2
    else:
        BB = batch_block
    if B % BB != 0:
        raise ValueError("batch must be divisible by the batch block")
    n_chunks = B // BB
    N = BB * Lp                                   # lanes per grid step

    # (B,1,L) -> zero-pad each sequence by MAXPAD -> one lane slab per chunk.
    xp = jnp.pad(x, ((0, 0), (0, 0), (MAXPAD, MAXPAD)))            # (B,1,Lp)
    x_cat = (xp.reshape(n_chunks, BB, 1, Lp)
               .transpose(0, 2, 1, 3)
               .reshape(n_chunks, 1, N))

    def kernel(x_ref, w1_ref, b1_ref, w2_ref, b2_ref,
               wa1_ref, ba1_ref, wa2_ref, ba2_ref, wf_ref, bf_ref, out_ref):
        x_row = x_ref[0]                                           # (1, N) f32

        def lane_shift(v, d):
            # out[:, j] = v[:, (j + d) % N]; wrapped columns only land inside the
            # per-sequence halo, never at a valid output position.
            s = d % N
            if s == 0:
                return v
            return jnp.concatenate([v[:, s:], v[:, :s]], axis=1)

        # ---- first convs of all 3 branches, fused: 9-tap VPU FMA chain ----
        acc1 = jnp.zeros((3 * H2, N), jnp.float32)
        for k in range(K9):
            acc1 = acc1 + w1_ref[:, k:k + 1] * lane_shift(x_row, k - MAXPAD)

        # zero the per-sequence halo so the second conv sees torch-style zero pad
        lc = jax.lax.broadcasted_iota(jnp.int32, (1, Lp), 1)
        base = jnp.logical_and(lc >= MAXPAD, lc < MAXPAD + L).astype(jnp.float32)
        mask = jnp.concatenate([base] * BB, axis=1)                 # (1, N)

        h1 = _gelu(acc1 + b1_ref[...]) * mask                       # (3*H2, N)
        h1b = h1.astype(jnp.bfloat16)

        # ---- second convs of all 3 branches, fused: 9 accumulated MXU matmuls ----
        acc2 = jnp.zeros((H3, N), jnp.float32)
        for k in range(K9):
            acc2 = acc2 + jnp.dot(w2_ref[k], lane_shift(h1b, k - MAXPAD),
                                  preferred_element_type=jnp.float32)
        feats = _gelu(acc2 + b2_ref[...])                           # (3H, N)

        # ---- squeeze-excitation attention (per sequence) ----
        pooled = jnp.concatenate(
            [jnp.sum(feats[:, b * Lp + MAXPAD: b * Lp + MAXPAD + L],
                     axis=1, keepdims=True) for b in range(BB)],
            axis=1) * (1.0 / L)                                     # (3H, BB)
        a = _gelu(jnp.dot(wa1_ref[...], pooled,
                          preferred_element_type=jnp.float32) + ba1_ref[...])
        attn = jax.nn.sigmoid(
            jnp.dot(wa2_ref[...], a,
                    preferred_element_type=jnp.float32) + ba2_ref[...])  # (3H, BB)

        # ---- fusion 1x1 conv (+folded BN) + GELU on valid columns only ----
        outs = []
        for b in range(BB):
            s0 = b * Lp + MAXPAD
            fb = (feats[:, s0:s0 + L] * attn[:, b:b + 1]).astype(jnp.bfloat16)
            ob = jnp.dot(wf_ref[...], fb,
                         preferred_element_type=jnp.float32) + bf_ref[...]
            outs.append(_gelu(ob))
        out_ref[0] = jnp.concatenate(outs, axis=1).astype(out_ref.dtype)

    flat = [params["w1"], params["b1"], params["w2"], params["b2"],
            params["wa1"], params["ba1"], params["wa2"], params["ba2"],
            params["wf"], params["bf"]]

    def full_spec(arr):
        nd = arr.ndim
        return pl.BlockSpec(arr.shape, lambda i, _nd=nd: (0,) * _nd)

    out2d = pl.pallas_call(
        kernel,
        out_shape=jax.ShapeDtypeStruct((n_chunks, H, BB * L), x.dtype),
        grid_spec=pltpu.PrefetchScalarGridSpec(
            num_scalar_prefetch=0,
            grid=(n_chunks,),
            in_specs=([pl.BlockSpec((1, 1, N), lambda i: (i, 0, 0))]
                      + [full_spec(a) for a in flat]),
            out_specs=pl.BlockSpec((1, H, BB * L), lambda i: (i, 0, 0)),
        ),
        compiler_params=pltpu.CompilerParams(
            dimension_semantics=("parallel",)),
    )(x_cat, *flat)

    # (n_chunks, H, BB*L) -> (B, H, L)   (wrapper-side layout plumbing only)
    return (out2d.reshape(n_chunks, H, BB, L)
                 .transpose(0, 2, 1, 3)
                 .reshape(B, H, L))


def init_params(key, Cin=1, H=32, dtype=jnp.float32):
    """Deterministic synthetic parameters; eval-mode BN folded into the convs."""
    assert Cin == 1
    H2, H3 = H // 2, 3 * H
    Hr = max(H3 // 8, 1)
    keys = iter(jax.random.split(key, 64))

    def conv_w(cout, cin, k):
        return 0.2 * jax.random.normal(next(keys), (cout, cin, k), dtype)

    def conv_b(cout):
        return 0.1 * jax.random.normal(next(keys), (cout,), dtype)

    def bn(c):
        gamma = 1.0 + 0.1 * jax.random.normal(next(keys), (c,), dtype)
        beta = 0.1 * jax.random.normal(next(keys), (c,), dtype)
        mean = 0.1 * jax.random.normal(next(keys), (c,), dtype)
        var = 0.9 + 0.2 * jax.random.uniform(next(keys), (c,), dtype)
        return gamma, beta, mean, var

    def fold(w, b, bnp, eps=1e-5):
        gamma, beta, mean, var = bnp
        s = gamma / jnp.sqrt(var + eps)
        return w * s[:, None, None], (b - mean) * s + beta

    def bf16_round(w):
        # the big matmul weights run on the MXU in bf16; bake that rounding into
        # the model so kernel and reference use identical weight values.
        return w.astype(jnp.bfloat16).astype(jnp.float32)

    def make_branch(k):
        w1, b1 = fold(conv_w(H2, Cin, k), conv_b(H2), bn(H2))
        w2, b2 = fold(conv_w(H, H2, k), conv_b(H), bn(H))
        return w1, b1, bf16_round(w2), b2

    ws1, bs1, ws2, bs2 = make_branch(3)
    wm1, bm1, wm2, bm2 = make_branch(5)
    wl1, bl1, wl2, bl2 = make_branch(9)

    wa1, ba1 = conv_w(Hr, H3, 1), conv_b(Hr)
    wa2, ba2 = conv_w(H3, Hr, 1), conv_b(H3)
    wf, bf = fold(conv_w(H, H3, 1), conv_b(H), bn(H))
    wf = bf16_round(wf)

    # ---- pack into the fused 9-tap layout used by the kernel ----
    w1_all = np.zeros((3 * H2, K9), np.float32)
    b1_all = np.zeros((3 * H2, 1), np.float32)
    w2_all = np.zeros((K9, H3, 3 * H2), np.float32)     # block-diagonal per tap
    b2_all = np.zeros((H3, 1), np.float32)
    branches = [(ws1, bs1, ws2, bs2, 3),
                (wm1, bm1, wm2, bm2, 5),
                (wl1, bl1, wl2, bl2, 9)]
    for br, (w1, b1, w2, b2, K) in enumerate(branches):
        p = (K - 1) // 2
        w1n, w2n = np.asarray(w1), np.asarray(w2)
        for k9 in range(K9):
            d = k9 - MAXPAD
            if abs(d) <= p:
                w1_all[br * H2:(br + 1) * H2, k9] = w1n[:, 0, d + p]
                w2_all[k9, br * H:(br + 1) * H, br * H2:(br + 1) * H2] = w2n[:, :, d + p]
        b1_all[br * H2:(br + 1) * H2, 0] = np.asarray(b1)
        b2_all[br * H:(br + 1) * H, 0] = np.asarray(b2)

    params = dict(
        w1=jnp.asarray(w1_all), b1=jnp.asarray(b1_all),
        w2=jnp.asarray(w2_all, dtype=jnp.bfloat16), b2=jnp.asarray(b2_all),
        wa1=wa1[:, :, 0], ba1=ba1[:, None],
        wa2=wa2[:, :, 0], ba2=ba2[:, None],
        wf=jnp.asarray(wf[:, :, 0], dtype=jnp.bfloat16), bf=bf[:, None],
    )
    ref = dict(
        ws1=ws1, bs1=bs1, ws2=ws2, bs2=bs2,
        wm1=wm1, bm1=bm1, wm2=wm2, bm2=bm2,
        wl1=wl1, bl1=bl1, wl2=wl2, bl2=bl2,
        wa1=wa1, ba1=ba1, wa2=wa2, ba2=ba2,
        wf=wf, bf=bf,
    )
    return params, ref


def reference_forward(x, ref):
    """Pure-JAX reference of the PyTorch forward (BN already folded), exact f32."""
    def conv1d(x, w, b, pad):
        out = jax.lax.conv_general_dilated(
            x, w, window_strides=(1,), padding=[(pad, pad)],
            dimension_numbers=('NCH', 'OIH', 'NCH'),
            precision=jax.lax.Precision.HIGHEST)
        return out + b[None, :, None]

    gelu = lambda v: jax.nn.gelu(v, approximate=False)

    def branch(x, w1, b1, w2, b2, pad):
        h = gelu(conv1d(x, w1, b1, pad))
        return gelu(conv1d(h, w2, b2, pad))

    s = branch(x, ref["ws1"], ref["bs1"], ref["ws2"], ref["bs2"], 1)
    m = branch(x, ref["wm1"], ref["bm1"], ref["wm2"], ref["bm2"], 2)
    g = branch(x, ref["wl1"], ref["bl1"], ref["wl2"], ref["bl2"], 4)
    feats = jnp.concatenate([s, m, g], axis=1)                  # (B, 3H, L)
    pooled = jnp.mean(feats, axis=2, keepdims=True)             # (B, 3H, 1)
    a = gelu(conv1d(pooled, ref["wa1"], ref["ba1"], 0))
    attn = jax.nn.sigmoid(conv1d(a, ref["wa2"], ref["ba2"], 0))
    feats = feats * attn
    return gelu(conv1d(feats, ref["wf"], ref["bf"], 0))


if __name__ == "__main__":
    key = jax.random.PRNGKey(0)
    kx, kp = jax.random.split(key)

    # small shapes: batch=2, input_channels=1, seq_len=16, hidden_channels=32
    B, Cin, L, H = 2, 1, 16, 32
    x = jax.random.normal(kx, (B, Cin, L), jnp.float32)
    params, ref = init_params(kp, Cin=Cin, H=H)

    out = multi_scale_cnn(x, params)
    out = jax.block_until_ready(out)
    assert out.shape == (B, H, L)

    expected = reference_forward(x, ref)
    # bf16-on-MXU (f32 accumulate) vs. exact-f32 reference: errors are ~1e-2
    # worst-case, far below anything a structural bug would produce.
    np.testing.assert_allclose(np.asarray(out), np.asarray(expected),
                               rtol=2e-2, atol=2e-2)
    print("KERNEL_OK")
</pallas_src>

<mosaic_0001>
module attributes {stable_mosaic.version = 11 : i64} {
  func.func @kernel(%arg0: i32, %arg1: memref<1x1x48xf32, #tpu.memory_space<vmem>>, %arg2: memref<48x9xf32, #tpu.memory_space<vmem>>, %arg3: memref<48x1xf32, #tpu.memory_space<vmem>>, %arg4: memref<9x96x48xbf16, #tpu.memory_space<vmem>>, %arg5: memref<96x1xf32, #tpu.memory_space<vmem>>, %arg6: memref<12x96xf32, #tpu.memory_space<vmem>>, %arg7: memref<12x1xf32, #tpu.memory_space<vmem>>, %arg8: memref<96x12xf32, #tpu.memory_space<vmem>>, %arg9: memref<96x1xf32, #tpu.memory_space<vmem>>, %arg10: memref<32x96xbf16, #tpu.memory_space<vmem>>, %arg11: memref<32x1xf32, #tpu.memory_space<vmem>>, %arg12: memref<1x32x32xf32, #tpu.memory_space<vmem>>) attributes {dimension_semantics = [#tpu.dimension_semantics<parallel>], iteration_bounds = array<i64: 1>, scalar_prefetch = 0 : i64, scratch_operands = 0 : i64, tpu.core_type = #tpu.core_type<tc>, window_params = [{transform_indices = @transform_0, window_bounds = array<i64: 1, 1, 48>}, {pipeline_mode = #tpu.pipeline_mode<synchronous>, transform_indices = @transform_1, window_bounds = array<i64: 48, 9>}, {pipeline_mode = #tpu.pipeline_mode<synchronous>, transform_indices = @transform_2, window_bounds = array<i64: 48, 1>}, {pipeline_mode = #tpu.pipeline_mode<synchronous>, transform_indices = @transform_3, window_bounds = array<i64: 9, 96, 48>}, {pipeline_mode = #tpu.pipeline_mode<synchronous>, transform_indices = @transform_4, window_bounds = array<i64: 96, 1>}, {pipeline_mode = #tpu.pipeline_mode<synchronous>, transform_indices = @transform_5, window_bounds = array<i64: 12, 96>}, {pipeline_mode = #tpu.pipeline_mode<synchronous>, transform_indices = @transform_6, window_bounds = array<i64: 12, 1>}, {pipeline_mode = #tpu.pipeline_mode<synchronous>, transform_indices = @transform_7, window_bounds = array<i64: 96, 12>}, {pipeline_mode = #tpu.pipeline_mode<synchronous>, transform_indices = @transform_8, window_bounds = array<i64: 96, 1>}, {pipeline_mode = #tpu.pipeline_mode<synchronous>, transform_indices = @transform_9, window_bounds = array<i64: 32, 96>}, {pipeline_mode = #tpu.pipeline_mode<synchronous>, transform_indices = @transform_10, window_bounds = array<i64: 32, 1>}, {transform_indices = @transform_11, window_bounds = array<i64: 1, 32, 32>}]} {
    %c0 = arith.constant 0 : index
    %c0_0 = arith.constant 0 : index
    %c0_1 = arith.constant 0 : index
    %0 = vector.load %arg1[%c0, %c0_0, %c0_1] : memref<1x1x48xf32, #tpu.memory_space<vmem>>, vector<1x1x48xf32>
    %1 = vector.shape_cast %0 : vector<1x1x48xf32> to vector<1x48xf32>
    %cst = arith.constant 0.000000e+00 : f32
    %2 = vector.broadcast %cst : f32 to vector<48x48xf32>
    %c0_2 = arith.constant 0 : index
    %c0_3 = arith.constant 0 : index
    %3 = vector.load %arg2[%c0_2, %c0_3] : memref<48x9xf32, #tpu.memory_space<vmem>>, vector<48x1xf32>
    %4 = vector.extract_strided_slice %1 {offsets = [0, 44], sizes = [1, 4], strides = [1, 1]} : vector<1x48xf32> to vector<1x4xf32>
    %5 = vector.extract_strided_slice %1 {offsets = [0, 0], sizes = [1, 44], strides = [1, 1]} : vector<1x48xf32> to vector<1x44xf32>
    %6 = tpu.concatenate %4, %5 in 1 : vector<1x4xf32>, vector<1x44xf32> -> vector<1x48xf32>
    %7 = vector.broadcast %3 : vector<48x1xf32> to vector<48x48xf32>
    %8 = vector.broadcast %6 : vector<1x48xf32> to vector<48x48xf32>
    %9 = arith.mulf %7, %8 : vector<48x48xf32>
    %10 = arith.addf %2, %9 : vector<48x48xf32>
    %c0_4 = arith.constant 0 : index
    %c1 = arith.constant 1 : index
    %11 = vector.load %arg2[%c0_4, %c1] : memref<48x9xf32, #tpu.memory_space<vmem>>, vector<48x1xf32>
    %12 = vector.extract_strided_slice %1 {offsets = [0, 45], sizes = [1, 3], strides = [1, 1]} : vector<1x48xf32> to vector<1x3xf32>
    %13 = vector.extract_strided_slice %1 {offsets = [0, 0], sizes = [1, 45], strides = [1, 1]} : vector<1x48xf32> to vector<1x45xf32>
    %14 = tpu.concatenate %12, %13 in 1 : vector<1x3xf32>, vector<1x45xf32> -> vector<1x48xf32>
    %15 = vector.broadcast %11 : vector<48x1xf32> to vector<48x48xf32>
    %16 = vector.broadcast %14 : vector<1x48xf32> to vector<48x48xf32>
    %17 = arith.mulf %15, %16 : vector<48x48xf32>
    %18 = arith.addf %10, %17 : vector<48x48xf32>
    %c0_5 = arith.constant 0 : index
    %c2 = arith.constant 2 : index
    %19 = vector.load %arg2[%c0_5, %c2] : memref<48x9xf32, #tpu.memory_space<vmem>>, vector<48x1xf32>
    %20 = vector.extract_strided_slice %1 {offsets = [0, 46], sizes = [1, 2], strides = [1, 1]} : vector<1x48xf32> to vector<1x2xf32>
    %21 = vector.extract_strided_slice %1 {offsets = [0, 0], sizes = [1, 46], strides = [1, 1]} : vector<1x48xf32> to vector<1x46xf32>
    %22 = tpu.concatenate %20, %21 in 1 : vector<1x2xf32>, vector<1x46xf32> -> vector<1x48xf32>
    %23 = vector.broadcast %19 : vector<48x1xf32> to vector<48x48xf32>
    %24 = vector.broadcast %22 : vector<1x48xf32> to vector<48x48xf32>
    %25 = arith.mulf %23, %24 : vector<48x48xf32>
    %26 = arith.addf %18, %25 : vector<48x48xf32>
    %c0_6 = arith.constant 0 : index
    %c3 = arith.constant 3 : index
    %27 = vector.load %arg2[%c0_6, %c3] : memref<48x9xf32, #tpu.memory_space<vmem>>, vector<48x1xf32>
    %28 = vector.extract_strided_slice %1 {offsets = [0, 47], sizes = [1, 1], strides = [1, 1]} : vector<1x48xf32> to vector<1x1xf32>
    %29 = vector.extract_strided_slice %1 {offsets = [0, 0], sizes = [1, 47], strides = [1, 1]} : vector<1x48xf32> to vector<1x47xf32>
    %30 = tpu.concatenate %28, %29 in 1 : vector<1x1xf32>, vector<1x47xf32> -> vector<1x48xf32>
    %31 = vector.broadcast %27 : vector<48x1xf32> to vector<48x48xf32>
    %32 = vector.broadcast %30 : vector<1x48xf32> to vector<48x48xf32>
    %33 = arith.mulf %31, %32 : vector<48x48xf32>
    %34 = arith.addf %26, %33 : vector<48x48xf32>
    %c0_7 = arith.constant 0 : index
    %c4 = arith.constant 4 : index
    %35 = vector.load %arg2[%c0_7, %c4] : memref<48x9xf32, #tpu.memory_space<vmem>>, vector<48x1xf32>
    %36 = vector.broadcast %35 : vector<48x1xf32> to vector<48x48xf32>
    %37 = vector.broadcast %1 : vector<1x48xf32> to vector<48x48xf32>
    %38 = arith.mulf %36, %37 : vector<48x48xf32>
    %39 = arith.addf %34, %38 : vector<48x48xf32>
    %c0_8 = arith.constant 0 : index
    %c5 = arith.constant 5 : index
    %40 = vector.load %arg2[%c0_8, %c5] : memref<48x9xf32, #tpu.memory_space<vmem>>, vector<48x1xf32>
    %41 = vector.extract_strided_slice %1 {offsets = [0, 1], sizes = [1, 47], strides = [1, 1]} : vector<1x48xf32> to vector<1x47xf32>
    %42 = vector.extract_strided_slice %1 {offsets = [0, 0], sizes = [1, 1], strides = [1, 1]} : vector<1x48xf32> to vector<1x1xf32>
    %43 = tpu.concatenate %41, %42 in 1 : vector<1x47xf32>, vector<1x1xf32> -> vector<1x48xf32>
    %44 = vector.broadcast %40 : vector<48x1xf32> to vector<48x48xf32>
    %45 = vector.broadcast %43 : vector<1x48xf32> to vector<48x48xf32>
    %46 = arith.mulf %44, %45 : vector<48x48xf32>
    %47 = arith.addf %39, %46 : vector<48x48xf32>
    %c0_9 = arith.constant 0 : index
    %c6 = arith.constant 6 : index
    %48 = vector.load %arg2[%c0_9, %c6] : memref<48x9xf32, #tpu.memory_space<vmem>>, vector<48x1xf32>
    %49 = vector.extract_strided_slice %1 {offsets = [0, 2], sizes = [1, 46], strides = [1, 1]} : vector<1x48xf32> to vector<1x46xf32>
    %50 = vector.extract_strided_slice %1 {offsets = [0, 0], sizes = [1, 2], strides = [1, 1]} : vector<1x48xf32> to vector<1x2xf32>
    %51 = tpu.concatenate %49, %50 in 1 : vector<1x46xf32>, vector<1x2xf32> -> vector<1x48xf32>
    %52 = vector.broadcast %48 : vector<48x1xf32> to vector<48x48xf32>
    %53 = vector.broadcast %51 : vector<1x48xf32> to vector<48x48xf32>
    %54 = arith.mulf %52, %53 : vector<48x48xf32>
    %55 = arith.addf %47, %54 : vector<48x48xf32>
    %c0_10 = arith.constant 0 : index
    %c7 = arith.constant 7 : index
    %56 = vector.load %arg2[%c0_10, %c7] : memref<48x9xf32, #tpu.memory_space<vmem>>, vector<48x1xf32>
    %57 = vector.extract_strided_slice %1 {offsets = [0, 3], sizes = [1, 45], strides = [1, 1]} : vector<1x48xf32> to vector<1x45xf32>
    %58 = vector.extract_strided_slice %1 {offsets = [0, 0], sizes = [1, 3], strides = [1, 1]} : vector<1x48xf32> to vector<1x3xf32>
    %59 = tpu.concatenate %57, %58 in 1 : vector<1x45xf32>, vector<1x3xf32> -> vector<1x48xf32>
    %60 = vector.broadcast %56 : vector<48x1xf32> to vector<48x48xf32>
    %61 = vector.broadcast %59 : vector<1x48xf32> to vector<48x48xf32>
    %62 = arith.mulf %60, %61 : vector<48x48xf32>
    %63 = arith.addf %55, %62 : vector<48x48xf32>
    %c0_11 = arith.constant 0 : index
    %c8 = arith.constant 8 : index
    %64 = vector.load %arg2[%c0_11, %c8] : memref<48x9xf32, #tpu.memory_space<vmem>>, vector<48x1xf32>
    %65 = vector.extract_strided_slice %1 {offsets = [0, 4], sizes = [1, 44], strides = [1, 1]} : vector<1x48xf32> to vector<1x44xf32>
    %66 = vector.extract_strided_slice %1 {offsets = [0, 0], sizes = [1, 4], strides = [1, 1]} : vector<1x48xf32> to vector<1x4xf32>
    %67 = tpu.concatenate %65, %66 in 1 : vector<1x44xf32>, vector<1x4xf32> -> vector<1x48xf32>
    %68 = vector.broadcast %64 : vector<48x1xf32> to vector<48x48xf32>
    %69 = vector.broadcast %67 : vector<1x48xf32> to vector<48x48xf32>
    %70 = arith.mulf %68, %69 : vector<48x48xf32>
    %71 = arith.addf %63, %70 : vector<48x48xf32>
    %72 = tpu.iota {dimensions = array<i32: 1>} : vector<1x24xi32>
    %c4_i32 = arith.constant 4 : i32
    %73 = vector.broadcast %c4_i32 : i32 to vector<1x24xi32>
    %74 = arith.cmpi sge, %72, %73 : vector<1x24xi32>
    %c20_i32 = arith.constant 20 : i32
    %75 = vector.broadcast %c20_i32 : i32 to vector<1x24xi32>
    %76 = arith.cmpi slt, %72, %75 : vector<1x24xi32>
    %77 = arith.andi %74, %76 : vector<1x24xi1>
    %78 = arith.extui %77 : vector<1x24xi1> to vector<1x24xi32>
    %79 = arith.sitofp %78 : vector<1x24xi32> to vector<1x24xf32>
    %80 = tpu.concatenate %79, %79 in 1 : vector<1x24xf32>, vector<1x24xf32> -> vector<1x48xf32>
    %c0_12 = arith.constant 0 : index
    %c0_13 = arith.constant 0 : index
    %81 = vector.load %arg3[%c0_12, %c0_13] : memref<48x1xf32, #tpu.memory_space<vmem>>, vector<48x1xf32>
    %82 = vector.broadcast %81 : vector<48x1xf32> to vector<48x48xf32>
    %83 = arith.addf %71, %82 : vector<48x48xf32>
    %cst_14 = arith.constant 5.000000e-01 : f32
    %84 = vector.broadcast %cst_14 : f32 to vector<48x48xf32>
    %85 = arith.mulf %84, %83 : vector<48x48xf32>
    %cst_15 = arith.constant 0.707106769 : f32
    %86 = vector.broadcast %cst_15 : f32 to vector<48x48xf32>
    %87 = arith.mulf %83, %86 : vector<48x48xf32>
    %88 = math.absf %87 : vector<48x48xf32>
    %cst_16 = arith.constant 0.327591091 : f32
    %89 = vector.broadcast %cst_16 : f32 to vector<48x48xf32>
    %90 = arith.mulf %89, %88 : vector<48x48xf32>
    %cst_17 = arith.constant 1.000000e+00 : f32
    %91 = vector.broadcast %cst_17 : f32 to vector<48x48xf32>
    %92 = arith.addf %91, %90 : vector<48x48xf32>
    %cst_18 = arith.constant 1.000000e+00 : f32
    %93 = vector.broadcast %cst_18 : f32 to vector<48x48xf32>
    %94 = arith.divf %93, %92 : vector<48x48xf32>
    %cst_19 = arith.constant 1.06140542 : f32
    %95 = vector.broadcast %cst_19 : f32 to vector<48x48xf32>
    %96 = arith.mulf %95, %94 : vector<48x48xf32>
    %cst_20 = arith.constant -1.45315206 : f32
    %97 = vector.broadcast %cst_20 : f32 to vector<48x48xf32>
    %98 = arith.addf %96, %97 : vector<48x48xf32>
    %99 = arith.mulf %98, %94 : vector<48x48xf32>
    %cst_21 = arith.constant 1.42141378 : f32
    %100 = vector.broadcast %cst_21 : f32 to vector<48x48xf32>
    %101 = arith.addf %99, %100 : vector<48x48xf32>
    %102 = arith.mulf %101, %94 : vector<48x48xf32>
    %cst_22 = arith.constant -0.284496725 : f32
    %103 = vector.broadcast %cst_22 : f32 to vector<48x48xf32>
    %104 = arith.addf %102, %103 : vector<48x48xf32>
    %105 = arith.mulf %104, %94 : vector<48x48xf32>
    %cst_23 = arith.constant 0.254829586 : f32
    %106 = vector.broadcast %cst_23 : f32 to vector<48x48xf32>
    %107 = arith.addf %105, %106 : vector<48x48xf32>
    %108 = arith.mulf %107, %94 : vector<48x48xf32>
    %cst_24 = arith.constant 0.000000e+00 : f32
    %109 = vector.broadcast %cst_24 : f32 to vector<48x48xf32>
    %110 = arith.subf %109, %88 : vector<48x48xf32>
    %111 = arith.mulf %110, %88 : vector<48x48xf32>
    %112 = math.exp %111 : vector<48x48xf32>
    %113 = arith.mulf %108, %112 : vector<48x48xf32>
    %cst_25 = arith.constant 1.000000e+00 : f32
    %114 = vector.broadcast %cst_25 : f32 to vector<48x48xf32>
    %115 = arith.subf %114, %113 : vector<48x48xf32>
    %cst_26 = arith.constant 0.000000e+00 : f32
    %116 = vector.broadcast %cst_26 : f32 to vector<48x48xf32>
    %117 = arith.cmpf oge, %87, %116 : vector<48x48xf32>
    %cst_27 = arith.constant 0.000000e+00 : f32
    %118 = vector.broadcast %cst_27 : f32 to vector<48x48xf32>
    %119 = arith.subf %118, %115 : vector<48x48xf32>
    %120 = arith.select %117, %115, %119 : vector<48x48xi1>, vector<48x48xf32>
    %cst_28 = arith.constant 1.000000e+00 : f32
    %121 = vector.broadcast %cst_28 : f32 to vector<48x48xf32>
    %122 = arith.addf %121, %120 : vector<48x48xf32>
    %123 = arith.mulf %85, %122 : vector<48x48xf32>
    %124 = vector.broadcast %80 : vector<1x48xf32> to vector<48x48xf32>
    %125 = arith.mulf %123, %124 : vector<48x48xf32>
    %126 = arith.truncf %125 : vector<48x48xf32> to vector<48x48xbf16>
    %cst_29 = arith.constant 0.000000e+00 : f32
    %127 = vector.broadcast %cst_29 : f32 to vector<96x48xf32>
    %c0_30 = arith.constant 0 : index
    %c0_31 = arith.constant 0 : index
    %c0_32 = arith.constant 0 : index
    %128 = vector.load %arg4[%c0_30, %c0_31, %c0_32] : memref<9x96x48xbf16, #tpu.memory_space<vmem>>, vector<1x96x48xbf16>
    %129 = vector.shape_cast %128 : vector<1x96x48xbf16> to vector<96x48xbf16>
    %130 = vector.extract_strided_slice %126 {offsets = [0, 44], sizes = [48, 4], strides = [1, 1]} : vector<48x48xbf16> to vector<48x4xbf16>
    %131 = vector.extract_strided_slice %126 {offsets = [0, 0], sizes = [48, 44], strides = [1, 1]} : vector<48x48xbf16> to vector<48x44xbf16>
    %132 = tpu.concatenate %130, %131 in 1 : vector<48x4xbf16>, vector<48x44xbf16> -> vector<48x48xbf16>
    %cst_33 = arith.constant dense<0.000000e+00> : vector<96x48xf32>
    %133 = tpu.matmul %129, %132, %cst_33 {dimension_numbers = #tpu.dot_dimension_numbers<[1], [0], [0], [1], [0, 0, 1, 1], [], []>} : vector<96x48xbf16>, vector<48x48xbf16>, vector<96x48xf32> -> vector<96x48xf32>
    %134 = arith.addf %127, %133 : vector<96x48xf32>
    %c1_34 = arith.constant 1 : index
    %c0_35 = arith.constant 0 : index
    %c0_36 = arith.constant 0 : index
    %135 = vector.load %arg4[%c1_34, %c0_35, %c0_36] : memref<9x96x48xbf16, #tpu.memory_space<vmem>>, vector<1x96x48xbf16>
    %136 = vector.shape_cast %135 : vector<1x96x48xbf16> to vector<96x48xbf16>
    %137 = vector.extract_strided_slice %126 {offsets = [0, 45], sizes = [48, 3], strides = [1, 1]} : vector<48x48xbf16> to vector<48x3xbf16>
    %138 = vector.extract_strided_slice %126 {offsets = [0, 0], sizes = [48, 45], strides = [1, 1]} : vector<48x48xbf16> to vector<48x45xbf16>
    %139 = tpu.concatenate %137, %138 in 1 : vector<48x3xbf16>, vector<48x45xbf16> -> vector<48x48xbf16>
    %cst_37 = arith.constant dense<0.000000e+00> : vector<96x48xf32>
    %140 = tpu.matmul %136, %139, %cst_37 {dimension_numbers = #tpu.dot_dimension_numbers<[1], [0], [0], [1], [0, 0, 1, 1], [], []>} : vector<96x48xbf16>, vector<48x48xbf16>, vector<96x48xf32> -> vector<96x48xf32>
    %141 = arith.addf %134, %140 : vector<96x48xf32>
    %c2_38 = arith.constant 2 : index
    %c0_39 = arith.constant 0 : index
    %c0_40 = arith.constant 0 : index
    %142 = vector.load %arg4[%c2_38, %c0_39, %c0_40] : memref<9x96x48xbf16, #tpu.memory_space<vmem>>, vector<1x96x48xbf16>
    %143 = vector.shape_cast %142 : vector<1x96x48xbf16> to vector<96x48xbf16>
    %144 = vector.extract_strided_slice %126 {offsets = [0, 46], sizes = [48, 2], strides = [1, 1]} : vector<48x48xbf16> to vector<48x2xbf16>
    %145 = vector.extract_strided_slice %126 {offsets = [0, 0], sizes = [48, 46], strides = [1, 1]} : vector<48x48xbf16> to vector<48x46xbf16>
    %146 = tpu.concatenate %144, %145 in 1 : vector<48x2xbf16>, vector<48x46xbf16> -> vector<48x48xbf16>
    %cst_41 = arith.constant dense<0.000000e+00> : vector<96x48xf32>
    %147 = tpu.matmul %143, %146, %cst_41 {dimension_numbers = #tpu.dot_dimension_numbers<[1], [0], [0], [1], [0, 0, 1, 1], [], []>} : vector<96x48xbf16>, vector<48x48xbf16>, vector<96x48xf32> -> vector<96x48xf32>
    %148 = arith.addf %141, %147 : vector<96x48xf32>
    %c3_42 = arith.constant 3 : index
    %c0_43 = arith.constant 0 : index
    %c0_44 = arith.constant 0 : index
    %149 = vector.load %arg4[%c3_42, %c0_43, %c0_44] : memref<9x96x48xbf16, #tpu.memory_space<vmem>>, vector<1x96x48xbf16>
    %150 = vector.shape_cast %149 : vector<1x96x48xbf16> to vector<96x48xbf16>
    %151 = vector.extract_strided_slice %126 {offsets = [0, 47], sizes = [48, 1], strides = [1, 1]} : vector<48x48xbf16> to vector<48x1xbf16>
    %152 = vector.extract_strided_slice %126 {offsets = [0, 0], sizes = [48, 47], strides = [1, 1]} : vector<48x48xbf16> to vector<48x47xbf16>
    %153 = tpu.concatenate %151, %152 in 1 : vector<48x1xbf16>, vector<48x47xbf16> -> vector<48x48xbf16>
    %cst_45 = arith.constant dense<0.000000e+00> : vector<96x48xf32>
    %154 = tpu.matmul %150, %153, %cst_45 {dimension_numbers = #tpu.dot_dimension_numbers<[1], [0], [0], [1], [0, 0, 1, 1], [], []>} : vector<96x48xbf16>, vector<48x48xbf16>, vector<96x48xf32> -> vector<96x48xf32>
    %155 = arith.addf %148, %154 : vector<96x48xf32>
    %c4_46 = arith.constant 4 : index
    %c0_47 = arith.constant 0 : index
    %c0_48 = arith.constant 0 : index
    %156 = vector.load %arg4[%c4_46, %c0_47, %c0_48] : memref<9x96x48xbf16, #tpu.memory_space<vmem>>, vector<1x96x48xbf16>
    %157 = vector.shape_cast %156 : vector<1x96x48xbf16> to vector<96x48xbf16>
    %cst_49 = arith.constant dense<0.000000e+00> : vector<96x48xf32>
    %158 = tpu.matmul %157, %126, %cst_49 {dimension_numbers = #tpu.dot_dimension_numbers<[1], [0], [0], [1], [0, 0, 1, 1], [], []>} : vector<96x48xbf16>, vector<48x48xbf16>, vector<96x48xf32> -> vector<96x48xf32>
    %159 = arith.addf %155, %158 : vector<96x48xf32>
    %c5_50 = arith.constant 5 : index
    %c0_51 = arith.constant 0 : index
    %c0_52 = arith.constant 0 : index
    %160 = vector.load %arg4[%c5_50, %c0_51, %c0_52] : memref<9x96x48xbf16, #tpu.memory_space<vmem>>, vector<1x96x48xbf16>
    %161 = vector.shape_cast %160 : vector<1x96x48xbf16> to vector<96x48xbf16>
    %162 = vector.extract_strided_slice %126 {offsets = [0, 1], sizes = [48, 47], strides = [1, 1]} : vector<48x48xbf16> to vector<48x47xbf16>
    %163 = vector.extract_strided_slice %126 {offsets = [0, 0], sizes = [48, 1], strides = [1, 1]} : vector<48x48xbf16> to vector<48x1xbf16>
    %164 = tpu.concatenate %162, %163 in 1 : vector<48x47xbf16>, vector<48x1xbf16> -> vector<48x48xbf16>
    %cst_53 = arith.constant dense<0.000000e+00> : vector<96x48xf32>
    %165 = tpu.matmul %161, %164, %cst_53 {dimension_numbers = #tpu.dot_dimension_numbers<[1], [0], [0], [1], [0, 0, 1, 1], [], []>} : vector<96x48xbf16>, vector<48x48xbf16>, vector<96x48xf32> -> vector<96x48xf32>
    %166 = arith.addf %159, %165 : vector<96x48xf32>
    %c6_54 = arith.constant 6 : index
    %c0_55 = arith.constant 0 : index
    %c0_56 = arith.constant 0 : index
    %167 = vector.load %arg4[%c6_54, %c0_55, %c0_56] : memref<9x96x48xbf16, #tpu.memory_space<vmem>>, vector<1x96x48xbf16>
    %168 = vector.shape_cast %167 : vector<1x96x48xbf16> to vector<96x48xbf16>
    %169 = vector.extract_strided_slice %126 {offsets = [0, 2], sizes = [48, 46], strides = [1, 1]} : vector<48x48xbf16> to vector<48x46xbf16>
    %170 = vector.extract_strided_slice %126 {offsets = [0, 0], sizes = [48, 2], strides = [1, 1]} : vector<48x48xbf16> to vector<48x2xbf16>
    %171 = tpu.concatenate %169, %170 in 1 : vector<48x46xbf16>, vector<48x2xbf16> -> vector<48x48xbf16>
    %cst_57 = arith.constant dense<0.000000e+00> : vector<96x48xf32>
    %172 = tpu.matmul %168, %171, %cst_57 {dimension_numbers = #tpu.dot_dimension_numbers<[1], [0], [0], [1], [0, 0, 1, 1], [], []>} : vector<96x48xbf16>, vector<48x48xbf16>, vector<96x48xf32> -> vector<96x48xf32>
    %173 = arith.addf %166, %172 : vector<96x48xf32>
    %c7_58 = arith.constant 7 : index
    %c0_59 = arith.constant 0 : index
    %c0_60 = arith.constant 0 : index
    %174 = vector.load %arg4[%c7_58, %c0_59, %c0_60] : memref<9x96x48xbf16, #tpu.memory_space<vmem>>, vector<1x96x48xbf16>
    %175 = vector.shape_cast %174 : vector<1x96x48xbf16> to vector<96x48xbf16>
    %176 = vector.extract_strided_slice %126 {offsets = [0, 3], sizes = [48, 45], strides = [1, 1]} : vector<48x48xbf16> to vector<48x45xbf16>
    %177 = vector.extract_strided_slice %126 {offsets = [0, 0], sizes = [48, 3], strides = [1, 1]} : vector<48x48xbf16> to vector<48x3xbf16>
    %178 = tpu.concatenate %176, %177 in 1 : vector<48x45xbf16>, vector<48x3xbf16> -> vector<48x48xbf16>
    %cst_61 = arith.constant dense<0.000000e+00> : vector<96x48xf32>
    %179 = tpu.matmul %175, %178, %cst_61 {dimension_numbers = #tpu.dot_dimension_numbers<[1], [0], [0], [1], [0, 0, 1, 1], [], []>} : vector<96x48xbf16>, vector<48x48xbf16>, vector<96x48xf32> -> vector<96x48xf32>
    %180 = arith.addf %173, %179 : vector<96x48xf32>
    %c8_62 = arith.constant 8 : index
    %c0_63 = arith.constant 0 : index
    %c0_64 = arith.constant 0 : index
    %181 = vector.load %arg4[%c8_62, %c0_63, %c0_64] : memref<9x96x48xbf16, #tpu.memory_space<vmem>>, vector<1x96x48xbf16>
    %182 = vector.shape_cast %181 : vector<1x96x48xbf16> to vector<96x48xbf16>
    %183 = vector.extract_strided_slice %126 {offsets = [0, 4], sizes = [48, 44], strides = [1, 1]} : vector<48x48xbf16> to vector<48x44xbf16>
    %184 = vector.extract_strided_slice %126 {offsets = [0, 0], sizes = [48, 4], strides = [1, 1]} : vector<48x48xbf16> to vector<48x4xbf16>
    %185 = tpu.concatenate %183, %184 in 1 : vector<48x44xbf16>, vector<48x4xbf16> -> vector<48x48xbf16>
    %cst_65 = arith.constant dense<0.000000e+00> : vector<96x48xf32>
    %186 = tpu.matmul %182, %185, %cst_65 {dimension_numbers = #tpu.dot_dimension_numbers<[1], [0], [0], [1], [0, 0, 1, 1], [], []>} : vector<96x48xbf16>, vector<48x48xbf16>, vector<96x48xf32> -> vector<96x48xf32>
    %187 = arith.addf %180, %186 : vector<96x48xf32>
    %c0_66 = arith.constant 0 : index
    %c0_67 = arith.constant 0 : index
    %188 = vector.load %arg5[%c0_66, %c0_67] : memref<96x1xf32, #tpu.memory_space<vmem>>, vector<96x1xf32>
    %189 = vector.broadcast %188 : vector<96x1xf32> to vector<96x48xf32>
    %190 = arith.addf %187, %189 : vector<96x48xf32>
    %cst_68 = arith.constant 5.000000e-01 : f32
    %191 = vector.broadcast %cst_68 : f32 to vector<96x48xf32>
    %192 = arith.mulf %191, %190 : vector<96x48xf32>
    %cst_69 = arith.constant 0.707106769 : f32
    %193 = vector.broadcast %cst_69 : f32 to vector<96x48xf32>
    %194 = arith.mulf %190, %193 : vector<96x48xf32>
    %195 = math.absf %194 : vector<96x48xf32>
    %cst_70 = arith.constant 0.327591091 : f32
    %196 = vector.broadcast %cst_70 : f32 to vector<96x48xf32>
    %197 = arith.mulf %196, %195 : vector<96x48xf32>
    %cst_71 = arith.constant 1.000000e+00 : f32
    %198 = vector.broadcast %cst_71 : f32 to vector<96x48xf32>
    %199 = arith.addf %198, %197 : vector<96x48xf32>
    %cst_72 = arith.constant 1.000000e+00 : f32
    %200 = vector.broadcast %cst_72 : f32 to vector<96x48xf32>
    %201 = arith.divf %200, %199 : vector<96x48xf32>
    %cst_73 = arith.constant 1.06140542 : f32
    %202 = vector.broadcast %cst_73 : f32 to vector<96x48xf32>
    %203 = arith.mulf %202, %201 : vector<96x48xf32>
    %cst_74 = arith.constant -1.45315206 : f32
    %204 = vector.broadcast %cst_74 : f32 to vector<96x48xf32>
    %205 = arith.addf %203, %204 : vector<96x48xf32>
    %206 = arith.mulf %205, %201 : vector<96x48xf32>
    %cst_75 = arith.constant 1.42141378 : f32
    %207 = vector.broadcast %cst_75 : f32 to vector<96x48xf32>
    %208 = arith.addf %206, %207 : vector<96x48xf32>
    %209 = arith.mulf %208, %201 : vector<96x48xf32>
    %cst_76 = arith.constant -0.284496725 : f32
    %210 = vector.broadcast %cst_76 : f32 to vector<96x48xf32>
    %211 = arith.addf %209, %210 : vector<96x48xf32>
    %212 = arith.mulf %211, %201 : vector<96x48xf32>
    %cst_77 = arith.constant 0.254829586 : f32
    %213 = vector.broadcast %cst_77 : f32 to vector<96x48xf32>
    %214 = arith.addf %212, %213 : vector<96x48xf32>
    %215 = arith.mulf %214, %201 : vector<96x48xf32>
    %cst_78 = arith.constant 0.000000e+00 : f32
    %216 = vector.broadcast %cst_78 : f32 to vector<96x48xf32>
    %217 = arith.subf %216, %195 : vector<96x48xf32>
    %218 = arith.mulf %217, %195 : vector<96x48xf32>
    %219 = math.exp %218 : vector<96x48xf32>
    %220 = arith.mulf %215, %219 : vector<96x48xf32>
    %cst_79 = arith.constant 1.000000e+00 : f32
    %221 = vector.broadcast %cst_79 : f32 to vector<96x48xf32>
    %222 = arith.subf %221, %220 : vector<96x48xf32>
    %cst_80 = arith.constant 0.000000e+00 : f32
    %223 = vector.broadcast %cst_80 : f32 to vector<96x48xf32>
    %224 = arith.cmpf oge, %194, %223 : vector<96x48xf32>
    %cst_81 = arith.constant 0.000000e+00 : f32
    %225 = vector.broadcast %cst_81 : f32 to vector<96x48xf32>
    %226 = arith.subf %225, %222 : vector<96x48xf32>
    %227 = arith.select %224, %222, %226 : vector<96x48xi1>, vector<96x48xf32>
    %cst_82 = arith.constant 1.000000e+00 : f32
    %228 = vector.broadcast %cst_82 : f32 to vector<96x48xf32>
    %229 = arith.addf %228, %227 : vector<96x48xf32>
    %230 = arith.mulf %192, %229 : vector<96x48xf32>
    %231 = vector.extract_strided_slice %230 {offsets = [0, 4], sizes = [96, 16], strides = [1, 1]} : vector<96x48xf32> to vector<96x16xf32>
    %cst_83 = arith.constant dense<0.000000e+00> : vector<96xf32>
    %232 = vector.multi_reduction <add>, %231, %cst_83 [1] : vector<96x16xf32> to vector<96xf32>
    %233 = vector.shape_cast %232 : vector<96xf32> to vector<96x1xf32>
    %234 = vector.extract_strided_slice %230 {offsets = [0, 28], sizes = [96, 16], strides = [1, 1]} : vector<96x48xf32> to vector<96x16xf32>
    %cst_84 = arith.constant dense<0.000000e+00> : vector<96xf32>
    %235 = vector.multi_reduction <add>, %234, %cst_84 [1] : vector<96x16xf32> to vector<96xf32>
    %236 = vector.shape_cast %235 : vector<96xf32> to vector<96x1xf32>
    %237 = tpu.concatenate %233, %236 in 1 : vector<96x1xf32>, vector<96x1xf32> -> vector<96x2xf32>
    %cst_85 = arith.constant 6.250000e-02 : f32
    %238 = vector.broadcast %cst_85 : f32 to vector<96x2xf32>
    %239 = arith.mulf %237, %238 : vector<96x2xf32>
    %c0_86 = arith.constant 0 : index
    %c0_87 = arith.constant 0 : index
    %240 = vector.load %arg6[%c0_86, %c0_87] : memref<12x96xf32, #tpu.memory_space<vmem>>, vector<12x96xf32>
    %cst_88 = arith.constant dense<0.000000e+00> : vector<12x2xf32>
    %241 = tpu.matmul %240, %239, %cst_88 {dimension_numbers = #tpu.dot_dimension_numbers<[1], [0], [0], [1], [0, 0, 1, 1], [], []>} : vector<12x96xf32>, vector<96x2xf32>, vector<12x2xf32> -> vector<12x2xf32>
    %c0_89 = arith.constant 0 : index
    %c0_90 = arith.constant 0 : index
    %242 = vector.load %arg7[%c0_89, %c0_90] : memref<12x1xf32, #tpu.memory_space<vmem>>, vector<12x1xf32>
    %243 = vector.broadcast %242 : vector<12x1xf32> to vector<12x2xf32>
    %244 = arith.addf %241, %243 : vector<12x2xf32>
    %cst_91 = arith.constant 5.000000e-01 : f32
    %245 = vector.broadcast %cst_91 : f32 to vector<12x2xf32>
    %246 = arith.mulf %245, %244 : vector<12x2xf32>
    %cst_92 = arith.constant 0.707106769 : f32
    %247 = vector.broadcast %cst_92 : f32 to vector<12x2xf32>
    %248 = arith.mulf %244, %247 : vector<12x2xf32>
    %249 = math.absf %248 : vector<12x2xf32>
    %cst_93 = arith.constant 0.327591091 : f32
    %250 = vector.broadcast %cst_93 : f32 to vector<12x2xf32>
    %251 = arith.mulf %250, %249 : vector<12x2xf32>
    %cst_94 = arith.constant 1.000000e+00 : f32
    %252 = vector.broadcast %cst_94 : f32 to vector<12x2xf32>
    %253 = arith.addf %252, %251 : vector<12x2xf32>
    %cst_95 = arith.constant 1.000000e+00 : f32
    %254 = vector.broadcast %cst_95 : f32 to vector<12x2xf32>
    %255 = arith.divf %254, %253 : vector<12x2xf32>
    %cst_96 = arith.constant 1.06140542 : f32
    %256 = vector.broadcast %cst_96 : f32 to vector<12x2xf32>
    %257 = arith.mulf %256, %255 : vector<12x2xf32>
    %cst_97 = arith.constant -1.45315206 : f32
    %258 = vector.broadcast %cst_97 : f32 to vector<12x2xf32>
    %259 = arith.addf %257, %258 : vector<12x2xf32>
    %260 = arith.mulf %259, %255 : vector<12x2xf32>
    %cst_98 = arith.constant 1.42141378 : f32
    %261 = vector.broadcast %cst_98 : f32 to vector<12x2xf32>
    %262 = arith.addf %260, %261 : vector<12x2xf32>
    %263 = arith.mulf %262, %255 : vector<12x2xf32>
    %cst_99 = arith.constant -0.284496725 : f32
    %264 = vector.broadcast %cst_99 : f32 to vector<12x2xf32>
    %265 = arith.addf %263, %264 : vector<12x2xf32>
    %266 = arith.mulf %265, %255 : vector<12x2xf32>
    %cst_100 = arith.constant 0.254829586 : f32
    %267 = vector.broadcast %cst_100 : f32 to vector<12x2xf32>
    %268 = arith.addf %266, %267 : vector<12x2xf32>
    %269 = arith.mulf %268, %255 : vector<12x2xf32>
    %cst_101 = arith.constant 0.000000e+00 : f32
    %270 = vector.broadcast %cst_101 : f32 to vector<12x2xf32>
    %271 = arith.subf %270, %249 : vector<12x2xf32>
    %272 = arith.mulf %271, %249 : vector<12x2xf32>
    %273 = math.exp %272 : vector<12x2xf32>
    %274 = arith.mulf %269, %273 : vector<12x2xf32>
    %cst_102 = arith.constant 1.000000e+00 : f32
    %275 = vector.broadcast %cst_102 : f32 to vector<12x2xf32>
    %276 = arith.subf %275, %274 : vector<12x2xf32>
    %cst_103 = arith.constant 0.000000e+00 : f32
    %277 = vector.broadcast %cst_103 : f32 to vector<12x2xf32>
    %278 = arith.cmpf oge, %248, %277 : vector<12x2xf32>
    %cst_104 = arith.constant 0.000000e+00 : f32
    %279 = vector.broadcast %cst_104 : f32 to vector<12x2xf32>
    %280 = arith.subf %279, %276 : vector<12x2xf32>
    %281 = arith.select %278, %276, %280 : vector<12x2xi1>, vector<12x2xf32>
    %cst_105 = arith.constant 1.000000e+00 : f32
    %282 = vector.broadcast %cst_105 : f32 to vector<12x2xf32>
    %283 = arith.addf %282, %281 : vector<12x2xf32>
    %284 = arith.mulf %246, %283 : vector<12x2xf32>
    %c0_106 = arith.constant 0 : index
    %c0_107 = arith.constant 0 : index
    %285 = vector.load %arg8[%c0_106, %c0_107] : memref<96x12xf32, #tpu.memory_space<vmem>>, vector<96x12xf32>
    %cst_108 = arith.constant dense<0.000000e+00> : vector<96x2xf32>
    %286 = tpu.matmul %285, %284, %cst_108 {dimension_numbers = #tpu.dot_dimension_numbers<[1], [0], [0], [1], [0, 0, 1, 1], [], []>} : vector<96x12xf32>, vector<12x2xf32>, vector<96x2xf32> -> vector<96x2xf32>
    %c0_109 = arith.constant 0 : index
    %c0_110 = arith.constant 0 : index
    %287 = vector.load %arg9[%c0_109, %c0_110] : memref<96x1xf32, #tpu.memory_space<vmem>>, vector<96x1xf32>
    %288 = vector.broadcast %287 : vector<96x1xf32> to vector<96x2xf32>
    %289 = arith.addf %286, %288 : vector<96x2xf32>
    %290 = arith.negf %289 : vector<96x2xf32>
    %291 = math.exp %290 : vector<96x2xf32>
    %cst_111 = arith.constant 1.000000e+00 : f32
    %292 = vector.broadcast %cst_111 : f32 to vector<96x2xf32>
    %293 = arith.addf %292, %291 : vector<96x2xf32>
    %294 = arith.divf %292, %293 : vector<96x2xf32>
    %295 = vector.extract_strided_slice %230 {offsets = [0, 4], sizes = [96, 16], strides = [1, 1]} : vector<96x48xf32> to vector<96x16xf32>
    %296 = vector.extract_strided_slice %294 {offsets = [0, 0], sizes = [96, 1], strides = [1, 1]} : vector<96x2xf32> to vector<96x1xf32>
    %297 = vector.broadcast %296 : vector<96x1xf32> to vector<96x16xf32>
    %298 = arith.mulf %295, %297 : vector<96x16xf32>
    %299 = arith.truncf %298 : vector<96x16xf32> to vector<96x16xbf16>
    %c0_112 = arith.constant 0 : index
    %c0_113 = arith.constant 0 : index
    %300 = vector.load %arg10[%c0_112, %c0_113] : memref<32x96xbf16, #tpu.memory_space<vmem>>, vector<32x96xbf16>
    %cst_114 = arith.constant dense<0.000000e+00> : vector<32x16xf32>
    %301 = tpu.matmul %300, %299, %cst_114 {dimension_numbers = #tpu.dot_dimension_numbers<[1], [0], [0], [1], [0, 0, 1, 1], [], []>} : vector<32x96xbf16>, vector<96x16xbf16>, vector<32x16xf32> -> vector<32x16xf32>
    %c0_115 = arith.constant 0 : index
    %c0_116 = arith.constant 0 : index
    %302 = vector.load %arg11[%c0_115, %c0_116] : memref<32x1xf32, #tpu.memory_space<vmem>>, vector<32x1xf32>
    %303 = vector.broadcast %302 : vector<32x1xf32> to vector<32x16xf32>
    %304 = arith.addf %301, %303 : vector<32x16xf32>
    %cst_117 = arith.constant 5.000000e-01 : f32
    %305 = vector.broadcast %cst_117 : f32 to vector<32x16xf32>
    %306 = arith.mulf %305, %304 : vector<32x16xf32>
    %cst_118 = arith.constant 0.707106769 : f32
    %307 = vector.broadcast %cst_118 : f32 to vector<32x16xf32>
    %308 = arith.mulf %304, %307 : vector<32x16xf32>
    %309 = math.absf %308 : vector<32x16xf32>
    %cst_119 = arith.constant 0.327591091 : f32
    %310 = vector.broadcast %cst_119 : f32 to vector<32x16xf32>
    %311 = arith.mulf %310, %309 : vector<32x16xf32>
    %cst_120 = arith.constant 1.000000e+00 : f32
    %312 = vector.broadcast %cst_120 : f32 to vector<32x16xf32>
    %313 = arith.addf %312, %311 : vector<32x16xf32>
    %cst_121 = arith.constant 1.000000e+00 : f32
    %314 = vector.broadcast %cst_121 : f32 to vector<32x16xf32>
    %315 = arith.divf %314, %313 : vector<32x16xf32>
    %cst_122 = arith.constant 1.06140542 : f32
    %316 = vector.broadcast %cst_122 : f32 to vector<32x16xf32>
    %317 = arith.mulf %316, %315 : vector<32x16xf32>
    %cst_123 = arith.constant -1.45315206 : f32
    %318 = vector.broadcast %cst_123 : f32 to vector<32x16xf32>
    %319 = arith.addf %317, %318 : vector<32x16xf32>
    %320 = arith.mulf %319, %315 : vector<32x16xf32>
    %cst_124 = arith.constant 1.42141378 : f32
    %321 = vector.broadcast %cst_124 : f32 to vector<32x16xf32>
    %322 = arith.addf %320, %321 : vector<32x16xf32>
    %323 = arith.mulf %322, %315 : vector<32x16xf32>
    %cst_125 = arith.constant -0.284496725 : f32
    %324 = vector.broadcast %cst_125 : f32 to vector<32x16xf32>
    %325 = arith.addf %323, %324 : vector<32x16xf32>
    %326 = arith.mulf %325, %315 : vector<32x16xf32>
    %cst_126 = arith.constant 0.254829586 : f32
    %327 = vector.broadcast %cst_126 : f32 to vector<32x16xf32>
    %328 = arith.addf %326, %327 : vector<32x16xf32>
    %329 = arith.mulf %328, %315 : vector<32x16xf32>
    %cst_127 = arith.constant 0.000000e+00 : f32
    %330 = vector.broadcast %cst_127 : f32 to vector<32x16xf32>
    %331 = arith.subf %330, %309 : vector<32x16xf32>
    %332 = arith.mulf %331, %309 : vector<32x16xf32>
    %333 = math.exp %332 : vector<32x16xf32>
    %334 = arith.mulf %329, %333 : vector<32x16xf32>
    %cst_128 = arith.constant 1.000000e+00 : f32
    %335 = vector.broadcast %cst_128 : f32 to vector<32x16xf32>
    %336 = arith.subf %335, %334 : vector<32x16xf32>
    %cst_129 = arith.constant 0.000000e+00 : f32
    %337 = vector.broadcast %cst_129 : f32 to vector<32x16xf32>
    %338 = arith.cmpf oge, %308, %337 : vector<32x16xf32>
    %cst_130 = arith.constant 0.000000e+00 : f32
    %339 = vector.broadcast %cst_130 : f32 to vector<32x16xf32>
    %340 = arith.subf %339, %336 : vector<32x16xf32>
    %341 = arith.select %338, %336, %340 : vector<32x16xi1>, vector<32x16xf32>
    %cst_131 = arith.constant 1.000000e+00 : f32
    %342 = vector.broadcast %cst_131 : f32 to vector<32x16xf32>
    %343 = arith.addf %342, %341 : vector<32x16xf32>
    %344 = arith.mulf %306, %343 : vector<32x16xf32>
    %345 = vector.extract_strided_slice %230 {offsets = [0, 28], sizes = [96, 16], strides = [1, 1]} : vector<96x48xf32> to vector<96x16xf32>
    %346 = vector.extract_strided_slice %294 {offsets = [0, 1], sizes = [96, 1], strides = [1, 1]} : vector<96x2xf32> to vector<96x1xf32>
    %347 = vector.broadcast %346 : vector<96x1xf32> to vector<96x16xf32>
    %348 = arith.mulf %345, %347 : vector<96x16xf32>
    %349 = arith.truncf %348 : vector<96x16xf32> to vector<96x16xbf16>
    %c0_132 = arith.constant 0 : index
    %c0_133 = arith.constant 0 : index
    %350 = vector.load %arg10[%c0_132, %c0_133] : memref<32x96xbf16, #tpu.memory_space<vmem>>, vector<32x96xbf16>
    %cst_134 = arith.constant dense<0.000000e+00> : vector<32x16xf32>
    %351 = tpu.matmul %350, %349, %cst_134 {dimension_numbers = #tpu.dot_dimension_numbers<[1], [0], [0], [1], [0, 0, 1, 1], [], []>} : vector<32x96xbf16>, vector<96x16xbf16>, vector<32x16xf32> -> vector<32x16xf32>
    %c0_135 = arith.constant 0 : index
    %c0_136 = arith.constant 0 : index
    %352 = vector.load %arg11[%c0_135, %c0_136] : memref<32x1xf32, #tpu.memory_space<vmem>>, vector<32x1xf32>
    %353 = vector.broadcast %352 : vector<32x1xf32> to vector<32x16xf32>
    %354 = arith.addf %351, %353 : vector<32x16xf32>
    %cst_137 = arith.constant 5.000000e-01 : f32
    %355 = vector.broadcast %cst_137 : f32 to vector<32x16xf32>
    %356 = arith.mulf %355, %354 : vector<32x16xf32>
    %cst_138 = arith.constant 0.707106769 : f32
    %357 = vector.broadcast %cst_138 : f32 to vector<32x16xf32>
    %358 = arith.mulf %354, %357 : vector<32x16xf32>
    %359 = math.absf %358 : vector<32x16xf32>
    %cst_139 = arith.constant 0.327591091 : f32
    %360 = vector.broadcast %cst_139 : f32 to vector<32x16xf32>
    %361 = arith.mulf %360, %359 : vector<32x16xf32>
    %cst_140 = arith.constant 1.000000e+00 : f32
    %362 = vector.broadcast %cst_140 : f32 to vector<32x16xf32>
    %363 = arith.addf %362, %361 : vector<32x16xf32>
    %cst_141 = arith.constant 1.000000e+00 : f32
    %364 = vector.broadcast %cst_141 : f32 to vector<32x16xf32>
    %365 = arith.divf %364, %363 : vector<32x16xf32>
    %cst_142 = arith.constant 1.06140542 : f32
    %366 = vector.broadcast %cst_142 : f32 to vector<32x16xf32>
    %367 = arith.mulf %366, %365 : vector<32x16xf32>
    %cst_143 = arith.constant -1.45315206 : f32
    %368 = vector.broadcast %cst_143 : f32 to vector<32x16xf32>
    %369 = arith.addf %367, %368 : vector<32x16xf32>
    %370 = arith.mulf %369, %365 : vector<32x16xf32>
    %cst_144 = arith.constant 1.42141378 : f32
    %371 = vector.broadcast %cst_144 : f32 to vector<32x16xf32>
    %372 = arith.addf %370, %371 : vector<32x16xf32>
    %373 = arith.mulf %372, %365 : vector<32x16xf32>
    %cst_145 = arith.constant -0.284496725 : f32
    %374 = vector.broadcast %cst_145 : f32 to vector<32x16xf32>
    %375 = arith.addf %373, %374 : vector<32x16xf32>
    %376 = arith.mulf %375, %365 : vector<32x16xf32>
    %cst_146 = arith.constant 0.254829586 : f32
    %377 = vector.broadcast %cst_146 : f32 to vector<32x16xf32>
    %378 = arith.addf %376, %377 : vector<32x16xf32>
    %379 = arith.mulf %378, %365 : vector<32x16xf32>
    %cst_147 = arith.constant 0.000000e+00 : f32
    %380 = vector.broadcast %cst_147 : f32 to vector<32x16xf32>
    %381 = arith.subf %380, %359 : vector<32x16xf32>
    %382 = arith.mulf %381, %359 : vector<32x16xf32>
    %383 = math.exp %382 : vector<32x16xf32>
    %384 = arith.mulf %379, %383 : vector<32x16xf32>
    %cst_148 = arith.constant 1.000000e+00 : f32
    %385 = vector.broadcast %cst_148 : f32 to vector<32x16xf32>
    %386 = arith.subf %385, %384 : vector<32x16xf32>
    %cst_149 = arith.constant 0.000000e+00 : f32
    %387 = vector.broadcast %cst_149 : f32 to vector<32x16xf32>
    %388 = arith.cmpf oge, %358, %387 : vector<32x16xf32>
    %cst_150 = arith.constant 0.000000e+00 : f32
    %389 = vector.broadcast %cst_150 : f32 to vector<32x16xf32>
    %390 = arith.subf %389, %386 : vector<32x16xf32>
    %391 = arith.select %388, %386, %390 : vector<32x16xi1>, vector<32x16xf32>
    %cst_151 = arith.constant 1.000000e+00 : f32
    %392 = vector.broadcast %cst_151 : f32 to vector<32x16xf32>
    %393 = arith.addf %392, %391 : vector<32x16xf32>
    %394 = arith.mulf %356, %393 : vector<32x16xf32>
    %395 = tpu.concatenate %344, %394 in 1 : vector<32x16xf32>, vector<32x16xf32> -> vector<32x32xf32>
    %c0_152 = arith.constant 0 : index
    %c0_153 = arith.constant 0 : index
    %c0_154 = arith.constant 0 : index
    %396 = vector.load %arg12[%c0_152, %c0_153, %c0_154] : memref<1x32x32xf32, #tpu.memory_space<vmem>>, vector<1x32x32xf32>
    %397 = vector.shape_cast %396 : vector<1x32x32xf32> to vector<32x32xf32>
    %398 = vector.shape_cast %395 : vector<32x32xf32> to vector<1x32x32xf32>
    tpu.vector_store %arg12[%c0_152, %c0_153, %c0_154], %398 {strides = array<i32>} : memref<1x32x32xf32, #tpu.memory_space<vmem>>, vector<1x32x32xf32>,
    return
  }
  func.func @transform_0(%arg0: i32) -> (i32, i32, i32) {
    %c0_i32 = arith.constant 0 : i32
    %c0_i32_0 = arith.constant 0 : i32
    %c0_i32_1 = arith.constant 0 : i32
    return %arg0, %c0_i32, %c0_i32_0 : i32, i32, i32
  }
  func.func @transform_1(%arg0: i32) -> (i32, i32) {
    %c0_i32 = arith.constant 0 : i32
    %c0_i32_0 = arith.constant 0 : i32
    %c0_i32_1 = arith.constant 0 : i32
    return %c0_i32, %c0_i32_0 : i32, i32
  }
  func.func @transform_2(%arg0: i32) -> (i32, i32) {
    %c0_i32 = arith.constant 0 : i32
    %c0_i32_0 = arith.constant 0 : i32
    %c0_i32_1 = arith.constant 0 : i32
    return %c0_i32, %c0_i32_0 : i32, i32
  }
  func.func @transform_3(%arg0: i32) -> (i32, i32, i32) {
    %c0_i32 = arith.constant 0 : i32
    %c0_i32_0 = arith.constant 0 : i32
    %c0_i32_1 = arith.constant 0 : i32
    %c0_i32_2 = arith.constant 0 : i32
    return %c0_i32, %c0_i32_0, %c0_i32_1 : i32, i32, i32
  }
  func.func @transform_4(%arg0: i32) -> (i32, i32) {
    %c0_i32 = arith.constant 0 : i32
    %c0_i32_0 = arith.constant 0 : i32
    %c0_i32_1 = arith.constant 0 : i32
    return %c0_i32, %c0_i32_0 : i32, i32
  }
  func.func @transform_5(%arg0: i32) -> (i32, i32) {
    %c0_i32 = arith.constant 0 : i32
    %c0_i32_0 = arith.constant 0 : i32
    %c0_i32_1 = arith.constant 0 : i32
    return %c0_i32, %c0_i32_0 : i32, i32
  }
  func.func @transform_6(%arg0: i32) -> (i32, i32) {
    %c0_i32 = arith.constant 0 : i32
    %c0_i32_0 = arith.constant 0 : i32
    %c0_i32_1 = arith.constant 0 : i32
    return %c0_i32, %c0_i32_0 : i32, i32
  }
  func.func @transform_7(%arg0: i32) -> (i32, i32) {
    %c0_i32 = arith.constant 0 : i32
    %c0_i32_0 = arith.constant 0 : i32
    %c0_i32_1 = arith.constant 0 : i32
    return %c0_i32, %c0_i32_0 : i32, i32
  }
  func.func @transform_8(%arg0: i32) -> (i32, i32) {
    %c0_i32 = arith.constant 0 : i32
    %c0_i32_0 = arith.constant 0 : i32
    %c0_i32_1 = arith.constant 0 : i32
    return %c0_i32, %c0_i32_0 : i32, i32
  }
  func.func @transform_9(%arg0: i32) -> (i32, i32) {
    %c0_i32 = arith.constant 0 : i32
    %c0_i32_0 = arith.constant 0 : i32
    %c0_i32_1 = arith.constant 0 : i32
    return %c0_i32, %c0_i32_0 : i32, i32
  }
  func.func @transform_10(%arg0: i32) -> (i32, i32) {
    %c0_i32 = arith.constant 0 : i32
    %c0_i32_0 = arith.constant 0 : i32
    %c0_i32_1 = arith.constant 0 : i32
    return %c0_i32, %c0_i32_0 : i32, i32
  }
  func.func @transform_11(%arg0: i32) -> (i32, i32, i32) {
    %c0_i32 = arith.constant 0 : i32
    %c0_i32_0 = arith.constant 0 : i32
    %c0_i32_1 = arith.constant 0 : i32
    return %arg0, %c0_i32, %c0_i32_0 : i32, i32, i32
  }
}

</mosaic_0001>

<bundles_post_ra>
// kernel: tpu_custom_call.1
= control target key start
LH: loop header
LB: loop body
LE: loop exit
PB: predicated region body
PF: predicated region fallthrough
CT: control target
= control target key end

     0   :  { %v6558_v1 = vmov 1   ;;  %v6556_v2 = vmov 0   ;;  %v4971_v5 = vmov 2   ;;  %s4972_s23 = smov 4   ;;  %s4974_s30 = smov 83   ;;  %v4976_v9 = vmov 3   ;;  %s6542_s0 = inlined_call_operand.vmem [shape: f32[1,1,48], index: 0, kind: input, shape index: {}]   ;;  %s6543_s1 = inlined_call_operand.vmem [shape: f32[48,9], index: 1, kind: input, shape index: {}]   ;;  %s6544_s2 = inlined_call_operand.vmem [shape: f32[48,1], index: 2, kind: input, shape index: {}]   ;;  %s6545_s3 = inlined_call_operand.vmem [shape: bf16[9,96,48], index: 3, kind: input, shape index: {}]   ;;  %s6546_s4 = inlined_call_operand.vmem [shape: f32[96,1], index: 4, kind: input, shape index: {}]   ;;  %s6547_s5 = inlined_call_operand.vmem [shape: f32[12,96], index: 5, kind: input, shape index: {}]   ;;  %s6548_s6 = inlined_call_operand.vmem [shape: f32[12,1], index: 6, kind: input, shape index: {}]   ;;  %s6549_s7 = inlined_call_operand.vmem [shape: f32[96,12], index: 7, kind: input, shape index: {}]   ;;  %s6550_s8 = inlined_call_operand.vmem [shape: f32[96,1], index: 8, kind: input, shape index: {}]   ;;  %s6551_s9 = inlined_call_operand.vmem [shape: bf16[32,96], index: 9, kind: input, shape index: {}]   ;;  %s6552_s10 = inlined_call_operand.vmem [shape: f32[32,1], index: 10, kind: input, shape index: {}]   ;;  %s6553_s11 = inlined_call_operand.hbm [shape: f32[1,32,32], index: 11, kind: output, shape index: {}]  }
   0x1   :  { %v5065_v0 = vld [vmem:[%s6543_s1] sm:$0xff]  ;;  %4685 = vset.pattern.permute.xlu1 %v6558_v1  ;;  %4684 = vset.pattern.permute.xlu0 %v6556_v2  ;;  %v5074_v3 = vld [vmem:[%s6543_s1 + $0x8] sm:$0xff]  ;;  %v5089_v6 = vld [vmem:[%s6543_s1 + $0x18] sm:$0xff]  ;;  %s4975_s12 = smov 3   ;;  %s4977_s13 = smov 1  }
   0x2   :  { %115 = vperm.xlu1 %4685, %v5065_v0   ;;  %62 = vperm.xlu0 %4684, %v5065_v0   ;;  %v5081_v4 = vld [vmem:[%s6542_s0] ss:$0 sm:$0xff]  ;;  %v5096_v7 = vld [vmem:[%s6543_s1 + $0x10] sm:$0xff]  ;;  %s4973_s0 = smov 84   ;;  %s4978_s14 = smov 82  }
   0x3   :  { %v5105_v8 = vld [vmem:[%s6543_s1 + $0x20] sm:$0xff]  ;;  %s4979_s15 = smov 2  }
   0x6   :  { %119 = vperm.xlu1 %4685, %v5074_v3   ;;  %67 = vperm.xlu0 %4684, %v5074_v3  }
   0xa   :  { %4686 = vset.pattern.permute.xlu1 %v4971_v5  ;;  %55 = vrot.lane.b32.xlu0 %v5081_v4, %s4972_s23 }
   0xb   :  { %167 = vperm.xlu1 %4686, %v5074_v3  }
   0xe   :  { %77 = vperm.xlu0 %4684, %v5089_v6  }
   0xf   :  { %52 = vrot.lane.b32.xlu1 %v5081_v4, %s4973_s0 }
  0x10   :  { %4687 = vset.pattern.permute.xlu1 %v6556_v2 }
  0x12   :  { %4688 = vset.pattern.permute.xlu0 %v6558_v1 }
  0x13   :  { %72 = vperm.xlu1 %4687, %v5096_v7   ;;  %123 = vperm.xlu0 %4688, %v5096_v7  }
  0x17   :  { %106 = vrot.lane.b32.xlu1 %v5081_v4, %s4974_s30  ;;  %131 = vperm.xlu0 %4688, %v5105_v8  }
  0x18   :  { %4689 = vset.pattern.permute.xlu1 %v6558_v1 }
  0x1b   :  { %109 = vrot.lane.b32.xlu1 %v5081_v4, %s4975_s12  ;;  %4694 = vset.pattern.permute.xlu0 %v4971_v5 }
  0x1c   :  { %163 = vperm.xlu0 %4694, %v5065_v0  }
  0x1f   :  { %127 = vperm.xlu1 %4689, %v5089_v6  }
  0x20   :  { %171 = vperm.xlu0 %4694, %v5096_v7  }
  0x23   :  { %4690 = vset.pattern.permute.xlu1 %v4976_v9 }
  0x24   :  { %211 = vperm.xlu1 %4690, %v5065_v0   ;;  %205 = vrot.lane.b32.xlu0 %v5081_v4, %s4977_s13 }
  0x28   :  { %154 = vrot.lane.b32.xlu1 %v5081_v4, %s4978_s14  ;;  %179 = vperm.xlu0 %4694, %v5105_v8  }
  0x29   :  { %4691 = vset.pattern.permute.xlu1 %v4971_v5 }
  0x2c   :  { %157 = vrot.lane.b32.xlu1 %v5081_v4, %s4979_s15  ;;  %4698 = vset.pattern.permute.xlu0 %v4976_v9 }
  0x2d   :  { %215 = vperm.xlu0 %4698, %v5074_v3  }
  0x2e   :  { %16 = vsyncpa [#allocation3], 0  ;;  %v4980_v10 = vmov 4   ;;  %v5143_v11 = vld [vmem:[%s6543_s1 + $0x28] sm:$0xff]  ;;  %s4981_s18 = smov 47   ;;  %s4982_s19 = smov 81   ;;  %v90_v16 = vlaneseq }
  0x2f   :  { %s4983_s1 = smov 46   ;;  %v4984_v12 = vmov 6   ;;  %v4985_v13 = vmov 5   ;;  %s4986_s20 = smov 45   ;;  %v4987_v14 = vmov 7   ;;  %v4989_v15 = vmov 8  }
  0x30   :  { %175 = vperm.xlu1 %4691, %v5089_v6   ;;  %s6554_s21 = smov 124   ;;  %v480_v17 = vand.u32 127, %v90_v16  ;;  %v493_v18 = vld [vmem:[%s6544_s2 + $0x8] sm:$0xff]  ;;  %s4990_s25 = smov 127   ;;  %v495_v19 = vld [vmem:[%s6544_s2 + $0x18] sm:$0xff]  ;;  %v4991_v20 = vmov 0.0  }
  0x31   :  { %223 = vperm.xlu0 %4698, %v5089_v6   ;;  %s4992_s28 = smov 24   ;;  %s4993_s29 = smov 126   ;;  %v492_v39 = vld [vmem:[%s6544_s2] sm:$0xff]  ;;  %v494_v49 = vld [vmem:[%s6544_s2 + $0x10] sm:$0xff]  ;;  %v497_v53 = vld [vmem:[%s6544_s2 + $0x28] sm:$0xff]  ;;  %vm112_vm3 = vcmask 23552  }
  0x32   :  { %vm481_vm0 = vcmp.ge.s32.totalorder %v480_v17, 4  ;;  %vm482_vm1 = vcmp.lt.s32.totalorder %v480_v17, 20  ;;  %s4994_s16 = smov 125   ;;  %s4995_s17 = smov 44   ;;  %v496_v51 = vld [vmem:[%s6544_s2 + $0x20] sm:$0xff]  ;;  %vm58_vm4 = vcmask 31744  }
  0x33   :  { %vm483_vm2 = vmand %vm481_vm0, %vm482_vm1  ;;  %vm160_vm5 = vcmask 15360   ;;  %vm208_vm6 = vcmask 7168   ;;  %vm293_vm7 = vcmask 384000   ;;  %vm341_vm8 = vcmask 375808  }
  0x34   :  { %4692 = vset.pattern.permute.xlu1 %v4980_v10  ;;  %v5193_v21 = vsel %vm483_vm2, 1.0, %v4991_v20  ;;  %vm389_vm9 = vcmask 367616   ;;  %vm437_vm10 = vcmask 359424   ;;  %vm490_vm11 = vcmask 195584  }
  0x35   :  { %251 = vperm.xlu1 %4692, %v5065_v0   ;;  %227 = vperm.xlu0 %4698, %v5105_v8   ;;  %6561 = vst [vmem:[#allocation5_spill] sm:$0xff] %v5193_v21  ;;  %vm815_vm2 = vcmask 392192  }
  0x39   :  { %4693 = vset.pattern.permute.xlu1 %v6556_v2  ;;  %4702 = vset.pattern.permute.xlu0 %v4980_v10 }
  0x3a   :  { %82 = vperm.xlu1 %4693, %v5105_v8   ;;  %255 = vperm.xlu0 %4702, %v5074_v3  }
  0x3e   :  { %87 = vperm.xlu1 %4693, %v5143_v11   ;;  %263 = vperm.xlu0 %4702, %v5089_v6  }
  0x42   :  { %4695 = vset.pattern.permute.xlu1 %v6558_v1  ;;  %290 = vrot.lane.b32.xlu0 %v5081_v4, %s4981_s18 }
  0x43   :  { %135 = vperm.xlu1 %4695, %v5143_v11  }
  0x46   :  { %267 = vperm.xlu0 %4702, %v5105_v8  }
  0x47   :  { %202 = vrot.lane.b32.xlu1 %v5081_v4, %s4982_s19 }
  0x48   :  { %4696 = vset.pattern.permute.xlu1 %v4976_v9 }
  0x4a   :  { %338 = vrot.lane.b32.xlu0 %v5081_v4, %s4983_s1 }
  0x4b   :  { %219 = vperm.xlu1 %4696, %v5096_v7   ;;  %4708 = vset.pattern.permute.xlu0 %v4984_v12 }
  0x4e   :  { %356 = vperm.xlu0 %4708, %v5089_v6  }
  0x4f   :  { %4697 = vset.pattern.permute.xlu1 %v4985_v13 }
  0x50   :  { %296 = vperm.xlu1 %4697, %v5065_v0  }
  0x52   :  { %4709 = vset.pattern.permute.xlu0 %v4985_v13 }
  0x53   :  { %308 = vperm.xlu0 %4709, %v5089_v6  }
  0x54   :  { %300 = vperm.xlu1 %4697, %v5074_v3  }
  0x57   :  { %312 = vperm.xlu0 %4709, %v5105_v8  }
  0x58   :  { %4699 = vset.pattern.permute.xlu1 %v4971_v5 }
  0x59   :  { %183 = vperm.xlu1 %4699, %v5143_v11  }
  0x5b   :  { %386 = vrot.lane.b32.xlu0 %v5081_v4, %s4986_s20 }
  0x5c   :  { %4713 = vset.pattern.permute.xlu0 %v4987_v14 }
  0x5d   :  { %4700 = vset.pattern.permute.xlu1 %v4980_v10 }
  0x5e   :  { %259 = vperm.xlu1 %4700, %v5096_v7  }
  0x5f   :  { %404 = vperm.xlu0 %4713, %v5089_v6  }
  0x62   :  { %4701 = vset.pattern.permute.xlu1 %v4984_v12 }
  0x63   :  { %344 = vperm.xlu1 %4701, %v5065_v0   ;;  %431 = vrot.lane.b32.xlu0 %v5081_v4, %s6554_s21 }
  0x64   :  { %4715 = vset.pattern.permute.xlu0 %v4989_v15 }
  0x67   :  { %348 = vperm.xlu1 %4701, %v5074_v3   ;;  %448 = vperm.xlu0 %4715, %v5096_v7  }
  0x6b   :  { %4703 = vset.pattern.permute.xlu1 %v4976_v9  ;;  %456 = vperm.xlu0 %4715, %v5105_v8  }
  0x6c   :  { %231 = vperm.xlu1 %4703, %v5143_v11  }
  0x6f   :  { %4719 = vset.pattern.permute.xlu0 %v6556_v2 }
  0x70   :  { %287 = vrot.lane.b32.xlu1 %v5081_v4, %s4990_s25  ;;  %505 = vperm.xlu0 %4719, %v493_v18  }
  0x71   :  { %4704 = vset.pattern.permute.xlu1 %v4985_v13 }
  0x74   :  { %304 = vperm.xlu1 %4704, %v5096_v7   ;;  %515 = vperm.xlu0 %4719, %v495_v19  }
  0x78   :  { %4705 = vset.pattern.permute.xlu1 %v4987_v14  ;;  %487 = vrot.lane.b32.xlu0 %v5193_v21, %s4992_s28 }
  0x79   :  { %392 = vperm.xlu1 %4705, %v5065_v0  }
  0x7d   :  { %396 = vperm.xlu1 %4705, %v5074_v3  }
  0x81   :  { %v5199_v22 = vpop.permute.xlu1 %115  ;;  %4706 = vset.pattern.permute.xlu1 %v4980_v10  ;;  %v5220_v28 = vpop.permute.xlu0 %62 }
  0x82   :  { %271 = vperm.xlu1 %4706, %v5143_v11  }
  0x85   :  { %v5203_v23 = vpop.permute.xlu1 %119  ;;  %v5228_v30 = vpop.permute.xlu0 %67 }
  0x86   :  { %335 = vrot.lane.b32.xlu1 %v5081_v4, %s4993_s29 }
  0x87   :  { %4707 = vset.pattern.permute.xlu1 %v4984_v12 }
  0x89   :  { %v5235_v33 = vpop.permute.xlu0 %55 }
  0x8a   :  { %v5208_v24 = vpop.permute.xlu1 %167  ;;  %352 = vperm.xlu1 %4707, %v5096_v7  }
  0x8d   :  { %v5242_v35 = vpop.permute.xlu0 %77 }
  0x8e   :  { %4710 = vset.pattern.permute.xlu1 %v4989_v15  ;;  %v5212_v25 = vpop.permute.xlu1 %52 }
  0x8f   :  { %440 = vperm.xlu1 %4710, %v5065_v0   ;;  %v59_v21 = vsel %vm58_vm4, %v5212_v25, %v5235_v33 }
  0x92   :  { %v5215_v26 = vpop.permute.xlu1 %72  ;;  %v5248_v37 = vpop.permute.xlu0 %123 }
  0x93   :  { %444 = vperm.xlu1 %4710, %v5074_v3  }
  0x96   :  { %v5218_v27 = vpop.permute.xlu1 %106  ;;  %v5257_v40 = vpop.permute.xlu0 %131 }
  0x97   :  { %4711 = vset.pattern.permute.xlu1 %v4985_v13 }
  0x98   :  { %316 = vperm.xlu1 %4711, %v5143_v11  }
  0x9a   :  { %v5223_v29 = vpop.permute.xlu1 %109 }
  0x9b   :  { %v5264_v43 = vpop.permute.xlu0 %163 }
  0x9c   :  { %383 = vrot.lane.b32.xlu1 %v5081_v4, %s4994_s16 }
  0x9d   :  { %4712 = vset.pattern.permute.xlu1 %v4987_v14 }
  0x9e   :  { %v5230_v31 = vpop.permute.xlu1 %127 }
  0x9f   :  { %v5271_v45 = vpop.permute.xlu0 %171 }
  0xa0   :  { %400 = vperm.xlu1 %4712, %v5096_v7  }
  0xa3   :  { %v5233_v32 = vpop.permute.xlu1 %211  ;;  %v206_v47 = vpop.permute.xlu0 %205 }
  0xa4   :  { %4714 = vset.pattern.permute.xlu1 %v4984_v12 }
  0xa5   :  { %360 = vperm.xlu1 %4714, %v5105_v8  }
  0xa7   :  { %v5239_v34 = vpop.permute.xlu1 %154  ;;  %v5286_v52 = vpop.permute.xlu0 %179 }
  0xa9   :  { %364 = vperm.xlu1 %4714, %v5143_v11  }
  0xab   :  { %v5244_v36 = vpop.permute.xlu1 %157 }
  0xac   :  { %v216_v55 = vpop.permute.xlu0 %215 }
  0xad   :  { %434 = vrot.lane.b32.xlu1 %v5081_v4, %s4995_s17 }
  0xae   :  { %4716 = vset.pattern.permute.xlu1 %v4989_v15 }
  0xaf   :  { %v5251_v38 = vpop.permute.xlu1 %175 }
  0xb0   :  { %v5295_v57 = vpop.permute.xlu0 %223 }
  0xb1   :  { %452 = vperm.xlu1 %4716, %v5089_v6  }
  0xb4   :  { %v5259_v41 = vpop.permute.xlu1 %251  ;;  %v5301_v60 = vpop.permute.xlu0 %227 }
  0xb5   :  { %4717 = vset.pattern.permute.xlu1 %v6556_v2 }
  0xb6   :  { %500 = vperm.xlu1 %4717, %v492_v39  }
  0xb9   :  { %v5262_v42 = vpop.permute.xlu1 %82  ;;  %v5305_v62 = vpop.permute.xlu0 %255 }
  0xba   :  { %4718 = vset.pattern.permute.xlu1 %v4987_v14 }
  0xbb   :  { %408 = vperm.xlu1 %4718, %v5105_v8  }
  0xbd   :  { %v5268_v44 = vpop.permute.xlu1 %87  ;;  %v5309_v0 = vpop.permute.xlu0 %263 }
  0xbf   :  { %412 = vperm.xlu1 %4718, %v5143_v11  }
  0xc1   :  { %v291_v6 = vpop.permute.xlu0 %290 }
  0xc2   :  { %v5273_v46 = vpop.permute.xlu1 %135 }
  0xc3   :  { %4720 = vset.pattern.permute.xlu1 %v4989_v15 }
  0xc4   :  { %460 = vperm.xlu1 %4720, %v5143_v11  }
  0xc5   :  { %v5315_v8 = vpop.permute.xlu0 %267 }
  0xc6   :  { %v203_v48 = vpop.permute.xlu1 %202 }
  0xc8   :  { %4721 = vset.pattern.permute.xlu1 %v6556_v2 }
  0xc9   :  { %510 = vperm.xlu1 %4721, %v494_v49   ;;  %v339_v10 = vpop.permute.xlu0 %338  ;;  %v91_v49 = vshrl.u32 %v90_v16, 7  ;;  %v161_v16 = vsel %vm160_vm5, %v5239_v34, %v5244_v36 }
  0xca   :  { %v5281_v50 = vpop.permute.xlu1 %219 }
  0xcb   :  { %v5341_v1 = vsub.s32 0, %v91_v49 }
  0xcd   :  { %520 = vperm.xlu1 %4721, %v496_v51   ;;  %v5321_v12 = vpop.permute.xlu0 %356  ;;  %v5357_v49 = vrot.slane %v161_v16, %v5341_v1 }
  0xcf   :  { %v5291_v54 = vpop.permute.xlu1 %296 }
  0xd1   :  { %525 = vperm.xlu1 %4721, %v497_v53   ;;  %v113_v53 = vsel %vm112_vm3, %v5218_v27, %v5223_v29  ;;  %v5354_v29 = vrot.slane %v59_v21, %v5341_v1 }
  0xd2   :  { %v309_v15 = vpop.permute.xlu0 %308 }
  0xd3   :  { %v5293_v56 = vpop.permute.xlu1 %300  ;;  %v95_v21 = vmul.f32 %v5354_v29, %v5228_v30 }
  0xd6   :  { %v5327_v18 = vpop.permute.xlu0 %312 }
  0xd7   :  { %6564 = vst [vmem:[#allocation8_spill] sm:$0xff] %v5327_v18  ;;  %v209_v18 = vsel %vm208_vm6, %v203_v48, %v206_v47  ;;  %v191_v47 = vmul.f32 %v5357_v49, %v5208_v24  ;;  %v190_v24 = vmul.f32 %v5357_v49, %v5264_v43  ;;  %v276_v43 = vmul.f32 %v5081_v4, %v5305_v62 }
  0xd8   :  { %v5297_v58 = vpop.permute.xlu1 %183 }
  0xda   :  { %v387_v20 = vpop.permute.xlu0 %386 }
  0xdd   :  { %v5299_v59 = vpop.permute.xlu1 %259 }
  0xde   :  { %v5334_v51 = vpop.permute.xlu0 %404 }
  0xe2   :  { %v5303_v61 = vpop.permute.xlu1 %344 }
  0xe6   :  { %v5307_v63 = vpop.permute.xlu1 %348 }
  0xeb   :  { %v5311_v3 = vpop.permute.xlu1 %231 }
  0xec   :  { %6562 = vst [vmem:[#allocation6_spill] sm:$0xff] %v5311_v3  ;;  %v432_v3 = vpop.permute.xlu0 %431 }
  0xef   :  { %v288_v5 = vpop.permute.xlu1 %287 }
  0xf0   :  { %v5368_v36 = vpop.permute.xlu0 %448 }
  0xf1   :  { %6566 = vst [vmem:[#allocation10_spill] sm:$0xff] %v5368_v36 }
  0xf3   :  { %v5313_v7 = vpop.permute.xlu1 %304 }
  0xf8   :  { %v5317_v9 = vpop.permute.xlu1 %392 }
  0xfc   :  { %v5319_v11 = vpop.permute.xlu1 %396 }
 0x101   :  { %v5323_v13 = vpop.permute.xlu1 %271 }
 0x102   :  { %6563 = vst [vmem:[#allocation7_spill] sm:$0xff] %v5323_v13  ;;  %v5350_v13 = vrot.slane %v113_v53, %v5341_v1  ;;  %v94_v53 = vmul.f32 %v5354_v29, %v5220_v28 }
 0x104   :  { %v143_v25 = vmul.f32 %v5350_v13, %v5203_v23  ;;  %v145_v33 = vmul.f32 %v5350_v13, %v5230_v31  ;;  %v142_v48 = vmul.f32 %v5350_v13, %v5199_v22  ;;  %v97_v23 = vmul.f32 %v5354_v29, %v5242_v35 }
 0x105   :  { %v336_v14 = vpop.permute.xlu1 %335  ;;  %v193_v31 = vmul.f32 %v5357_v49, %v5251_v38 }
 0x106   :  { %v149_v16 = vadd.f32 %v143_v25, %v95_v21  ;;  %v151_v36 = vadd.f32 %v145_v33, %v97_v23  ;;  %v342_v22 = vsel %vm341_vm8, %v336_v14, %v339_v10  ;;  %v148_v28 = vadd.f32 %v142_v48, %v94_v53 }
 0x107   :  { %v5400_v10 = vrot.slane %v342_v22, %v5341_v1 }
 0x108   :  { %v196_v33 = vadd.f32 %v190_v24, %v148_v28 }
 0x109   :  { %v5325_v17 = vpop.permute.xlu1 %352 }
 0x10e   :  { %v5329_v19 = vpop.permute.xlu1 %440 }
 0x112   :  { %v5331_v39 = vpop.permute.xlu1 %444 }
 0x117   :  { %v5339_v2 = vpop.permute.xlu1 %316 }
 0x118   :  { %6565 = vst [vmem:[#allocation9_spill] sm:$0xff] %v5339_v2  ;;  %v5360_v2 = vrot.slane %v209_v18, %v5341_v1  ;;  %v294_v18 = vsel %vm293_vm7, %v288_v5, %v291_v6  ;;  %v197_v6 = vadd.f32 %v191_v47, %v149_v16  ;;  %v278_v47 = vmul.f32 %v5081_v4, %v5309_v0 }
 0x119   :  { %v5390_v38 = vrot.slane %v294_v18, %v5341_v1  ;;  %v372_v0 = vmul.f32 %v5400_v10, %v5307_v63  ;;  %v374_v16 = vmul.f32 %v5400_v10, %v5321_v12 }
 0x11a   :  { %v239_v30 = vmul.f32 %v5360_v2, %v216_v55  ;;  %v241_v35 = vmul.f32 %v5360_v2, %v5295_v57  ;;  %v238_v25 = vmul.f32 %v5360_v2, %v5233_v32  ;;  %v199_v55 = vadd.f32 %v193_v31, %v151_v36  ;;  %v5402_v57 = vpop.permute.xlu0 %456 }
 0x11b   :  { %v384_v27 = vpop.permute.xlu1 %383  ;;  %v275_v36 = vmul.f32 %v5081_v4, %v5259_v41  ;;  %v323_v18 = vmul.f32 %v5390_v38, %v5291_v54  ;;  %v371_v41 = vmul.f32 %v5400_v10, %v5303_v61 }
 0x11c   :  { %v390_v21 = vsel %vm389_vm9, %v384_v27, %v387_v20  ;;  %v245_v14 = vadd.f32 %v239_v30, %v197_v6  ;;  %v247_v48 = vadd.f32 %v241_v35, %v199_v55  ;;  %v324_v20 = vmul.f32 %v5390_v38, %v5293_v56 }
 0x11d   :  { %v5407_v23 = vrot.slane %v390_v21, %v5341_v1  ;;  %v244_v62 = vadd.f32 %v238_v25, %v196_v33  ;;  %v326_v27 = vmul.f32 %v5390_v38, %v309_v15 }
 0x11e   :  { %v282_v31 = vadd.f32 %v276_v43, %v245_v14  ;;  %v284_v53 = vadd.f32 %v278_v47, %v247_v48  ;;  %v506_v56 = vpop.permute.xlu0 %505 }
 0x11f   :  { %v5366_v34 = vpop.permute.xlu1 %400  ;;  %v420_v15 = vmul.f32 %v5407_v23, %v5319_v11  ;;  %v281_v22 = vadd.f32 %v275_v36, %v244_v62  ;;  %v422_v63 = vmul.f32 %v5407_v23, %v5334_v51  ;;  %v419_v25 = vmul.f32 %v5407_v23, %v5317_v9 }
 0x120   :  { %v330_v24 = vadd.f32 %v324_v20, %v282_v31  ;;  %v332_v35 = vadd.f32 %v326_v27, %v284_v53  ;;  %v98_v9 = vmul.f32 %v5354_v29, %v5262_v42  ;;  %v96_v42 = vmul.f32 %v5354_v29, %v5215_v26 }
 0x121   :  { %v329_v28 = vadd.f32 %v323_v18, %v281_v22  ;;  %v192_v53 = vmul.f32 %v5357_v49, %v5271_v45  ;;  %v194_v26 = vmul.f32 %v5357_v49, %v5286_v52  ;;  %v242_v45 = vmul.f32 %v5360_v2, %v5301_v60 }
 0x122   :  { %v378_v12 = vadd.f32 %v372_v0, %v330_v24  ;;  %v380_v55 = vadd.f32 %v374_v16, %v332_v35  ;;  %v516_v47 = vpop.permute.xlu0 %515  ;;  %v240_v24 = vmul.f32 %v5360_v2, %v5281_v50  ;;  %v147_v60 = vmul.f32 %v5350_v13, %v5273_v46  ;;  %v6567_v46 = vld [vmem:[#allocation8_spill] sm:$0xff] }
 0x123   :  { %v377_v43 = vadd.f32 %v371_v41, %v329_v28  ;;  %v99_v28 = vmul.f32 %v5354_v29, %v5268_v44  ;;  %v195_v44 = vmul.f32 %v5357_v49, %v5297_v58 }
 0x124   :  { %v5392_v5 = vpop.permute.xlu1 %360  ;;  %v426_v11 = vadd.f32 %v420_v15, %v378_v12  ;;  %v428_v14 = vadd.f32 %v422_v63, %v380_v55 }
 0x125   :  { %v425_v48 = vadd.f32 %v419_v25, %v377_v43  ;;  %v375_v58 = vmul.f32 %v5400_v10, %v5392_v5 }
 0x128   :  { %v5409_v32 = vpop.permute.xlu1 %364 }
 0x12c   :  { %v435_v30 = vpop.permute.xlu1 %434 }
 0x12d   :  { %v438_v54 = vsel %vm437_vm10, %v432_v3, %v435_v30 }
 0x12e   :  { %v5430_v6 = vrot.slane %v438_v54, %v5341_v1  ;;  %v277_v54 = vmul.f32 %v5081_v4, %v5299_v59  ;;  %v279_v59 = vmul.f32 %v5081_v4, %v5315_v8  ;;  %v421_v8 = vmul.f32 %v5407_v23, %v5366_v34  ;;  %v6571_v34 = vld [vmem:[#allocation9_spill] sm:$0xff] }
 0x130   :  { %v468_v21 = vmul.f32 %v5430_v6, %v5331_v39  ;;  %v453_v61 = vpop.permute.xlu1 %452  ;;  %v467_v51 = vmul.f32 %v5430_v6, %v5329_v19  ;;  %v144_v39 = vmul.f32 %v5350_v13, %v5248_v37  ;;  %v146_v19 = vmul.f32 %v5350_v13, %v5257_v40 }
 0x131   :  { %v470_v3 = vmul.f32 %v5430_v6, %v453_v61  ;;  %v327_v13 = vmul.f32 %v5390_v38, %v6567_v46 }
 0x132   :  { %v474_v33 = vadd.f32 %v468_v21, %v426_v11  ;;  %v473_v27 = vadd.f32 %v467_v51, %v425_v48  ;;  %v152_v37 = vadd.f32 %v146_v19, %v98_v9  ;;  %v150_v40 = vadd.f32 %v144_v39, %v96_v42  ;;  %v6570_v39 = vld [vmem:[#allocation10_spill] sm:$0xff] }
 0x133   :  { %v476_v20 = vadd.f32 %v470_v3, %v428_v14  ;;  %v325_v11 = vmul.f32 %v5390_v38, %v5313_v7  ;;  %v373_v14 = vmul.f32 %v5400_v10, %v5325_v17  ;;  %v153_v7 = vadd.f32 %v147_v60, %v99_v28  ;;  %v6568_v3 = vld [vmem:[#allocation6_spill] sm:$0xff] }
 0x134   :  { %v5441_v62 = vadd.f32 %v506_v56, %v474_v33  ;;  %v198_v63 = vadd.f32 %v192_v53, %v150_v40  ;;  %v200_v12 = vadd.f32 %v194_v26, %v152_v37  ;;  %v243_v33 = vmul.f32 %v5360_v2, %v6568_v3 }
 0x135   :  { %v5445_v36 = vadd.f32 %v516_v47, %v476_v20  ;;  %v501_v31 = vpop.permute.xlu1 %500  ;;  %v201_v49 = vadd.f32 %v195_v44, %v153_v7  ;;  %v6569_v20 = vld [vmem:[#allocation7_spill] sm:$0xff]  ;;  %v328_v37 = vmul.f32 %v5390_v38, %v6571_v34  ;;  %v376_v26 = vmul.f32 %v5400_v10, %v5409_v32 }
 0x136   :  { %v5450_v0 = vmul.f32 0.70710677, %v5441_v62  ;;  %v5452_v18 = vadd.f32 %v501_v31, %v473_v27  ;;  %v246_v55 = vadd.f32 %v240_v24, %v198_v63  ;;  %v248_v61 = vadd.f32 %v242_v45, %v200_v12 }
 0x137   :  { %v5459_v16 = vmul.f32 0.70710677, %v5445_v36  ;;  %v280_v17 = vmul.f32 %v5081_v4, %v6569_v20  ;;  %v469_v31 = vmul.f32 %v5430_v6, %v6570_v39  ;;  %v249_v53 = vadd.f32 %v243_v33, %v201_v49 }
 0x138   :  { %v547_v30 = vand.u32 2147483647, %v5450_v0  ;;  %v5463_v56 = vmul.f32 0.70710677, %v5452_v18  ;;  %v283_v29 = vadd.f32 %v277_v54, %v246_v55  ;;  %v285_v48 = vadd.f32 %v279_v59, %v248_v61 }
 0x139   :  { %v5468_v15 = vand.u32 2147483647, %v5459_v16  ;;  %v286_v24 = vadd.f32 %v280_v17, %v249_v53  ;;  %v471_v10 = vmul.f32 %v5430_v6, %v5402_v57  ;;  %vm667_vm12 = vcmp.ge.f32.partialorder %v5450_v0, 0.0 }
 0x13a   :  { %v553_v22 = vmul.f32 0.3275911, %v547_v30  ;;  %v5475_v41 = vand.u32 2147483647, %v5463_v56  ;;  %v409_v35 = vpop.permute.xlu1 %408  ;;  %v331_v47 = vadd.f32 %v325_v11, %v283_v29  ;;  %v333_v19 = vadd.f32 %v327_v13, %v285_v48 }
 0x13b   :  { %v555_v50 = vmul.f32 0.3275911, %v5468_v15  ;;  %v631_v2 = vsub.f32 0.0, %v547_v30  ;;  %v423_v42 = vmul.f32 %v5407_v23, %v409_v35  ;;  %v334_v35 = vadd.f32 %v328_v37, %v286_v24 }
 0x13c   :  { %v559_v25 = vadd.f32 1.0, %v553_v22  ;;  %v552_v52 = vmul.f32 0.3275911, %v5475_v41  ;;  %v379_v9 = vadd.f32 %v373_v14, %v331_v47  ;;  %v381_v5 = vadd.f32 %v375_v58, %v333_v19 }
 0x13d   :  { %v561_v21 = vadd.f32 1.0, %v555_v50  ;;  %v637_v22 = vmul.f32 %v631_v2, %v547_v30  ;;  %v630_v63 = vsub.f32 0.0, %v5475_v41  ;;  %v633_v60 = vsub.f32 0.0, %v5468_v15 }
 0x13e   :  { %4785 = vrcp.f32 %v559_v25  ;;  %v558_v43 = vadd.f32 1.0, %v552_v52  ;;  %v413_v51 = vpop.permute.xlu1 %412  ;;  %v427_v40 = vadd.f32 %v421_v8, %v379_v9  ;;  %v429_v54 = vadd.f32 %v423_v42, %v381_v5 }
 0x13f   :  { %4787 = vrcp.f32 %v561_v21  ;;  %v424_v25 = vmul.f32 %v5407_v23, %v413_v51  ;;  %v382_v32 = vadd.f32 %v376_v26, %v334_v35  ;;  %v644_v61 = vmul.f32 1.442695, %v637_v22 }
 0x140   :  { %4789 = vrcp.f32 %v558_v43  ;;  %v475_v4 = vadd.f32 %v469_v31, %v427_v40  ;;  %v636_v23 = vmul.f32 %v630_v63, %v5475_v41  ;;  %v477_v43 = vadd.f32 %v471_v10, %v429_v54 }
 0x141   :  { %v430_v14 = vadd.f32 %v424_v25, %v382_v32  ;;  %v639_v13 = vmul.f32 %v633_v60, %v5468_v15  ;;  %4791 = vpow2.f32 %v644_v61  ;;  %v535_v0 = vmul.f32 0.5, %v5441_v62 }
 0x142   :  { %v642_v41 = vmul.f32 1.442695, %v636_v23  ;;  %vm666_vm13 = vcmp.ge.f32.partialorder %v5463_v56, 0.0  ;;  %vm669_vm14 = vcmp.ge.f32.partialorder %v5459_v16, 0.0 }
 0x143   :  { %v461_v27 = vpop.permute.xlu1 %460  ;;  %v648_v53 = vmul.f32 1.442695, %v639_v13 }
 0x144   :  { %v472_v55 = vmul.f32 %v5430_v6, %v461_v27 }
 0x146   :  { %v478_v47 = vadd.f32 %v472_v55, %v430_v14  ;;  %v6572_v14 = vld [vmem:[#allocation5_spill] sm:$0xff] }
 0x148   :  { %v4786_v45 = vpop.eup %4785  ;;  %v511_v50 = vpop.permute.xlu1 %510 }
 0x149   :  { %v5511_v12 = vpop.eup %4787  ;;  %v577_v28 = vmul.f32 1.0614054, %v4786_v45  ;;  %v5514_v38 = vadd.f32 %v511_v50, %v475_v4 }
 0x14a   :  { %v579_v52 = vmul.f32 1.0614054, %v5511_v12  ;;  %v4790_v21 = vpop.eup %4789 }
 0x14b   :  { %v583_v30 = vadd.f32 -1.4531521, %v577_v28  ;;  %v5522_v11 = vmul.f32 0.70710677, %v5514_v38  ;;  %v576_v29 = vmul.f32 1.0614054, %v4790_v21  ;;  %v4792_v35 = vpop.eup %4791 }
 0x14c   :  { %v585_v59 = vadd.f32 -1.4531521, %v579_v52  ;;  %v521_v51 = vpop.permute.xlu1 %520 }
 0x14d   :  { %v589_v44 = vmul.f32 %v4786_v45, %v583_v30  ;;  %v548_v46 = vand.u32 2147483647, %v5522_v11  ;;  %v5528_v6 = vadd.f32 %v521_v51, %v477_v43  ;;  %v582_v3 = vadd.f32 -1.4531521, %v576_v29 }
 0x14e   :  { %v591_v57 = vmul.f32 %v5511_v12, %v585_v59  ;;  %v488_v59 = vpop.permute.xlu0 %487  ;;  %vm668_vm15 = vcmp.ge.f32.partialorder %v5522_v11, 0.0 }
 0x14f   :  { %v595_v7 = vadd.f32 1.4214138, %v589_v44  ;;  %v554_v33 = vmul.f32 0.3275911, %v548_v46  ;;  %v5531_v48 = vmul.f32 0.70710677, %v5528_v6  ;;  %v588_v20 = vmul.f32 %v4790_v21, %v582_v3 }
 0x150   :  { %v597_v8 = vadd.f32 1.4214138, %v591_v57  ;;  %v526_v58 = vpop.permute.xlu1 %525  ;;  %v632_v22 = vsub.f32 0.0, %v548_v46  ;;  %v491_v57 = vsel %vm490_vm11, %v6572_v14, %v488_v59 }
 0x151   :  { %v601_v49 = vmul.f32 %v4786_v45, %v595_v7  ;;  %v560_v17 = vadd.f32 1.0, %v554_v33  ;;  %v5533_v9 = vadd.f32 %v526_v58, %v478_v47  ;;  %v550_v27 = vand.u32 2147483647, %v5531_v48 }
 0x152   :  { %v603_v15 = vmul.f32 %v5511_v12, %v597_v8  ;;  %v594_v31 = vadd.f32 1.4214138, %v588_v20  ;;  %v638_v10 = vmul.f32 %v632_v22, %v548_v46  ;;  %v5546_v20 = vrot.slane %v491_v57, %v5341_v1 }
 0x153   :  { %v607_v39 = vadd.f32 -0.28449672, %v601_v49  ;;  %4793 = vrcp.f32 %v560_v17  ;;  %v556_v2 = vmul.f32 0.3275911, %v550_v27  ;;  %v5538_v37 = vmul.f32 0.70710677, %v5533_v9 }
 0x154   :  { %v609_v19 = vadd.f32 -0.28449672, %v603_v15  ;;  %4795 = vpow2.f32 %v642_v41  ;;  %v600_v34 = vmul.f32 %v4790_v21, %v594_v31  ;;  %v634_v61 = vsub.f32 0.0, %v550_v27 }
 0x155   :  { %v613_v42 = vmul.f32 %v4786_v45, %v607_v39  ;;  %v562_v40 = vadd.f32 1.0, %v556_v2  ;;  %v551_v26 = vand.u32 2147483647, %v5538_v37  ;;  %v646_v7 = vmul.f32 1.442695, %v638_v10 }
 0x156   :  { %v606_v24 = vadd.f32 -0.28449672, %v600_v34  ;;  %v615_v4 = vmul.f32 %v5511_v12, %v609_v19  ;;  %v640_v3 = vmul.f32 %v634_v61, %v550_v27  ;;  %v534_v19 = vmul.f32 0.5, %v5452_v18 }
 0x157   :  { %v619_v5 = vadd.f32 0.2548296, %v613_v42  ;;  %4797 = vrcp.f32 %v562_v40  ;;  %v557_v50 = vmul.f32 0.3275911, %v551_v26  ;;  %v635_v49 = vsub.f32 0.0, %v551_v26 }
 0x158   :  { %4799 = vpow2.f32 %v648_v53  ;;  %v612_v54 = vmul.f32 %v4790_v21, %v606_v24  ;;  %v621_v60 = vadd.f32 0.2548296, %v615_v4  ;;  %v650_v27 = vmul.f32 1.442695, %v640_v3 }
 0x159   :  { %v625_v63 = vmul.f32 %v4786_v45, %v619_v5  ;;  %v563_v52 = vadd.f32 1.0, %v557_v50  ;;  %v641_v40 = vmul.f32 %v635_v49, %v551_v26  ;;  %vm670_vm0 = vcmp.ge.f32.partialorder %v5531_v48, 0.0  ;;  %v4729_v48 = vld [vmem:[%s6545_s3 + $0x90] sm:$0xff]  }
 0x15a   :  { %v618_v25 = vadd.f32 0.2548296, %v612_v54  ;;  %v627_v44 = vmul.f32 %v5511_v12, %v621_v60  ;;  %vm671_vm1 = vcmp.ge.f32.partialorder %v5538_v37, 0.0  ;;  %4342 = vmatprep.mubr.msk.bf16.mxu0 %vm815_vm2, %v4729_v48 }
 0x15b   :  { %v655_v28 = vmul.f32 %v4792_v35, %v625_v63  ;;  %4801 = vrcp.f32 %v563_v52  ;;  %v652_v35 = vmul.f32 1.442695, %v641_v40  ;;  %v2266_v40 = vld [vmem:[%s6546_s4] sm:$0xff] }
 0x15c   :  { %v624_v55 = vmul.f32 %v4790_v21, %v618_v25  ;;  %4803 = vpow2.f32 %v646_v7 }
 0x15d   :  { %v4794_v32 = vpop.eup %4793  ;;  %v661_v30 = vsub.f32 1.0, %v655_v28  ;;  %4805 = vpow2.f32 %v650_v27 }
 0x15e   :  { %v4796_v23 = vpop.eup %4795  ;;  %v578_v43 = vmul.f32 1.0614054, %v4794_v32  ;;  %4807 = vpow2.f32 %v652_v35  ;;  %v2274_v35 = vld [vmem:[%s6546_s4 + $0x40] sm:$0xff] }
 0x15f   :  { %v673_v51 = vsub.f32 0.0, %v661_v30  ;;  %v654_v45 = vmul.f32 %v4796_v23, %v624_v55 }
 0x160   :  { %v584_v29 = vadd.f32 -1.4531521, %v578_v43 }
 0x161   :  { %v679_v13 = vsel %vm667_vm12, %v661_v30, %v673_v51  ;;  %v660_v46 = vsub.f32 1.0, %v654_v45  ;;  %v4798_v33 = vpop.eup %4797 }
 0x162   :  { %v685_v21 = vadd.f32 1.0, %v679_v13  ;;  %v590_v47 = vmul.f32 %v4794_v32, %v584_v29  ;;  %v4800_v8 = vpop.eup %4799  ;;  %v580_v58 = vmul.f32 1.0614054, %v4798_v33  ;;  %v537_v13 = vmul.f32 0.5, %v5445_v36 }
 0x163   :  { %v672_v41 = vsub.f32 0.0, %v660_v46  ;;  %v657_v12 = vmul.f32 %v4800_v8, %v627_v44 }
 0x164   :  { %v596_v17 = vadd.f32 1.4214138, %v590_v47  ;;  %v586_v39 = vadd.f32 -1.4531521, %v580_v58  ;;  %v691_v31 = vmul.f32 %v685_v21, %v535_v0  ;;  %v536_v21 = vmul.f32 0.5, %v5514_v38 }
 0x165   :  { %v678_v15 = vsel %vm666_vm13, %v660_v46, %v672_v41  ;;  %v4802_v53 = vpop.eup %4801  ;;  %v663_v1 = vsub.f32 1.0, %v657_v12  ;;  %v538_v38 = vmul.f32 0.5, %v5528_v6 }
 0x166   :  { %v684_v2 = vadd.f32 1.0, %v678_v15  ;;  %v602_v42 = vmul.f32 %v4794_v32, %v596_v17  ;;  %v592_v34 = vmul.f32 %v4798_v33, %v586_v39  ;;  %v581_v62 = vmul.f32 1.0614054, %v4802_v53  ;;  %v4804_v30 = vpop.eup %4803 }
 0x167   :  { %v701_v54 = vmul.f32 %v5546_v20, %v691_v31  ;;  %v675_v18 = vsub.f32 0.0, %v663_v1  ;;  %v4806_v44 = vpop.eup %4805 }
 0x168   :  { %v690_v5 = vmul.f32 %v684_v2, %v534_v19  ;;  %v608_v24 = vadd.f32 -0.28449672, %v602_v42  ;;  %v598_v4 = vadd.f32 1.4214138, %v592_v34  ;;  %v587_v22 = vadd.f32 -1.4531521, %v581_v62  ;;  %v4808_v58 = vpop.eup %4807 }
 0x169   :  { %v681_v61 = vsel %vm669_vm14, %v663_v1, %v675_v18  ;;  %v539_v2 = vmul.f32 0.5, %v5533_v9  ;;  %v4737_v9 = vld [vmem:[%s6545_s3 + $0x30] sm:$0xff]   ;;  %v2269_v62 = vld [vmem:[%s6546_s4 + $0x18] sm:$0xff] }
 0x16a   :  { %v614_v56 = vmul.f32 %v4794_v32, %v608_v24  ;;  %v700_v63 = vmul.f32 %v5546_v20, %v690_v5  ;;  %v604_v50 = vmul.f32 %v4798_v33, %v598_v4  ;;  %v593_v25 = vmul.f32 %v4802_v53, %v587_v22  ;;  %4288 = vmatprep.mubr.msk.bf16.mxu1 %vm815_vm2, %v4737_v9  ;;  %v2268_v4 = vld [vmem:[%s6546_s4 + $0x10] sm:$0xff]  ;;  %v2270_v22 = vld [vmem:[%s6546_s4 + $0x20] sm:$0xff] }
 0x16b   :  { %v4745_v9 = vld [vmem:[%s6545_s3 + $0x50] sm:$0xff]  }
 0x16c   :  { %v620_v28 = vadd.f32 0.2548296, %v614_v56  ;;  %v5553_v52 = vpack.c.bf16 %v701_v54, %v700_v63  ;;  %v610_v26 = vadd.f32 -0.28449672, %v604_v50  ;;  %v599_v10 = vadd.f32 1.4214138, %v593_v25 }
 0x16d   :  { %v2271_v56 = vld [vmem:[%s6546_s4 + $0x28] sm:$0xff]  ;;  %v2273_v63 = vld [vmem:[%s6546_s4 + $0x38] sm:$0xff]  ;;  %v2272_v54 = vld [vmem:[%s6546_s4 + $0x30] sm:$0xff] }
 0x16e   :  { %v626_v60 = vmul.f32 %v4794_v32, %v620_v28  ;;  %1241 = vrot.lane.b32.xlu0 %v5553_v52, %s4977_s13  ;;  %1235 = vrot.lane.b32.xlu1 %v5553_v52, %s4982_s19  ;;  %v616_v55 = vmul.f32 %v4798_v33, %v610_v26  ;;  %v605_v23 = vmul.f32 %v4802_v53, %v599_v10  ;;  %v687_v32 = vadd.f32 1.0, %v681_v61  ;;  %v2275_v50 = vld [vmem:[%s6546_s4 + $0x48] sm:$0xff]  ;;  %v2277_v25 = vld [vmem:[%s6546_s4 + $0x58] sm:$0xff] }
 0x16f   :  { %v2276_v26 = vld [vmem:[%s6546_s4 + $0x50] sm:$0xff]  ;;  %v4730_v61 = vld [vmem:[%s6545_s3 + $0x98] sm:$0xff]  }
 0x170   :  { %v656_v59 = vmul.f32 %v4804_v30, %v626_v60  ;;  %v622_v43 = vadd.f32 0.2548296, %v616_v55  ;;  %v611_v45 = vadd.f32 -0.28449672, %v605_v23  ;;  %v693_v3 = vmul.f32 %v687_v32, %v537_v13  ;;  %v4733_v32 = vld [vmem:[%s6545_s3 + $0xb0] sm:$0xff]  }
 0x172   :  { %v662_v51 = vsub.f32 1.0, %v656_v59  ;;  %v628_v29 = vmul.f32 %v4798_v33, %v622_v43  ;;  %v617_v57 = vmul.f32 %v4802_v53, %v611_v45  ;;  %v703_v11 = vmul.f32 %v5546_v20, %v693_v3  ;;  %v4731_v59 = vld [vmem:[%s6545_s3 + $0xa0] sm:$0xff]  }
 0x174   :  { %v674_v14 = vsub.f32 0.0, %v662_v51  ;;  %v658_v46 = vmul.f32 %v4806_v44, %v628_v29  ;;  %v623_v16 = vadd.f32 0.2548296, %v617_v57  ;;  %v4732_v44 = vld [vmem:[%s6545_s3 + $0xa8] sm:$0xff]  }
 0x176   :  { %v680_v7 = vsel %vm668_vm15, %v662_v51, %v674_v14  ;;  %v664_v8 = vsub.f32 1.0, %v658_v46  ;;  %v629_v41 = vmul.f32 %v4802_v53, %v623_v16  ;;  %v4735_v16 = vld [vmem:[%s6545_s3 + $0xc0] sm:$0xff]  }
 0x177   :  { %v686_v47 = vadd.f32 1.0, %v680_v7  ;;  %v4734_v7 = vld [vmem:[%s6545_s3 + $0xb8] sm:$0xff]  }
 0x178   :  { %v676_v0 = vsub.f32 0.0, %v664_v8  ;;  %v659_v33 = vmul.f32 %v4808_v58, %v629_v41  ;;  %v4736_v58 = vld [vmem:[%s6545_s3 + $0xc8] sm:$0xff]  }
 0x179   :  { %v692_v49 = vmul.f32 %v686_v47, %v536_v21 }
 0x17a   :  { %v682_v12 = vsel %vm670_vm0, %v664_v8, %v676_v0  ;;  %v665_v17 = vsub.f32 1.0, %v659_v33  ;;  %vm2722_vm0 = vcmask 130048  }
 0x17b   :  { %v702_v36 = vmul.f32 %v5546_v20, %v692_v49  ;;  %v688_v15 = vadd.f32 1.0, %v682_v12  ;;  %v4738_v49 = vld [vmem:[%s6545_s3 + $0xd0] sm:$0xff]  }
 0x17c   :  { %v677_v27 = vsub.f32 0.0, %v665_v17 }
 0x17d   :  { %v5566_v39 = vpack.c.bf16 %v703_v11, %v702_v36  ;;  %v694_v19 = vmul.f32 %v688_v15, %v538_v38  ;;  %v4739_v15 = vld [vmem:[%s6545_s3 + $0x38] sm:$0xff]   ;;  %v4741_v38 = vld [vmem:[%s6545_s3 + $0x40] sm:$0xff]  }
 0x17e   :  { %v683_v31 = vsel %vm671_vm1, %v665_v17, %v677_v27  ;;  %vm2869_vm1 = vcmask 785408  }
 0x17f   :  { %1243 = vrot.lane.b32.xlu0 %v5566_v39, %s4977_s13  ;;  %1237 = vrot.lane.b32.xlu1 %v5566_v39, %s4982_s19  ;;  %v689_v42 = vadd.f32 1.0, %v683_v31  ;;  %v704_v37 = vmul.f32 %v5546_v20, %v694_v19  ;;  %v4742_v19 = vld [vmem:[%s6545_s3 + $0xe0] sm:$0xff]  }
 0x181   :  { %v695_v6 = vmul.f32 %v689_v42, %v539_v2 }
 0x183   :  { %v705_v53 = vmul.f32 %v5546_v20, %v695_v6  ;;  %v2267_v20 = vld [vmem:[%s6546_s4 + $0x8] sm:$0xff] }
 0x185   :  { %v5581_v34 = vpack.c.bf16 %v705_v53, %v704_v37  ;;  %v4743_v53 = vld [vmem:[%s6545_s3 + $0x48] sm:$0xff]  }
 0x187   :  { %1245 = vrot.lane.b32.xlu0 %v5581_v34, %s4977_s13  ;;  %1239 = vrot.lane.b32.xlu1 %v5581_v34, %s4982_s19 }
 0x18b   :  { %1573 = vrot.lane.b32.xlu0 %v5553_v52, %s4981_s18  ;;  %1567 = vrot.lane.b32.xlu1 %v5553_v52, %s4990_s25 }
 0x18f   :  { %1575 = vrot.lane.b32.xlu0 %v5566_v39, %s4981_s18  ;;  %1569 = vrot.lane.b32.xlu1 %v5566_v39, %s4990_s25 }
 0x193   :  { %1577 = vrot.lane.b32.xlu0 %v5581_v34, %s4981_s18  ;;  %1571 = vrot.lane.b32.xlu1 %v5581_v34, %s4990_s25 }
 0x197   :  { %767 = vrot.lane.b32.xlu0 %v5553_v52, %s4975_s12  ;;  %761 = vrot.lane.b32.xlu1 %v5553_v52, %s4974_s30 }
 0x19b   :  { %1751 = vrot.lane.b32.xlu0 %v5553_v52, %s4983_s1  ;;  %1745 = vrot.lane.b32.xlu1 %v5553_v52, %s4993_s29 }
 0x19f   :  { %769 = vrot.lane.b32.xlu0 %v5566_v39, %s4975_s12  ;;  %763 = vrot.lane.b32.xlu1 %v5566_v39, %s4974_s30 }
 0x1a3   :  { %1753 = vrot.lane.b32.xlu0 %v5566_v39, %s4983_s1  ;;  %1747 = vrot.lane.b32.xlu1 %v5566_v39, %s4993_s29 }
 0x1a7   :  { %771 = vrot.lane.b32.xlu0 %v5581_v34, %s4975_s12  ;;  %765 = vrot.lane.b32.xlu1 %v5581_v34, %s4974_s30  ;;  %s6573_s30 = smov 124  }
 0x1ab   :  { %1755 = vrot.lane.b32.xlu0 %v5581_v34, %s4983_s1  ;;  %1749 = vrot.lane.b32.xlu1 %v5581_v34, %s4993_s29 }
 0x1af   :  { %730 = vrot.lane.b32.xlu0 %v5553_v52, %s4972_s23  ;;  %724 = vrot.lane.b32.xlu1 %v5553_v52, %s4973_s0 }
 0x1b3   :  { %1929 = vrot.lane.b32.xlu0 %v5553_v52, %s4986_s20  ;;  %1923 = vrot.lane.b32.xlu1 %v5553_v52, %s4994_s16 }
 0x1b7   :  { %732 = vrot.lane.b32.xlu0 %v5566_v39, %s4972_s23  ;;  %726 = vrot.lane.b32.xlu1 %v5566_v39, %s4973_s0 }
 0x1bb   :  { %1931 = vrot.lane.b32.xlu0 %v5566_v39, %s4986_s20  ;;  %1925 = vrot.lane.b32.xlu1 %v5566_v39, %s4994_s16 }
 0x1bf   :  { %734 = vrot.lane.b32.xlu0 %v5581_v34, %s4972_s23  ;;  %728 = vrot.lane.b32.xlu1 %v5581_v34, %s4973_s0 }
 0x1c3   :  { %1933 = vrot.lane.b32.xlu0 %v5581_v34, %s4986_s20  ;;  %1927 = vrot.lane.b32.xlu1 %v5581_v34, %s4994_s16  ;;  %s4999_s16 = smov [#allocation2]  }
 0x1c7   :  { %1063 = vrot.lane.b32.xlu0 %v5553_v52, %s4979_s15  ;;  %1057 = vrot.lane.b32.xlu1 %v5553_v52, %s4978_s14 }
 0x1cb   :  { %2107 = vrot.lane.b32.xlu0 %v5553_v52, %s4995_s17  ;;  %2101 = vrot.lane.b32.xlu1 %v5553_v52, %s6573_s30 }
 0x1cf   :  { %1065 = vrot.lane.b32.xlu0 %v5566_v39, %s4979_s15  ;;  %1059 = vrot.lane.b32.xlu1 %v5566_v39, %s4978_s14 }
 0x1d3   :  { %2109 = vrot.lane.b32.xlu0 %v5566_v39, %s4995_s17  ;;  %2103 = vrot.lane.b32.xlu1 %v5566_v39, %s6573_s30 }
 0x1d7   :  { %1067 = vrot.lane.b32.xlu0 %v5581_v34, %s4979_s15  ;;  %1061 = vrot.lane.b32.xlu1 %v5581_v34, %s4978_s14 }
 0x1db   :  { %2111 = vrot.lane.b32.xlu0 %v5581_v34, %s4995_s17  ;;  %2105 = vrot.lane.b32.xlu1 %v5581_v34, %s6573_s30  ;;  %s3907_s17 = sshll.u32 %s4999_s16, 4  ;;  %s3908_s17 = int_to_ptr.vmem [resolvable:$true] %s3907_s17 }
 0x1dc   :  { %s4945_s26 = scalar_lea.vmem %s3908_s17, 512  ;;  %p4950_p1 = scmp.lt.s32.totalorder %s3908_s17, %s3908_s17 }
 0x1dd   :  { %p4946_p0 = scmp.ne.s32.totalorder %s3908_s17, %s4945_s26  ;;  %p4951_p2 = scmp.lt.s32.totalorder %s4945_s26, %s4945_s26 }
 0x1df   :  { %2285 = vperm.xlu0 %4719, %v2267_v20   ;;  %2280 = vperm.xlu1 %4721, %v2266_v40   ;;  %v4746_v20 = vld [vmem:[%s6545_s3 + $0xf0] sm:$0xff]   ;;  %p4952_p3 = por %p4951_p2, %p4950_p1 }
 0x1e0   :  { %v1242_v1 = vpop.permute.xlu0 %1241  ;;  %v1236_v5 = vpop.permute.xlu1 %1235 }
 0x1e1   :  { %v1249_v24 = vsel %vm208_vm6, %v1236_v5, %v1242_v1  ;;  %p4953_p4 = pnand %p4952_p3, %p4946_p0 }
 0x1e2   :  { %4336 = vmatprep.subr.bf16.mxu0 %v1249_v24 }
 0x1e3   :  { %4337 = vmatpush3.bf16.msra.mxu0 %v1249_v24  ;;  %2295 = vperm.xlu0 %4719, %v2269_v62  }
 0x1e4   :  { %2290 = vperm.xlu1 %4721, %v2268_v4   ;;  %v4747_v4 = vld [vmem:[%s6545_s3 + $0x58] sm:$0xff]  }
 0x1e7   :  { %2305 = vperm.xlu0 %4719, %v2271_v56   ;;  %v4748_v56 = vld [vmem:[%s6545_s3 + $0xf8] sm:$0xff]  }
 0x1e8   :  { %2300 = vperm.xlu1 %4721, %v2270_v22   ;;  %v4749_v22 = vld [vmem:[%s6545_s3] sm:$0xff]  }
 0x1eb   :  { %2315 = vperm.xlu0 %4719, %v2273_v63  }
 0x1ec   :  { %2310 = vperm.xlu1 %4721, %v2272_v54  }
 0x1ef   :  { %2325 = vperm.xlu0 %4719, %v2275_v50   ;;  %v4750_v50 = vld [vmem:[%s6545_s3 + $0x100] sm:$0xff]  }
 0x1f0   :  { %2320 = vperm.xlu1 %4721, %v2274_v35  }
 0x1f1   :  { %v1244_v18 = vpop.permute.xlu0 %1243  ;;  %v1238_v28 = vpop.permute.xlu1 %1237 }
 0x1f2   :  { %v1253_v60 = vsel %vm208_vm6, %v1238_v28, %v1244_v18 }
 0x1f3   :  { %4338 = vmatprep.subr.bf16.mxu0 %v1253_v60  ;;  %2335 = vperm.xlu0 %4719, %v2277_v25  }
 0x1f4   :  { %4339 = vmatpush3.bf16.msra.mxu0 %v1253_v60  ;;  %2330 = vperm.xlu1 %4721, %v2276_v26   ;;  %v4751_v26 = vld [vmem:[%s6545_s3 + $0x8] sm:$0xff]  }
 0x1f5   :  { %v4752_v60 = vld [vmem:[%s6545_s3 + $0x108] sm:$0xff]  }
 0x1f9   :  { %v1246_v10 = vpop.permute.xlu0 %1245  ;;  %v1240_v30 = vpop.permute.xlu1 %1239 }
 0x1fa   :  { %v1257_v55 = vsel %vm208_vm6, %v1240_v30, %v1246_v10  ;;  %v4753_v30 = vld [vmem:[%s6545_s3 + $0x10] sm:$0xff]  }
 0x1fb   :  { %4340 = vmatprep.subr.bf16.mxu0 %v1257_v55 }
 0x1fc   :  { %4341 = vmatpush3.bf16.msra.mxu0 %v1257_v55 }
 0x1fd   :  { %v1574_v23 = vpop.permute.xlu0 %1573  ;;  %4354 = vmatprep.subr.bf16.mxu0 %v5553_v52  ;;  %v1568_v43 = vpop.permute.xlu1 %1567 }
 0x1fe   :  { %v1581_v14 = vsel %vm293_vm7, %v1568_v43, %v1574_v23 }
 0x1ff   :  { %4343 = vmatmul.mubr.msk.bf16.vlgmr.msra.gmra.mrb[0].mxu0 %vm815_vm2, %v4730_v61 }
 0x200   :  { %4355 = vmatpush3.bf16.msra.mxu0 %v5553_v52  ;;  %4346 = vmatprep.mubr.msk.bf16.mxu0 %vm815_vm2, %v4731_v59  ;;  %v4754_v59 = vld [vmem:[%s6545_s3 + $0x110] sm:$0xff]  }
 0x201   :  { %v1576_v51 = vpop.permute.xlu0 %1575  ;;  %4356 = vmatprep.subr.bf16.mxu0 %v5566_v39  ;;  %v1570_v45 = vpop.permute.xlu1 %1569 }
 0x202   :  { %v1585_v12 = vsel %vm293_vm7, %v1570_v45, %v1576_v51 }
 0x204   :  { %4357 = vmatpush3.bf16.msra.mxu0 %v5566_v39  ;;  %v4740_v39 = vld [vmem:[%s6545_s3 + $0xd8] sm:$0xff]  }
 0x205   :  { %v1578_v29 = vpop.permute.xlu0 %1577  ;;  %4358 = vmatprep.subr.bf16.mxu0 %v5581_v34  ;;  %v1572_v52 = vpop.permute.xlu1 %1571 }
 0x206   :  { %v1589_v27 = vsel %vm293_vm7, %v1572_v52, %v1578_v29  ;;  %v4757_v29 = vld [vmem:[%s6545_s3 + $0x20] sm:$0xff]  }
 0x207   :  { %4347 = vmatmul.mubr.msk.bf16.gmra.mrb[4].mxu0 %vm815_vm2, %v4732_v44  ;;  %v4755_v44 = vld [vmem:[%s6545_s3 + $0x18] sm:$0xff]   ;;  %v4758_v52 = vld [vmem:[%s6545_s3 + $0x120] sm:$0xff]  }
 0x208   :  { %4359 = vmatpush3.bf16.msra.mxu0 %v5581_v34  ;;  %4350 = vmatprep.mubr.msk.bf16.mxu0 %vm815_vm2, %v4733_v32  ;;  %v4744_v34 = vld [vmem:[%s6545_s3 + $0xe8] sm:$0xff]   ;;  %v4756_v32 = vld [vmem:[%s6545_s3 + $0x118] sm:$0xff]  }
 0x209   :  { %v768_v57 = vpop.permute.xlu0 %767  ;;  %4372 = vmatprep.subr.bf16.mxu0 %v1581_v14  ;;  %v762_v13 = vpop.permute.xlu1 %761 }
 0x20a   :  { %v775_v46 = vsel %vm112_vm3, %v762_v13, %v768_v57 }
 0x20b   :  { %4282 = vmatprep.subr.bf16.mxu1 %v775_v46 }
 0x20c   :  { %4283 = vmatpush3.bf16.msra.mxu1 %v775_v46 }
 0x20d   :  { %v1752_v3 = vpop.permute.xlu0 %1751  ;;  %v1746_v21 = vpop.permute.xlu1 %1745 }
 0x20e   :  { %v1759_v2 = vsel %vm341_vm8, %v1746_v21, %v1752_v3  ;;  %v4760_v3 = vld [vmem:[%s6545_s3 + $0x128] sm:$0xff]   ;;  %v4761_v21 = vld [vmem:[%s6545_s3 + $0x60] sm:$0xff]  }
 0x20f   :  { %4351 = vmatmul.mubr.msk.bf16.gmra.mrb[8].mxu0 %vm815_vm2, %v4734_v7 }
 0x210   :  { %4360 = vmatprep.mubr.msk.bf16.mxu0 %vm815_vm2, %v4735_v16  ;;  %v4759_v16 = vld [vmem:[%s6545_s3 + $0x28] sm:$0xff]  }
 0x211   :  { %v770_v47 = vpop.permute.xlu0 %769  ;;  %v764_v8 = vpop.permute.xlu1 %763 }
 0x212   :  { %v779_v41 = vsel %vm112_vm3, %v764_v8, %v770_v47 }
 0x213   :  { %4284 = vmatprep.subr.bf16.mxu1 %v779_v41 }
 0x214   :  { %4285 = vmatpush3.bf16.msra.mxu1 %v779_v41  ;;  %v4762_v41 = vld [vmem:[%s6545_s3 + $0x130] sm:$0xff]  }
 0x215   :  { %v1754_v0 = vpop.permute.xlu0 %1753  ;;  %v1748_v33 = vpop.permute.xlu1 %1747 }
 0x216   :  { %v1763_v35 = vsel %vm341_vm8, %v1748_v33, %v1754_v0 }
 0x217   :  { %4361 = vmatmul.mubr.msk.bf16.vlgmr.msra.gmra.mrb[0].mxu0 %vm815_vm2, %v4736_v58 }
 0x218   :  { %4373 = vmatpush3.bf16.msra.mxu0 %v1581_v14  ;;  %4364 = vmatprep.mubr.msk.bf16.mxu0 %vm815_vm2, %v4738_v49 }
 0x219   :  { %4374 = vmatprep.subr.bf16.mxu0 %v1585_v12  ;;  %v772_v36 = vpop.permute.xlu0 %771  ;;  %v766_v11 = vpop.permute.xlu1 %765 }
 0x21a   :  { %v783_v17 = vsel %vm112_vm3, %v766_v11, %v772_v36  ;;  %v4764_v36 = vld [vmem:[%s6545_s3 + $0x138] sm:$0xff]  }
 0x21b   :  { %4286 = vmatprep.subr.bf16.mxu1 %v783_v17 }
 0x21c   :  { %4375 = vmatpush3.bf16.msra.mxu0 %v1585_v12  ;;  %4287 = vmatpush3.bf16.msra.mxu1 %v783_v17  ;;  %v4763_v12 = vld [vmem:[%s6545_s3 + $0x68] sm:$0xff]   ;;  %v4765_v17 = vld [vmem:[%s6545_s3 + $0x70] sm:$0xff]  }
 0x21d   :  { %4376 = vmatprep.subr.bf16.mxu0 %v1589_v27  ;;  %v1756_v48 = vpop.permute.xlu0 %1755  ;;  %v1750_v31 = vpop.permute.xlu1 %1749 }
 0x21e   :  { %v1767_v10 = vsel %vm341_vm8, %v1750_v31, %v1756_v48  ;;  %v4769_v48 = vld [vmem:[%s6545_s3 + $0x80] sm:$0xff]   ;;  %v4770_v31 = vld [vmem:[%s6545_s3 + $0x150] sm:$0xff]  }
 0x21f   :  { %4289 = vmatmul.mubr.msk.bf16.vlgmr.msra.gmra.mrb[0].mxu1 %vm815_vm2, %v4739_v15  ;;  %4365 = vmatmul.mubr.msk.bf16.gmra.mrb[4].mxu0 %vm815_vm2, %v4740_v39  ;;  %v4766_v15 = vld [vmem:[%s6545_s3 + $0x140] sm:$0xff]  }
 0x220   :  { %4377 = vmatpush3.bf16.msra.mxu0 %v1589_v27  ;;  %4292 = vmatprep.mubr.msk.bf16.mxu1 %vm815_vm2, %v4741_v38  ;;  %v4767_v27 = vld [vmem:[%s6545_s3 + $0x78] sm:$0xff]   ;;  %v4768_v38 = vld [vmem:[%s6545_s3 + $0x148] sm:$0xff]  }
 0x221   :  { %4390 = vmatprep.subr.bf16.mxu0 %v1759_v2  ;;  %v731_v42 = vpop.permute.xlu0 %730  ;;  %v725_v6 = vpop.permute.xlu1 %724  ;;  %4368 = vmatprep.mubr.msk.bf16.mxu0 %vm815_vm2, %v4742_v19  ;;  %v4771_v19 = vld [vmem:[%s6545_s3 + $0x88] sm:$0xff]  }
 0x222   :  { %v738_v37 = vsel %vm58_vm4, %v725_v6, %v731_v42  ;;  %v4773_v42 = vld [vmem:[%s6545_s3 + $0x160] sm:$0xff]  }
 0x223   :  { %4300 = vmatprep.subr.bf16.mxu1 %v738_v37 }
 0x224   :  { %4301 = vmatpush3.bf16.msra.mxu1 %v738_v37 }
 0x225   :  { %v1930_v40 = vpop.permute.xlu0 %1929  ;;  %v1924_v1 = vpop.permute.xlu1 %1923 }
 0x226   :  { %v1937_v23 = vsel %vm389_vm9, %v1924_v1, %v1930_v40  ;;  %v4776_v40 = vld [vmem:[%s6545_s3 + $0x178] sm:$0xff]   ;;  %v4777_v1 = vld [vmem:[%s6545_s3 + $0x180] sm:$0xff]  }
 0x227   :  { %4293 = vmatmul.mubr.msk.bf16.gmra.mrb[4].mxu1 %vm815_vm2, %v4743_v53  ;;  %4369 = vmatmul.mubr.msk.bf16.gmra.mrb[8].mxu0 %vm815_vm2, %v4744_v34  ;;  %v4774_v34 = vld [vmem:[%s6545_s3 + $0x168] sm:$0xff]  }
 0x228   :  { %4296 = vmatprep.mubr.msk.bf16.mxu1 %vm815_vm2, %v4745_v9  ;;  %4378 = vmatprep.mubr.msk.bf16.mxu0 %vm815_vm2, %v4746_v20  ;;  %v4775_v20 = vld [vmem:[%s6545_s3 + $0x170] sm:$0xff]  }
 0x229   :  { %v733_v5 = vpop.permute.xlu0 %732  ;;  %v727_v24 = vpop.permute.xlu1 %726 }
 0x22a   :  { %v742_v62 = vsel %vm58_vm4, %v727_v24, %v733_v5  ;;  %v4778_v5 = vld [vmem:[%s6545_s3 + $0x188] sm:$0xff]   ;;  %v4779_v24 = vld [vmem:[%s6545_s3 + $0x190] sm:$0xff]  }
 0x22b   :  { %4302 = vmatprep.subr.bf16.mxu1 %v742_v62 }
 0x22c   :  { %4303 = vmatpush3.bf16.msra.mxu1 %v742_v62  ;;  %v4780_v62 = vld [vmem:[%s6545_s3 + $0x198] sm:$0xff]  }
 0x22d   :  { %v1932_v63 = vpop.permute.xlu0 %1931  ;;  %v1926_v54 = vpop.permute.xlu1 %1925 }
 0x22e   :  { %v1941_v58 = vsel %vm389_vm9, %v1926_v54, %v1932_v63 }
 0x22f   :  { %4297 = vmatmul.mubr.msk.bf16.gmra.mrb[8].mxu1 %vm815_vm2, %v4747_v4  ;;  %4379 = vmatmul.mubr.msk.bf16.vlgmr.msra.gmra.mrb[0].mxu0 %vm815_vm2, %v4748_v56  ;;  %v4781_v4 = vld [vmem:[%s6545_s3 + $0x1a0] sm:$0xff]   ;;  %v4782_v56 = vld [vmem:[%s6545_s3 + $0x1a8] sm:$0xff]  }
 0x230   :  { %4391 = vmatpush3.bf16.msra.mxu0 %v1759_v2  ;;  %4306 = vmatprep.mubr.msk.bf16.mxu1 %vm815_vm2, %v4749_v22  ;;  %v4772_v2 = vld [vmem:[%s6545_s3 + $0x158] sm:$0xff]   ;;  %s4996_s3 = smov 100  }
 0x231   :  { %4392 = vmatprep.subr.bf16.mxu0 %v1763_v35  ;;  %v735_v18 = vpop.permute.xlu0 %734  ;;  %v729_v28 = vpop.permute.xlu1 %728  ;;  %4382 = vmatprep.mubr.msk.bf16.mxu0 %vm815_vm2, %v4750_v50 }
 0x232   :  { %v746_v25 = vsel %vm58_vm4, %v729_v28, %v735_v18 }
 0x233   :  { %4304 = vmatprep.subr.bf16.mxu1 %v746_v25 }
 0x234   :  { %4393 = vmatpush3.bf16.msra.mxu0 %v1763_v35  ;;  %4305 = vmatpush3.bf16.msra.mxu1 %v746_v25 }
 0x235   :  { %4394 = vmatprep.subr.bf16.mxu0 %v1767_v10  ;;  %v1934_v55 = vpop.permute.xlu0 %1933  ;;  %v1928_v61 = vpop.permute.xlu1 %1927 }
 0x236   :  { %v1945_v11 = vsel %vm389_vm9, %v1928_v61, %v1934_v55 }
 0x237   :  { %4307 = vmatmul.mubr.msk.bf16.vlgmr.msra.gmra.mrb[0].mxu1 %vm815_vm2, %v4751_v26  ;;  %4383 = vmatmul.mubr.msk.bf16.gmra.mrb[4].mxu0 %vm815_vm2, %v4752_v60 }
 0x238   :  { %4395 = vmatpush3.bf16.msra.mxu0 %v1767_v10  ;;  %4310 = vmatprep.mubr.msk.bf16.mxu1 %vm815_vm2, %v4753_v30 }
 0x239   :  { %4408 = vmatprep.subr.bf16.mxu0 %v1937_v23  ;;  %v1064_v43 = vpop.permute.xlu0 %1063  ;;  %v1058_v51 = vpop.permute.xlu1 %1057  ;;  %4386 = vmatprep.mubr.msk.bf16.mxu0 %vm815_vm2, %v4754_v59 }
 0x23a   :  { %v1071_v45 = vsel %vm160_vm5, %v1058_v51, %v1064_v43 }
 0x23b   :  { %4318 = vmatprep.subr.bf16.mxu1 %v1071_v45 }
 0x23c   :  { %4319 = vmatpush3.bf16.msra.mxu1 %v1071_v45 }
 0x23d   :  { %v2108_v14 = vpop.permute.xlu0 %2107  ;;  %v2102_v57 = vpop.permute.xlu1 %2101 }
 0x23e   :  { %v2115_v39 = vsel %vm437_vm10, %v2102_v57, %v2108_v14 }
 0x23f   :  { %4311 = vmatmul.mubr.msk.bf16.gmra.mrb[4].mxu1 %vm815_vm2, %v4755_v44  ;;  %4387 = vmatmul.mubr.msk.bf16.gmra.mrb[8].mxu0 %vm815_vm2, %v4756_v32 }
 0x240   :  { %4314 = vmatprep.mubr.msk.bf16.mxu1 %vm815_vm2, %v4757_v29  ;;  %4396 = vmatprep.mubr.msk.bf16.mxu0 %vm815_vm2, %v4758_v52 }
 0x241   :  { %v1066_v13 = vpop.permute.xlu0 %1065  ;;  %v1060_v46 = vpop.permute.xlu1 %1059 }
 0x242   :  { %v1075_v7 = vsel %vm160_vm5, %v1060_v46, %v1066_v13 }
 0x243   :  { %4320 = vmatprep.subr.bf16.mxu1 %v1075_v7 }
 0x244   :  { %4321 = vmatpush3.bf16.msra.mxu1 %v1075_v7 }
 0x245   :  { %v2110_v47 = vpop.permute.xlu0 %2109  ;;  %v2104_v8 = vpop.permute.xlu1 %2103 }
 0x246   :  { %v2119_v6 = vsel %vm437_vm10, %v2104_v8, %v2110_v47 }
 0x247   :  { %4315 = vmatmul.mubr.msk.bf16.gmra.mrb[8].mxu1 %vm815_vm2, %v4759_v16  ;;  %4397 = vmatmul.mubr.msk.bf16.vlgmr.msra.gmra.mrb[0].mxu0 %vm815_vm2, %v4760_v3 }
 0x248   :  { %4409 = vmatpush3.bf16.msra.mxu0 %v1937_v23  ;;  %4324 = vmatprep.mubr.msk.bf16.mxu1 %vm815_vm2, %v4761_v21 }
 0x249   :  { %4410 = vmatprep.subr.bf16.mxu0 %v1941_v58  ;;  %v1068_v49 = vpop.permute.xlu0 %1067  ;;  %v1062_v0 = vpop.permute.xlu1 %1061  ;;  %4400 = vmatprep.mubr.msk.bf16.mxu0 %vm815_vm2, %v4762_v41 }
 0x24a   :  { %v1079_v33 = vsel %vm160_vm5, %v1062_v0, %v1068_v49 }
 0x24b   :  { %4322 = vmatprep.subr.bf16.mxu1 %v1079_v33 }
 0x24c   :  { %4411 = vmatpush3.bf16.msra.mxu0 %v1941_v58  ;;  %4323 = vmatpush3.bf16.msra.mxu1 %v1079_v33 }
 0x24d   :  { %4412 = vmatprep.subr.bf16.mxu0 %v1945_v11  ;;  %v2112_v37 = vpop.permute.xlu0 %2111  ;;  %v2106_v53 = vpop.permute.xlu1 %2105 }
 0x24e   :  { %v2123_v9 = vsel %vm437_vm10, %v2106_v53, %v2112_v37 }
 0x24f   :  { %4325 = vmatmul.mubr.msk.bf16.vlgmr.msra.gmra.mrb[0].mxu1 %vm815_vm2, %v4763_v12  ;;  %4401 = vmatmul.mubr.msk.bf16.gmra.mrb[4].mxu0 %vm815_vm2, %v4764_v36 }
 0x250   :  { %4413 = vmatpush3.bf16.msra.mxu0 %v1945_v11  ;;  %4328 = vmatprep.mubr.msk.bf16.mxu1 %vm815_vm2, %v4765_v17 }
 0x251   :  { %4426 = vmatprep.subr.bf16.mxu0 %v2115_v39  ;;  %4404 = vmatprep.mubr.msk.bf16.mxu0 %vm815_vm2, %v4766_v15 }
 0x257   :  { %4329 = vmatmul.mubr.msk.bf16.gmra.mrb[4].mxu1 %vm815_vm2, %v4767_v27  ;;  %4405 = vmatmul.mubr.msk.bf16.gmra.mrb[8].mxu0 %vm815_vm2, %v4768_v38 }
 0x258   :  { %4332 = vmatprep.mubr.msk.bf16.mxu1 %vm815_vm2, %v4769_v48  ;;  %4414 = vmatprep.mubr.msk.bf16.mxu0 %vm815_vm2, %v4770_v31 }
 0x25e   :  { %v2281_v55 = vpop.permute.xlu1 %2280  ;;  %v2286_v61 = vpop.permute.xlu0 %2285 }
 0x25f   :  { %4333 = vmatmul.mubr.msk.bf16.gmra.mrb[8].mxu1 %vm815_vm2, %v4771_v19  ;;  %4415 = vmatmul.mubr.msk.bf16.vlgmr.msra.gmra.mrb[0].mxu0 %vm815_vm2, %v4772_v2 }
 0x260   :  { %4427 = vmatpush3.bf16.msra.mxu0 %v2115_v39  ;;  %4418 = vmatprep.mubr.msk.bf16.mxu0 %vm815_vm2, %v4773_v42 }
 0x261   :  { %4428 = vmatprep.subr.bf16.mxu0 %v2119_v6 }
 0x262   :  { %v2296_v14 = vpop.permute.xlu0 %2295 }
 0x263   :  { %v2291_v51 = vpop.permute.xlu1 %2290 }
 0x264   :  { %4429 = vmatpush3.bf16.msra.mxu0 %v2119_v6 }
 0x265   :  { %4430 = vmatprep.subr.bf16.mxu0 %v2123_v9 }
 0x266   :  { %v2306_v36 = vpop.permute.xlu0 %2305 }
 0x267   :  { %4419 = vmatmul.mubr.msk.bf16.gmra.mrb[4].mxu0 %vm815_vm2, %v4774_v34  ;;  %v2301_v0 = vpop.permute.xlu1 %2300 }
 0x268   :  { %4431 = vmatpush3.bf16.msra.mxu0 %v2123_v9  ;;  %4422 = vmatprep.mubr.msk.bf16.mxu0 %vm815_vm2, %v4775_v20 }
 0x26b   :  { %v2311_v20 = vpop.permute.xlu1 %2310 }
 0x26f   :  { %4423 = vmatmul.mubr.msk.bf16.gmra.mrb[8].mxu0 %vm815_vm2, %v4776_v40 }
 0x270   :  { %4432 = vmatprep.mubr.msk.bf16.mxu0 %vm815_vm2, %v4777_v1 }
 0x277   :  { %4433 = vmatmul.mubr.msk.bf16.vlgmr.msra.gmra.mrb[0].mxu0 %vm815_vm2, %v4778_v5 }
 0x278   :  { %4436 = vmatprep.mubr.msk.bf16.mxu0 %vm815_vm2, %v4779_v24 }
 0x27f   :  { %4437 = vmatmul.mubr.msk.bf16.gmra.mrb[4].mxu0 %vm815_vm2, %v4780_v62  ;;  %v2316_v62 = vpop.permute.xlu0 %2315 }
 0x280   :  { %4440 = vmatprep.mubr.msk.bf16.mxu0 %vm815_vm2, %v4781_v4 }
 0x287   :  { %4441 = vmatmul.mubr.msk.bf16.gmra.mrb[8].mxu0 %vm815_vm2, %v4782_v56  ;;  %vm3089_vm2 = vcmask 97280  }
 0x322   :  { %v4326_v22 = vpop.f32.mrb[0].mxu1 }
 0x323   :  { %v1163_v63 = vpop.f32.mrb[1].mxu1 }
 0x324   :  { %v4327_v54 = vpop.f32.mrb[2].mxu1 }
 0x325   :  { %v1166_v50 = vpop.f32.mrb[3].mxu1 }
 0x32a   :  { %v4330_v35 = vpop.f32.mrb[4].mxu1 }
 0x32b   :  { %v1179_v18 = vpop.f32.mrb[5].mxu1 }
 0x32c   :  { %v4331_v28 = vpop.f32.mrb[6].mxu1 }
 0x32d   :  { %v1182_v25 = vpop.f32.mrb[7].mxu1 }
 0x332   :  { %v4334_v26 = vpop.f32.mrb[8].mxu1 }
 0x333   :  { %v5949_v60 = vpop.f32.mrb[9].mxu1 }
 0x334   :  { %v5951_v10 = vpop.f32.mrb[10].mxu1 }
 0x335   :  { %v5953_v30 = vpop.f32.mrb[11].mxu1 }
 0x34a   :  { %v4434_v59 = vpop.f32.mrb[0].mxu0 }
 0x34b   :  { %v4555_v23 = vadd.f32 %v4434_v59, %v4326_v22  ;;  %v2207_v43 = vpop.f32.mrb[1].mxu0 }
 0x34c   :  { %v4556_v45 = vadd.f32 %v2207_v43, %v1163_v63  ;;  %v4435_v44 = vpop.f32.mrb[2].mxu0 }
 0x34d   :  { %v2340_v32 = vadd.f32 %v4555_v23, %v2291_v51  ;;  %v4557_v29 = vadd.f32 %v4435_v44, %v4327_v54  ;;  %v2210_v52 = vpop.f32.mrb[3].mxu0 }
 0x34e   :  { %v2338_v57 = vadd.f32 %v4556_v45, %v2281_v55  ;;  %v4558_v13 = vadd.f32 %v2210_v52, %v1166_v50 }
 0x34f   :  { %v5955_v46 = vmul.f32 0.70710677, %v2340_v32  ;;  %v5957_v7 = vadd.f32 %v4557_v29, %v2296_v14  ;;  %v5999_v51 = vmul.f32 0.5, %v2340_v32 }
 0x350   :  { %v5959_v16 = vmul.f32 0.70710677, %v2338_v57  ;;  %v5961_v3 = vadd.f32 %v4558_v13, %v2286_v61 }
 0x351   :  { %v2376_v21 = vand.u32 2147483647, %v5955_v46  ;;  %v5965_v47 = vmul.f32 0.70710677, %v5957_v7  ;;  %vm2616_vm3 = vcmp.ge.f32.partialorder %v5955_v46, 0.0 }
 0x352   :  { %v2374_v8 = vand.u32 2147483647, %v5959_v16  ;;  %v5969_v41 = vmul.f32 0.70710677, %v5961_v3  ;;  %v4438_v39 = vpop.f32.mrb[4].mxu0  ;;  %vm2614_vm4 = vcmp.ge.f32.partialorder %v5959_v16, 0.0 }
 0x353   :  { %v2388_v58 = vmul.f32 0.3275911, %v2376_v21  ;;  %v2377_v49 = vand.u32 2147483647, %v5965_v47  ;;  %v2544_v17 = vsub.f32 0.0, %v2376_v21  ;;  %v2223_v31 = vpop.f32.mrb[5].mxu0  ;;  %v4559_v34 = vadd.f32 %v4438_v39, %v4330_v35 }
 0x354   :  { %v2386_v33 = vmul.f32 0.3275911, %v2374_v8  ;;  %v2375_v12 = vand.u32 2147483647, %v5969_v41  ;;  %v2542_v38 = vsub.f32 0.0, %v2374_v8  ;;  %v4439_v2 = vpop.f32.mrb[6].mxu0  ;;  %v4560_v9 = vadd.f32 %v2223_v31, %v1179_v18 }
 0x355   :  { %v2400_v11 = vadd.f32 1.0, %v2388_v58  ;;  %v2389_v15 = vmul.f32 0.3275911, %v2377_v49  ;;  %v2545_v42 = vsub.f32 0.0, %v2377_v49  ;;  %v2226_v6 = vpop.f32.mrb[7].mxu0  ;;  %v2556_v37 = vmul.f32 %v2544_v17, %v2376_v21 }
 0x356   :  { %v2398_v27 = vadd.f32 1.0, %v2386_v33  ;;  %v2387_v48 = vmul.f32 0.3275911, %v2375_v12  ;;  %v2554_v40 = vmul.f32 %v2542_v38, %v2374_v8  ;;  %v4561_v1 = vadd.f32 %v4439_v2, %v4331_v28 }
 0x357   :  { %4809 = vrcp.f32 %v2400_v11  ;;  %v2401_v19 = vadd.f32 1.0, %v2389_v15  ;;  %v4562_v5 = vadd.f32 %v2226_v6, %v1182_v25  ;;  %v5973_v4 = vadd.f32 %v4559_v34, %v2311_v20  ;;  %v2321_v15 = vpop.permute.xlu1 %2320 }
 0x358   :  { %4811 = vrcp.f32 %v2398_v27  ;;  %v2399_v53 = vadd.f32 1.0, %v2387_v48  ;;  %v5975_v56 = vadd.f32 %v4560_v9, %v2301_v0  ;;  %v2557_v54 = vmul.f32 %v2545_v42, %v2377_v49 }
 0x359   :  { %4813 = vrcp.f32 %v2401_v19  ;;  %v5979_v50 = vadd.f32 %v4561_v1, %v2316_v62  ;;  %v5981_v55 = vadd.f32 %v4562_v5, %v2306_v36  ;;  %v2570_v28 = vmul.f32 1.442695, %v2556_v37 }
 0x35a   :  { %v4442_v24 = vpop.f32.mrb[8].mxu0  ;;  %4815 = vrcp.f32 %v2399_v53  ;;  %v2543_v25 = vsub.f32 0.0, %v2375_v12  ;;  %v5989_v61 = vmul.f32 0.70710677, %v5973_v4  ;;  %v5994_v23 = vmul.f32 0.70710677, %v5975_v56 }
 0x35b   :  { %v5977_v22 = vadd.f32 %v4442_v24, %v4334_v26  ;;  %v2239_v63 = vpop.f32.mrb[9].mxu0  ;;  %v2566_v26 = vmul.f32 1.442695, %v2554_v40  ;;  %v5997_v43 = vmul.f32 0.70710677, %v5979_v50  ;;  %4817 = vpow2.f32 %v2570_v28 }
 0x35c   :  { %v5984_v35 = vadd.f32 %v2239_v63, %v5949_v60  ;;  %v5986_v18 = vpop.f32.mrb[10].mxu0  ;;  %v6001_v60 = vmul.f32 0.5, %v2338_v57  ;;  %v2380_v45 = vand.u32 2147483647, %v5989_v61  ;;  %v6005_v44 = vmul.f32 0.70710677, %v5981_v55 }
 0x35d   :  { %v5991_v59 = vpop.f32.mrb[11].mxu0  ;;  %v2572_v29 = vmul.f32 1.442695, %v2557_v54  ;;  %v2378_v52 = vand.u32 2147483647, %v5994_v23  ;;  %v2555_v21 = vmul.f32 %v2543_v25, %v2375_v12  ;;  %4819 = vpow2.f32 %v2566_v26  ;;  %v2331_v54 = vpop.permute.xlu1 %2330 }
 0x35e   :  { %v2381_v14 = vand.u32 2147483647, %v5997_v43  ;;  %v2392_v8 = vmul.f32 0.3275911, %v2380_v45  ;;  %v2548_v58 = vsub.f32 0.0, %v2380_v45  ;;  %v6019_v31 = vmul.f32 0.5, %v5957_v7 }
 0x35f   :  { %v2390_v49 = vmul.f32 0.3275911, %v2378_v52  ;;  %v2379_v0 = vand.u32 2147483647, %v6005_v44  ;;  %4821 = vpow2.f32 %v2572_v29  ;;  %v2546_v12 = vsub.f32 0.0, %v2378_v52 }
 0x360   :  { %v2404_v36 = vadd.f32 1.0, %v2392_v8  ;;  %v2560_v11 = vmul.f32 %v2548_v58, %v2380_v45  ;;  %v2393_v17 = vmul.f32 0.3275911, %v2381_v14  ;;  %v2568_v6 = vmul.f32 1.442695, %v2555_v21 }
 0x361   :  { %v6009_v13 = vpop.eup %4809  ;;  %v2402_v27 = vadd.f32 1.0, %v2390_v49  ;;  %v2549_v9 = vsub.f32 0.0, %v2381_v14  ;;  %v2391_v20 = vmul.f32 0.3275911, %v2379_v0  ;;  %v2558_v5 = vmul.f32 %v2546_v12, %v2378_v52 }
 0x362   :  { %v6011_v32 = vpop.eup %4811  ;;  %v2436_v57 = vmul.f32 1.0614054, %v6009_v13  ;;  %4823 = vrcp.f32 %v2404_v36  ;;  %v2405_v19 = vadd.f32 1.0, %v2393_v17  ;;  %v2578_v34 = vmul.f32 1.442695, %v2560_v11 }
 0x363   :  { %v2434_v33 = vmul.f32 1.0614054, %v6011_v32  ;;  %v6016_v38 = vpop.eup %4813  ;;  %4825 = vrcp.f32 %v2402_v27  ;;  %v2403_v62 = vadd.f32 1.0, %v2391_v20  ;;  %v2547_v63 = vsub.f32 0.0, %v2379_v0 }
 0x364   :  { %v2448_v39 = vadd.f32 -1.4531521, %v2436_v57  ;;  %v2437_v42 = vmul.f32 1.0614054, %v6016_v38  ;;  %v6023_v37 = vpop.eup %4815  ;;  %4827 = vrcp.f32 %v2405_v19  ;;  %v2561_v21 = vmul.f32 %v2549_v9, %v2381_v14 }
 0x365   :  { %v2446_v48 = vadd.f32 -1.4531521, %v2434_v33  ;;  %v2435_v7 = vmul.f32 1.0614054, %v6023_v37  ;;  %4829 = vpow2.f32 %v2568_v6  ;;  %v4818_v45 = vpop.eup %4817  ;;  %v2559_v8 = vmul.f32 %v2547_v63, %v2379_v0 }
 0x366   :  { %v2460_v2 = vmul.f32 %v6009_v13, %v2448_v39  ;;  %v2449_v1 = vadd.f32 -1.4531521, %v2437_v42  ;;  %v6031_v58 = vadd.f32 %v5977_v22, %v2331_v54  ;;  %4831 = vrcp.f32 %v2403_v62 }
 0x367   :  { %v2458_v53 = vmul.f32 %v6011_v32, %v2446_v48  ;;  %v2447_v26 = vadd.f32 -1.4531521, %v2435_v7  ;;  %v4820_v52 = vpop.eup %4819  ;;  %4833 = vpow2.f32 %v2578_v34  ;;  %v2574_v11 = vmul.f32 1.442695, %v2558_v5 }
 0x368   :  { %v2472_v40 = vadd.f32 1.4214138, %v2460_v2  ;;  %v2461_v25 = vmul.f32 %v6016_v38, %v2449_v1  ;;  %v6036_v17 = vadd.f32 %v5986_v18, %v5951_v10  ;;  %v6041_v27 = vmul.f32 0.70710677, %v6031_v58 }
 0x369   :  { %v2470_v24 = vadd.f32 1.4214138, %v2458_v53  ;;  %v2459_v33 = vmul.f32 %v6023_v37, %v2447_v26  ;;  %v4822_v39 = vpop.eup %4821  ;;  %v2580_v19 = vmul.f32 1.442695, %v2561_v21  ;;  %v6046_v2 = vmul.f32 1.442695, %v2559_v8 }
 0x36a   :  { %v2484_v28 = vmul.f32 %v6009_v13, %v2472_v40  ;;  %v2473_v49 = vadd.f32 1.4214138, %v2461_v25  ;;  %v6049_v42 = vadd.f32 %v5984_v35, %v2321_v15  ;;  %4835 = vpow2.f32 %v2574_v11 }
 0x36b   :  { %v2482_v29 = vmul.f32 %v6011_v32, %v2470_v24  ;;  %v2471_v22 = vadd.f32 1.4214138, %v2459_v33  ;;  %v6058_v40 = vand.u32 2147483647, %v6041_v27  ;;  %vm2617_vm5 = vcmp.ge.f32.partialorder %v5965_v47, 0.0 }
 0x36c   :  { %v2496_v57 = vadd.f32 -0.28449672, %v2484_v28  ;;  %v2485_v0 = vmul.f32 %v6016_v38, %v2473_v49  ;;  %v6043_v12 = vpop.eup %4823  ;;  %v6067_v54 = vmul.f32 0.70710677, %v6049_v42  ;;  %vm2615_vm7 = vcmp.ge.f32.partialorder %v5969_v41, 0.0 }
 0x36d   :  { %v2494_v36 = vadd.f32 -0.28449672, %v2482_v29  ;;  %v6051_v10 = vpop.eup %4825  ;;  %v2483_v53 = vmul.f32 %v6023_v37, %v2471_v22  ;;  %v2440_v34 = vmul.f32 1.0614054, %v6043_v12  ;;  %v2396_v63 = vmul.f32 0.3275911, %v6058_v40 }
 0x36e   :  { %v2508_v14 = vmul.f32 %v6009_v13, %v2496_v57  ;;  %v2497_v6 = vadd.f32 -0.28449672, %v2485_v0  ;;  %v2438_v20 = vmul.f32 1.0614054, %v6051_v10  ;;  %v6062_v5 = vpop.eup %4827  ;;  %vm2620_vm8 = vcmp.ge.f32.partialorder %v5989_v61, 0.0 }
 0x36f   :  { %v2506_v48 = vmul.f32 %v6011_v32, %v2494_v36  ;;  %v2495_v1 = vadd.f32 -0.28449672, %v2483_v53  ;;  %v2452_v7 = vadd.f32 -1.4531521, %v2440_v34  ;;  %v4830_v28 = vpop.eup %4829  ;;  %v2441_v8 = vmul.f32 1.0614054, %v6062_v5 }
 0x370   :  { %v2520_v18 = vadd.f32 0.2548296, %v2508_v14  ;;  %v2509_v15 = vmul.f32 %v6016_v38, %v2497_v6  ;;  %v2450_v62 = vadd.f32 -1.4531521, %v2438_v20  ;;  %v2408_v57 = vadd.f32 1.0, %v2396_v63  ;;  %v6075_v49 = vpop.eup %4831 }
 0x371   :  { %v2518_v9 = vadd.f32 0.2548296, %v2506_v48  ;;  %v2507_v29 = vmul.f32 %v6023_v37, %v2495_v1  ;;  %v4834_v14 = vpop.eup %4833  ;;  %vm2618_vm9 = vcmp.ge.f32.partialorder %v5994_v23, 0.0  ;;  %vm2621_vm10 = vcmp.ge.f32.partialorder %v5997_v43, 0.0 }
 0x372   :  { %v2532_v35 = vmul.f32 %v6009_v13, %v2520_v18  ;;  %v2521_v26 = vadd.f32 0.2548296, %v2509_v15  ;;  %v2464_v13 = vmul.f32 %v6043_v12, %v2452_v7  ;;  %4837 = vrcp.f32 %v2408_v57 }
 0x373   :  { %v2530_v24 = vmul.f32 %v6011_v32, %v2518_v9  ;;  %v2462_v32 = vmul.f32 %v6051_v10, %v2450_v62  ;;  %v2519_v36 = vadd.f32 0.2548296, %v2507_v29  ;;  %4839 = vpow2.f32 %v2580_v19 }
 0x374   :  { %v2592_v25 = vmul.f32 %v4818_v45, %v2532_v35  ;;  %v2533_v45 = vmul.f32 %v6016_v38, %v2521_v26  ;;  %v2476_v11 = vadd.f32 1.4214138, %v2464_v13  ;;  %v2439_v38 = vmul.f32 1.0614054, %v6075_v49 }
 0x375   :  { %v2590_v21 = vmul.f32 %v4820_v52, %v2530_v24  ;;  %v2474_v22 = vadd.f32 1.4214138, %v2462_v32  ;;  %v2453_v52 = vadd.f32 -1.4531521, %v2441_v8  ;;  %v2531_v6 = vmul.f32 %v6023_v37, %v2519_v36  ;;  %v4836_v24 = vpop.eup %4835 }
 0x376   :  { %v2604_v33 = vsub.f32 1.0, %v2592_v25  ;;  %v2593_v18 = vmul.f32 %v4822_v39, %v2533_v45  ;;  %v2488_v53 = vmul.f32 %v6043_v12, %v2476_v11  ;;  %v2552_v29 = vsub.f32 0.0, %v6058_v40 }
 0x377   :  { %v2602_v0 = vsub.f32 1.0, %v2590_v21  ;;  %v2486_v9 = vmul.f32 %v6051_v10, %v2474_v22  ;;  %v2465_v20 = vmul.f32 %v6062_v5, %v2453_v52  ;;  %v2591_v1 = vmul.f32 %v4830_v28, %v2531_v6 }
 0x378   :  { %v2628_v48 = vsub.f32 0.0, %v2604_v33  ;;  %v2605_v15 = vsub.f32 1.0, %v2593_v18  ;;  %v2500_v7 = vadd.f32 -0.28449672, %v2488_v53  ;;  %v2451_v28 = vadd.f32 -1.4531521, %v2439_v38 }
 0x379   :  { %v2626_v34 = vsub.f32 0.0, %v2602_v0  ;;  %v2498_v39 = vadd.f32 -0.28449672, %v2486_v9  ;;  %v2477_v63 = vadd.f32 1.4214138, %v2465_v20  ;;  %v2603_v25 = vsub.f32 1.0, %v2591_v1 }
 0x37a   :  { %v2640_v35 = vsel %vm2616_vm3, %v2604_v33, %v2628_v48  ;;  %v2629_v37 = vsub.f32 0.0, %v2605_v15  ;;  %v2512_v26 = vmul.f32 %v6043_v12, %v2500_v7  ;;  %v2463_v11 = vmul.f32 %v6075_v49, %v2451_v28 }
 0x37b   :  { %v2652_v62 = vadd.f32 1.0, %v2640_v35  ;;  %v2510_v46 = vmul.f32 %v6051_v10, %v2498_v39  ;;  %v2489_v21 = vmul.f32 %v6062_v5, %v2477_v63  ;;  %v2638_v32 = vsel %vm2614_vm4, %v2602_v0, %v2626_v34 }
 0x37c   :  { %v2641_v19 = vsel %vm2617_vm5, %v2605_v15, %v2629_v37  ;;  %v2627_v8 = vsub.f32 0.0, %v2603_v25  ;;  %v2524_v57 = vadd.f32 0.2548296, %v2512_v26  ;;  %v2351_v22 = vmul.f32 0.5, %v5961_v3  ;;  %v6105_v0 = vpop.eup %4837 }
 0x37d   :  { %v6088_v13 = vmul.f32 %v2652_v62, %v5999_v51  ;;  %v2653_v33 = vadd.f32 1.0, %v2641_v19  ;;  %v2522_v45 = vadd.f32 0.2548296, %v2510_v46  ;;  %v2501_v36 = vadd.f32 -0.28449672, %v2489_v21  ;;  %v6099_v51 = vpop.permute.xlu0 %2325  ;;  %v4840_v38 = vpop.eup %4839 }
 0x37e   :  { %v2536_v16 = vmul.f32 %v6043_v12, %v2524_v57  ;;  %v2564_v47 = vmul.f32 %v2552_v29, %v6058_v40  ;;  %v2650_v52 = vadd.f32 1.0, %v2638_v32  ;;  %v2639_v53 = vsel %vm2615_vm7, %v2603_v25, %v2627_v8 }
 0x37f   :  { %2690 = vrot.lane.b32.xlu1 %v6088_v13, %s6573_s30  ;;  %v6108_v48 = vmul.f32 %v2653_v33, %v6019_v31  ;;  %v2534_v18 = vmul.f32 %v6051_v10, %v2522_v45  ;;  %v2513_v6 = vmul.f32 %v6062_v5, %v2501_v36  ;;  %v2475_v9 = vadd.f32 1.4214138, %v2463_v11 }
 0x380   :  { %v2596_v34 = vmul.f32 %v4834_v14, %v2536_v16  ;;  %v2444_v3 = vmul.f32 1.0614054, %v6105_v0  ;;  %4841 = vpow2.f32 %v6046_v2  ;;  %v6115_v12 = vand.u32 2147483647, %v6067_v54 }
 0x381   :  { %v2594_v41 = vmul.f32 %v4836_v24, %v2534_v18  ;;  %v2525_v20 = vadd.f32 0.2548296, %v2513_v6  ;;  %2692 = vrot.lane.b32.xlu0 %v6108_v48, %s6573_s30  ;;  %v2487_v10 = vmul.f32 %v6075_v49, %v2475_v9  ;;  %v2586_v14 = vmul.f32 1.442695, %v2564_v47  ;;  %v2336_v7 = vpop.permute.xlu0 %2335 }
 0x382   :  { %v2608_v31 = vsub.f32 1.0, %v2596_v34  ;;  %v2456_v40 = vadd.f32 -1.4531521, %v2444_v3  ;;  %v6123_v35 = vmul.f32 %v2650_v52, %v6001_v60  ;;  %v2651_v2 = vadd.f32 1.0, %v2639_v53 }
 0x383   :  { %2763 = vrot.lane.b32.xlu1 %v6088_v13, %s4996_s3  ;;  %v2537_v15 = vmul.f32 %v6062_v5, %v2525_v20  ;;  %v2394_v1 = vmul.f32 0.3275911, %v6115_v12  ;;  %v2606_v62 = vsub.f32 1.0, %v2594_v41  ;;  %v2499_v39 = vadd.f32 -0.28449672, %v2487_v10 }
 0x384   :  { %v2632_v24 = vsub.f32 0.0, %v2608_v31  ;;  %v2468_v63 = vmul.f32 %v6105_v0, %v2456_v40  ;;  %v6130_v26 = vadd.f32 %v6036_v17, %v2336_v7  ;;  %4843 = vpow2.f32 %v2586_v14 }
 0x385   :  { %v2597_v37 = vmul.f32 %v4840_v38, %v2537_v15  ;;  %v2406_v25 = vadd.f32 1.0, %v2394_v1  ;;  %2765 = vrot.lane.b32.xlu0 %v6108_v48, %s4996_s3  ;;  %v2511_v5 = vmul.f32 %v6075_v49, %v2499_v39  ;;  %v6137_v46 = vmul.f32 %v2651_v2, %v2351_v22 }
 0x386   :  { %v2644_v60 = vsel %vm2620_vm8, %v2608_v31, %v2632_v24  ;;  %v2480_v29 = vadd.f32 1.4214138, %v2468_v63  ;;  %v2630_v28 = vsub.f32 0.0, %v2606_v62  ;;  %v2356_v19 = vmul.f32 0.5, %v5973_v4 }
 0x387   :  { %2686 = vrot.lane.b32.xlu1 %v6123_v35, %s6573_s30  ;;  %v2656_v21 = vadd.f32 1.0, %v2644_v60  ;;  %v2609_v61 = vsub.f32 1.0, %v2597_v37  ;;  %4845 = vrcp.f32 %v2406_v25  ;;  %v2523_v32 = vadd.f32 0.2548296, %v2511_v5 }
 0x388   :  { %v2492_v17 = vmul.f32 %v6105_v0, %v2480_v29  ;;  %v6142_v57 = vmul.f32 0.70710677, %v6130_v26  ;;  %v4566_v33 = vadd.f32 %v5991_v59, %v5953_v30  ;;  %v2642_v59 = vsel %vm2618_vm9, %v2606_v62, %v2630_v28 }
 0x389   :  { %v2633_v8 = vsub.f32 0.0, %v2609_v61  ;;  %2688 = vrot.lane.b32.xlu0 %v6137_v46, %s6573_s30  ;;  %v2535_v45 = vmul.f32 %v6075_v49, %v2523_v32  ;;  %v6153_v11 = vmul.f32 %v2656_v21, %v2356_v19  ;;  %v2357_v23 = vmul.f32 0.5, %v5979_v50 }
 0x38a   :  { %v2504_v4 = vadd.f32 -0.28449672, %v2492_v17  ;;  %v4842_v36 = vpop.eup %4841  ;;  %v2385_v16 = vand.u32 2147483647, %v6142_v57  ;;  %v6157_v30 = vadd.f32 %v4566_v33, %v6099_v51  ;;  %v2550_v43 = vsub.f32 0.0, %v6115_v12 }
 0x38b   :  { %2759 = vrot.lane.b32.xlu1 %v6123_v35, %s4996_s3  ;;  %v2645_v22 = vsel %vm2621_vm10, %v2609_v61, %v2633_v8  ;;  %v2595_v52 = vmul.f32 %v4842_v36, %v2535_v45  ;;  %v2654_v34 = vadd.f32 1.0, %v2642_v59  ;;  %v2354_v20 = vmul.f32 0.5, %v5975_v56 }
 0x38c   :  { %v2657_v47 = vadd.f32 1.0, %v2645_v22  ;;  %v2516_v18 = vmul.f32 %v6105_v0, %v2504_v4  ;;  %v2397_v49 = vmul.f32 0.3275911, %v2385_v16  ;;  %v6163_v6 = vmul.f32 0.70710677, %v6157_v30 }
 0x38d   :  { %2761 = vrot.lane.b32.xlu0 %v6137_v46, %s4996_s3  ;;  %v2607_v51 = vsub.f32 1.0, %v2595_v52  ;;  %vm2619_vm11 = vcmp.ge.f32.partialorder %v6005_v44, 0.0  ;;  %v2562_v14 = vmul.f32 %v2550_v43, %v6115_v12  ;;  %v6180_v56 = vmul.f32 %v2654_v34, %v2354_v20 }
 0x38e   :  { %v2528_v53 = vadd.f32 0.2548296, %v2516_v18  ;;  %v6169_v9 = vmul.f32 %v2657_v47, %v2357_v23  ;;  %v2409_v3 = vadd.f32 1.0, %v2397_v49  ;;  %v2383_v50 = vand.u32 2147483647, %v6163_v6  ;;  %v4844_v41 = vpop.eup %4843 }
 0x38f   :  { %2698 = vrot.lane.b32.xlu1 %v6153_v11, %s6573_s30  ;;  %v2631_v31 = vsub.f32 0.0, %v2607_v51  ;;  %v2355_v44 = vmul.f32 0.5, %v5981_v55  ;;  %v2582_v12 = vmul.f32 1.442695, %v2562_v14  ;;  %vm2624_vm12 = vcmp.ge.f32.partialorder %v6041_v27, 0.0 }
 0x390   :  { %v2540_v10 = vmul.f32 %v6105_v0, %v2528_v53  ;;  %4847 = vrcp.f32 %v2409_v3  ;;  %v2395_v38 = vmul.f32 0.3275911, %v2383_v50  ;;  %v2553_v25 = vsub.f32 0.0, %v2385_v16 }
 0x391   :  { %v4846_v40 = vpop.eup %4845  ;;  %2700 = vrot.lane.b32.xlu0 %v6169_v9, %s6573_s30  ;;  %v2643_v2 = vsel %vm2619_vm11, %v2607_v51, %v2631_v31  ;;  %v2360_v29 = vmul.f32 0.5, %v6031_v58  ;;  %v2551_v17 = vsub.f32 0.0, %v2383_v50  ;;  %vm2622_vm13 = vcmp.ge.f32.partialorder %v6067_v54, 0.0 }
 0x392   :  { %v2600_v15 = vmul.f32 %v4844_v41, %v2540_v10  ;;  %v2442_v1 = vmul.f32 1.0614054, %v4846_v40  ;;  %v2655_v7 = vadd.f32 1.0, %v2643_v2  ;;  %v2407_v0 = vadd.f32 1.0, %v2395_v38 }
 0x393   :  { %2771 = vrot.lane.b32.xlu1 %v6153_v11, %s4996_s3  ;;  %v2565_v32 = vmul.f32 %v2553_v25, %v2385_v16  ;;  %v2563_v4 = vmul.f32 %v2551_v17, %v2383_v50  ;;  %v2358_v14 = vmul.f32 0.5, %v6049_v42  ;;  %vm2625_vm14 = vcmp.ge.f32.partialorder %v6142_v57, 0.0 }
 0x394   :  { %v2612_v24 = vsub.f32 1.0, %v2600_v15  ;;  %v2454_v62 = vadd.f32 -1.4531521, %v2442_v1  ;;  %4849 = vrcp.f32 %v2407_v0  ;;  %v6187_v37 = vmul.f32 %v2655_v7, %v2355_v44 }
 0x395   :  { %2773 = vrot.lane.b32.xlu0 %v6169_v9, %s4996_s3  ;;  %4851 = vpow2.f32 %v2582_v12  ;;  %v2588_v45 = vmul.f32 1.442695, %v2565_v32  ;;  %v2584_v23 = vmul.f32 1.442695, %v2563_v4  ;;  %v2361_v25 = vmul.f32 0.5, %v6130_v26 }
 0x396   :  { %v2636_v39 = vsub.f32 0.0, %v2612_v24  ;;  %v2466_v63 = vmul.f32 %v4846_v40, %v2454_v62  ;;  %vm2623_vm15 = vcmp.ge.f32.partialorder %v6163_v6, 0.0  ;;  %vm3126_vm4 = vcmask 1043456  }
 0x397   :  { %2694 = vrot.lane.b32.xlu1 %v6180_v56, %s6573_s30  ;;  %4853 = vpow2.f32 %v2588_v45  ;;  %vm4997_vm5 = vmmov 1  }
 0x398   :  { %v2648_v60 = vsel %vm2624_vm12, %v2612_v24, %v2636_v39  ;;  %v2478_v5 = vadd.f32 1.4214138, %v2466_v63  ;;  %4855 = vpow2.f32 %v2584_v23  ;;  %vm4550_vm7 = vmpackc.low %vm3126_vm4, %vm4997_vm5 }
 0x399   :  { %v2660_v55 = vadd.f32 1.0, %v2648_v60  ;;  %2696 = vrot.lane.b32.xlu0 %v6187_v37, %s6573_s30 }
 0x39a   :  { %v2490_v21 = vmul.f32 %v4846_v40, %v2478_v5  ;;  %v4848_v61 = vpop.eup %4847 }
 0x39b   :  { %2767 = vrot.lane.b32.xlu1 %v6180_v56, %s4996_s3  ;;  %v6195_v28 = vmul.f32 %v2660_v55, %v2360_v29  ;;  %v2445_v19 = vmul.f32 1.0614054, %v4848_v61 }
 0x39c   :  { %v2502_v27 = vadd.f32 -0.28449672, %v2490_v21  ;;  %v2359_v21 = vmul.f32 0.5, %v6157_v30 }
 0x39d   :  { %2769 = vrot.lane.b32.xlu0 %v6187_v37, %s4996_s3  ;;  %v2457_v8 = vadd.f32 -1.4531521, %v2445_v19 }
 0x39e   :  { %v2514_v58 = vmul.f32 %v4846_v40, %v2502_v27  ;;  %v4850_v33 = vpop.eup %4849 }
 0x39f   :  { %2706 = vrot.lane.b32.xlu1 %v6195_v28, %s6573_s30  ;;  %v2469_v22 = vmul.f32 %v4848_v61, %v2457_v8  ;;  %v2443_v59 = vmul.f32 1.0614054, %v4850_v33  ;;  %v4852_v18 = vpop.eup %4851 }
 0x3a0   :  { %v2526_v36 = vadd.f32 0.2548296, %v2514_v58 }
 0x3a1   :  { %v2481_v52 = vadd.f32 1.4214138, %v2469_v22  ;;  %v2455_v16 = vadd.f32 -1.4531521, %v2443_v59  ;;  %v4854_v1 = vpop.eup %4853 }
 0x3a2   :  { %v2538_v47 = vmul.f32 %v4846_v40, %v2526_v36  ;;  %v4856_v12 = vpop.eup %4855 }
 0x3a3   :  { %v2493_v49 = vmul.f32 %v4848_v61, %v2481_v52  ;;  %v2467_v51 = vmul.f32 %v4850_v33, %v2455_v16 }
 0x3a4   :  { %v2598_v43 = vmul.f32 %v4852_v18, %v2538_v47 }
 0x3a5   :  { %v2505_v34 = vadd.f32 -0.28449672, %v2493_v49  ;;  %v2479_v3 = vadd.f32 1.4214138, %v2467_v51 }
 0x3a6   :  { %v2610_v53 = vsub.f32 1.0, %v2598_v43 }
 0x3a7   :  { %v2517_v20 = vmul.f32 %v4848_v61, %v2505_v34  ;;  %v2491_v31 = vmul.f32 %v4850_v33, %v2479_v3 }
 0x3a8   :  { %v2634_v41 = vsub.f32 0.0, %v2610_v53 }
 0x3a9   :  { %v2529_v10 = vadd.f32 0.2548296, %v2517_v20  ;;  %v2503_v40 = vadd.f32 -0.28449672, %v2491_v31 }
 0x3aa   :  { %v2646_v50 = vsel %vm2622_vm13, %v2610_v53, %v2634_v41 }
 0x3ab   :  { %v2658_v38 = vadd.f32 1.0, %v2646_v50  ;;  %v2541_v2 = vmul.f32 %v4848_v61, %v2529_v10  ;;  %v2515_v15 = vmul.f32 %v4850_v33, %v2503_v40 }
 0x3ad   :  { %v6203_v7 = vmul.f32 %v2658_v38, %v2358_v14  ;;  %v2601_v0 = vmul.f32 %v4854_v1, %v2541_v2  ;;  %v2527_v24 = vadd.f32 0.2548296, %v2515_v15 }
 0x3af   :  { %2702 = vrot.lane.b32.xlu1 %v6203_v7, %s6573_s30  ;;  %v2613_v62 = vsub.f32 1.0, %v2601_v0  ;;  %v2539_v44 = vmul.f32 %v4850_v33, %v2527_v24 }
 0x3b1   :  { %v2637_v54 = vsub.f32 0.0, %v2613_v62  ;;  %v2599_v39 = vmul.f32 %v4856_v12, %v2539_v44 }
 0x3b3   :  { %2775 = vrot.lane.b32.xlu1 %v6203_v7, %s4996_s3  ;;  %v2649_v42 = vsel %vm2625_vm14, %v2613_v62, %v2637_v54  ;;  %v2611_v63 = vsub.f32 1.0, %v2599_v39  ;;  %vm3897_vm14 = vcmask 261120  }
 0x3b4   :  { %v2661_v60 = vadd.f32 1.0, %v2649_v42 }
 0x3b5   :  { %v2635_v5 = vsub.f32 0.0, %v2611_v63 }
 0x3b6   :  { %v6211_v29 = vmul.f32 %v2661_v60, %v2361_v25 }
 0x3b7   :  { %2779 = vrot.lane.b32.xlu1 %v6195_v28, %s4996_s3  ;;  %v2647_v55 = vsel %vm2623_vm15, %v2611_v63, %v2635_v5  ;;  %v2857_v5 = vld [vmem:[%s6548_s6] sm:$0xff] }
 0x3b8   :  { %2708 = vrot.lane.b32.xlu0 %v6211_v29, %s6573_s30  ;;  %v2659_v57 = vadd.f32 1.0, %v2647_v55  ;;  %v3018_v55 = vld [vmem:[%s6550_s8 + $0x8] sm:$0xff] }
 0x3ba   :  { %v6221_v26 = vmul.f32 %v2659_v57, %v2359_v21  ;;  %v3020_v57 = vld [vmem:[%s6550_s8 + $0x18] sm:$0xff]  ;;  %v3022_v21 = vld [vmem:[%s6550_s8 + $0x28] sm:$0xff] }
 0x3bc   :  { %2781 = vrot.lane.b32.xlu0 %v6211_v29, %s4996_s3 }
 0x3c0   :  { %2704 = vrot.lane.b32.xlu0 %v6221_v26, %s6573_s30 }
 0x3c4   :  { %2777 = vrot.lane.b32.xlu0 %v6221_v26, %s4996_s3 }
 0x3f1   :  { %v2691_v6 = vpop.permute.xlu1 %2690 }
 0x3f2   :  { %v2729_v61 = vsel %vm2722_vm0, %v2691_v6, 0.0  ;;  %v2858_v6 = vld [vmem:[%s6548_s6 + $0x8] sm:$0xf] }
 0x3f3   :  { %2730 = vadd.xlane.f32.xlu0 %v2729_v61  ;;  %v2693_v32 = vpop.permute.xlu0 %2692  ;;  %v3024_v61 = vld [vmem:[%s6550_s8 + $0x38] sm:$0xff] }
 0x3f4   :  { %v2732_v45 = vsel %vm2722_vm0, %v2693_v32, 0.0  ;;  %v3017_v32 = vld [vmem:[%s6550_s8] sm:$0xff] }
 0x3f5   :  { %v2764_v17 = vpop.permute.xlu1 %2763 }
 0x3f6   :  { %v2801_v30 = vsel %vm2722_vm0, %v2764_v17, 0.0  ;;  %v3026_v17 = vld [vmem:[%s6550_s8 + $0x48] sm:$0xff] }
 0x3f7   :  { %2802 = vadd.xlane.f32.xlu0 %v2801_v30  ;;  %v2766_v27 = vpop.permute.xlu0 %2765  ;;  %v2855_v30 = vld [vmem:[%s6547_s5] sm:$0xff] }
 0x3f8   :  { %v2804_v59 = vsel %vm2722_vm0, %v2766_v27, 0.0  ;;  %v3019_v27 = vld [vmem:[%s6550_s8 + $0x10] sm:$0xff]  ;;  %4468 = vmatprep.mubr.msk.f32.mxu1 %vm2869_vm1, %v2855_v30 }
 0x3f9   :  { %v2687_v19 = vpop.permute.xlu1 %2686 }
 0x3fa   :  { %v2723_v58 = vsel %vm2722_vm0, %v2687_v19, 0.0  ;;  %v3028_v19 = vld [vmem:[%s6550_s8 + $0x58] sm:$0xff] }
 0x3fb   :  { %2724 = vadd.xlane.f32.xlu1 %v2723_v58  ;;  %v2689_v8 = vpop.permute.xlu0 %2688  ;;  %v3021_v58 = vld [vmem:[%s6550_s8 + $0x20] sm:$0xff] }
 0x3fc   :  { %v2726_v47 = vsel %vm2722_vm0, %v2689_v8, 0.0  ;;  %v3023_v8 = vld [vmem:[%s6550_s8 + $0x30] sm:$0xff] }
 0x3fd   :  { %v2760_v33 = vpop.permute.xlu1 %2759 }
 0x3fe   :  { %v2795_v4 = vsel %vm2722_vm0, %v2760_v33, 0.0  ;;  %v3025_v33 = vld [vmem:[%s6550_s8 + $0x40] sm:$0xff] }
 0x3ff   :  { %2733 = vadd.xlane.f32.xlu1 %v2732_v45  ;;  %2796 = vadd.xlane.f32.xlu0 %v2795_v4  ;;  %v2762_v36 = vpop.permute.xlu0 %2761  ;;  %v3027_v45 = vld [vmem:[%s6550_s8 + $0x50] sm:$0xff] }
 0x400   :  { %v2798_v18 = vsel %vm2722_vm0, %v2762_v36, 0.0 }
 0x401   :  { %v2699_v22 = vpop.permute.xlu1 %2698 }
 0x402   :  { %v2741_v23 = vsel %vm2722_vm0, %v2699_v22, 0.0 }
 0x403   :  { %2805 = vadd.xlane.f32.xlu1 %v2804_v59  ;;  %2727 = vadd.xlane.f32.xlu0 %v2726_v47  ;;  %v2701_v52 = vpop.permute.xlu0 %2700 }
 0x404   :  { %v2744_v51 = vsel %vm2722_vm0, %v2701_v52, 0.0 }
 0x405   :  { %v2772_v16 = vpop.permute.xlu1 %2771 }
 0x406   :  { %v2813_v53 = vsel %vm2722_vm0, %v2772_v16, 0.0 }
 0x407   :  { %2799 = vadd.xlane.f32.xlu1 %v2798_v18  ;;  %2742 = vadd.xlane.f32.xlu0 %v2741_v23  ;;  %v2774_v43 = vpop.permute.xlu0 %2773 }
 0x408   :  { %v2816_v41 = vsel %vm2722_vm0, %v2774_v43, 0.0 }
 0x409   :  { %v2695_v49 = vpop.permute.xlu1 %2694 }
 0x40a   :  { %v2735_v20 = vsel %vm2722_vm0, %v2695_v49, 0.0 }
 0x40b   :  { %2745 = vadd.xlane.f32.xlu1 %v2744_v51  ;;  %2814 = vadd.xlane.f32.xlu0 %v2813_v53  ;;  %v2697_v34 = vpop.permute.xlu0 %2696 }
 0x40c   :  { %v2738_v31 = vsel %vm2722_vm0, %v2697_v34, 0.0 }
 0x40d   :  { %v2768_v3 = vpop.permute.xlu1 %2767 }
 0x40e   :  { %v2807_v50 = vsel %vm2722_vm0, %v2768_v3, 0.0 }
 0x40f   :  { %2817 = vadd.xlane.f32.xlu1 %v2816_v41  ;;  %2736 = vadd.xlane.f32.xlu0 %v2735_v20  ;;  %v2770_v10 = vpop.permute.xlu0 %2769 }
 0x410   :  { %v2810_v14 = vsel %vm2722_vm0, %v2770_v10, 0.0 }
 0x411   :  { %v2707_v40 = vpop.permute.xlu1 %2706 }
 0x412   :  { %v2753_v38 = vsel %vm2722_vm0, %v2707_v40, 0.0 }
 0x413   :  { %2739 = vadd.xlane.f32.xlu1 %v2738_v31  ;;  %2808 = vadd.xlane.f32.xlu0 %v2807_v50 }
 0x417   :  { %2811 = vadd.xlane.f32.xlu1 %v2810_v14  ;;  %2754 = vadd.xlane.f32.xlu0 %v2753_v38 }
 0x421   :  { %v2703_v2 = vpop.permute.xlu1 %2702 }
 0x422   :  { %v2747_v15 = vsel %vm2722_vm0, %v2703_v2, 0.0 }
 0x423   :  { %2748 = vadd.xlane.f32.xlu0 %v2747_v15 }
 0x425   :  { %v2776_v1 = vpop.permute.xlu1 %2775 }
 0x426   :  { %v2819_v0 = vsel %vm2722_vm0, %v2776_v1, 0.0 }
 0x427   :  { %2820 = vadd.xlane.f32.xlu0 %v2819_v0 }
 0x429   :  { %v2780_v24 = vpop.permute.xlu1 %2779 }
 0x42a   :  { %v2825_v62 = vsel %vm2722_vm0, %v2780_v24, 0.0  ;;  %v2709_v44 = vpop.permute.xlu0 %2708 }
 0x42b   :  { %2826 = vadd.xlane.f32.xlu0 %v2825_v62  ;;  %v2756_v12 = vsel %vm2722_vm0, %v2709_v44, 0.0 }
 0x42c   :  { %2757 = vadd.xlane.f32.xlu1 %v2756_v12 }
 0x42e   :  { %v2782_v54 = vpop.permute.xlu0 %2781 }
 0x42f   :  { %v2828_v60 = vsel %vm2722_vm0, %v2782_v54, 0.0 }
 0x432   :  { %v2705_v39 = vpop.permute.xlu0 %2704 }
 0x433   :  { %v2750_v42 = vsel %vm2722_vm0, %v2705_v39, 0.0 }
 0x434   :  { %2751 = vadd.xlane.f32.xlu1 %v2750_v42 }
 0x436   :  { %v2778_v63 = vpop.permute.xlu0 %2777 }
 0x437   :  { %v2822_v25 = vsel %vm2722_vm0, %v2778_v63, 0.0 }
 0x438   :  { %2823 = vadd.xlane.f32.xlu1 %v2822_v25 }
 0x43c   :  { %2829 = vadd.xlane.f32.xlu1 %v2828_v60 }
 0x441   :  { %2861 = vperm.xlu0 %4719, %v2857_v5  }
 0x445   :  { %3036 = vperm.xlu0 %4719, %v3018_v55  }
 0x449   :  { %3046 = vperm.xlu0 %4719, %v3020_v57  }
 0x44d   :  { %3056 = vperm.xlu0 %4719, %v3022_v21   ;;  %2866 = vperm.xlu1 %4721, %v2858_v6  }
 0x451   :  { %3066 = vperm.xlu0 %4719, %v3024_v61   ;;  %3031 = vperm.xlu1 %4721, %v3017_v32  }
 0x455   :  { %3076 = vperm.xlu0 %4719, %v3026_v17   ;;  %3041 = vperm.xlu1 %4721, %v3019_v27  }
 0x459   :  { %3086 = vperm.xlu0 %4719, %v3028_v19   ;;  %3051 = vperm.xlu1 %4721, %v3021_v58  }
 0x45d   :  { %3061 = vperm.xlu1 %4721, %v3023_v8  }
 0x461   :  { %3071 = vperm.xlu1 %4721, %v3025_v33  }
 0x465   :  { %3081 = vperm.xlu1 %4721, %v3027_v45  }
 0x480   :  { %v2731_v4 = vpop.xlane.xlu0 %2730 }
 0x484   :  { %v2803_v36 = vpop.xlane.xlu0 %2802 }
 0x485   :  { %v2833_v51 = vsel %vm208_vm6, %v2731_v4, %v2803_v36 }
 0x486   :  { %v2845_v20 = vmul.f32 0.0625, %v2833_v51 }
 0x488   :  { %v2725_v22 = vpop.xlane.xlu1 %2724 }
 0x48c   :  { %v2797_v59 = vpop.xlane.xlu0 %2796  ;;  %v2734_v47 = vpop.xlane.xlu1 %2733 }
 0x48d   :  { %v2831_v18 = vsel %vm208_vm6, %v2725_v22, %v2797_v59  ;;  %v2856_v22 = vld [vmem:[%s6547_s5 + $0x8] sm:$0xf]  ;;  %v3005_v59 = vld [vmem:[%s6549_s7] sm:$0xff] }
 0x48e   :  { %v2843_v34 = vmul.f32 0.0625, %v2831_v18 }
 0x490   :  { %v2728_v52 = vpop.xlane.xlu0 %2727  ;;  %v2806_v16 = vpop.xlane.xlu1 %2805 }
 0x491   :  { %v2834_v23 = vsel %vm208_vm6, %v2734_v47, %v2806_v16 }
 0x492   :  { %v2846_v3 = vmul.f32 0.0625, %v2834_v23 }
 0x494   :  { %v2743_v43 = vpop.xlane.xlu0 %2742  ;;  %v2800_v49 = vpop.xlane.xlu1 %2799  ;;  %v4529_v40 = vpack.c.bf16 %v2846_v3, %v2845_v20 }
 0x495   :  { %v2832_v53 = vsel %vm208_vm6, %v2728_v52, %v2800_v49 }
 0x496   :  { %v2844_v41 = vmul.f32 0.0625, %v2832_v53 }
 0x498   :  { %v2815_v31 = vpop.xlane.xlu0 %2814  ;;  %v2746_v50 = vpop.xlane.xlu1 %2745  ;;  %v4525_v10 = vpack.c.bf16 %v2844_v41, %v2843_v34 }
 0x499   :  { %v2837_v62 = vsel %vm208_vm6, %v2743_v43, %v2815_v31 }
 0x49a   :  { %4526 = vmatprep.subr.bf16.mxu1 %v4525_v10  ;;  %v2849_v42 = vmul.f32 0.0625, %v2837_v62 }
 0x49b   :  { %4528 = vmatpush3.bf16.msra.mxu1 %v4525_v10 }
 0x49c   :  { %v2737_v14 = vpop.xlane.xlu0 %2736  ;;  %4530 = vmatprep.subr.bf16.mxu1 %v4529_v40  ;;  %v2818_v38 = vpop.xlane.xlu1 %2817 }
 0x49d   :  { %v2838_v1 = vsel %vm208_vm6, %v2746_v50, %v2818_v38 }
 0x49e   :  { %v2850_v12 = vmul.f32 0.0625, %v2838_v1 }
 0x49f   :  { %4532 = vmatpush3.bf16.msra.mxu1 %v4529_v40 }
 0x4a0   :  { %v2809_v2 = vpop.xlane.xlu0 %2808  ;;  %v2740_v15 = vpop.xlane.xlu1 %2739  ;;  %v4537_v25 = vpack.c.bf16 %v2850_v12, %v2849_v42 }
 0x4a1   :  { %v2835_v0 = vsel %vm208_vm6, %v2737_v14, %v2809_v2 }
 0x4a2   :  { %v2847_v54 = vmul.f32 0.0625, %v2835_v0 }
 0x4a4   :  { %v2812_v24 = vpop.xlane.xlu1 %2811  ;;  %v2755_v60 = vpop.xlane.xlu0 %2754 }
 0x4a5   :  { %v2836_v44 = vsel %vm208_vm6, %v2740_v15, %v2812_v24 }
 0x4a6   :  { %v2848_v39 = vmul.f32 0.0625, %v2836_v44 }
 0x4a8   :  { %v4533_v63 = vpack.c.bf16 %v2848_v39, %v2847_v54 }
 0x4aa   :  { %4534 = vmatprep.subr.bf16.mxu1 %v4533_v63 }
 0x4ab   :  { %4536 = vmatpush3.bf16.msra.mxu1 %v4533_v63 }
 0x4ac   :  { %4538 = vmatprep.subr.bf16.mxu1 %v4537_v25 }
 0x4af   :  { %4540 = vmatpush3.bf16.msra.mxu1 %v4537_v25 }
 0x4b0   :  { %v2749_v5 = vpop.xlane.xlu0 %2748 }
 0x4b4   :  { %v2821_v57 = vpop.xlane.xlu0 %2820 }
 0x4b5   :  { %v2839_v6 = vsel %vm208_vm6, %v2749_v5, %v2821_v57 }
 0x4b6   :  { %v2851_v30 = vmul.f32 0.0625, %v2839_v6 }
 0x4b8   :  { %v2827_v61 = vpop.xlane.xlu0 %2826 }
 0x4b9   :  { %v2758_v55 = vpop.xlane.xlu1 %2757  ;;  %v2841_v19 = vsel %vm208_vm6, %v2755_v60, %v2827_v61 }
 0x4ba   :  { %v2853_v45 = vmul.f32 0.0625, %v2841_v19 }
 0x4c0   :  { %v2862_v16 = vpop.permute.xlu0 %2861 }
 0x4c1   :  { %v2752_v21 = vpop.xlane.xlu1 %2751 }
 0x4c5   :  { %v2824_v32 = vpop.xlane.xlu1 %2823 }
 0x4c6   :  { %v2840_v17 = vsel %vm208_vm6, %v2752_v21, %v2824_v32 }
 0x4c7   :  { %v2852_v27 = vmul.f32 0.0625, %v2840_v17 }
 0x4c9   :  { %v2830_v58 = vpop.xlane.xlu1 %2829  ;;  %v4541_v8 = vpack.c.bf16 %v2852_v27, %v2851_v30 }
 0x4ca   :  { %v2842_v33 = vsel %vm208_vm6, %v2758_v55, %v2830_v58 }
 0x4cb   :  { %v2854_v4 = vmul.f32 0.0625, %v2842_v33  ;;  %4542 = vmatprep.subr.bf16.mxu1 %v4541_v8 }
 0x4cc   :  { %4544 = vmatpush3.bf16.msra.mxu1 %v4541_v8 }
 0x4cd   :  { %v4545_v36 = vpack.c.bf16 %v2854_v4, %v2853_v45  ;;  %v2867_v47 = vpop.permute.xlu1 %2866 }
 0x4cf   :  { %4546 = vmatprep.subr.bf16.mxu1 %v4545_v36 }
 0x4d0   :  { %4548 = vmatpush3.bf16.msra.mxu1 %v4545_v36 }
 0x4d3   :  { %4469 = vmatmul.mubr.msk.f32.vlgmr.msra.gmra.mrb[12].mxu1 %vm2869_vm1, %v2856_v22 }
 0x4d4   :  { %4475 = vmatprep.mubr.msk.f32.mxu1 %vm3089_vm2, %v3005_v59 }
 0x5a6   :  { %v4470_v52 = vpop.f32.mrb[12].mxu1 }
 0x5a7   :  { %v2948_v18 = vadd.f32 %v4470_v52, %v2867_v47  ;;  %v2942_v23 = vpop.f32.mrb[13].mxu1 }
 0x5a8   :  { %v2943_v43 = vadd.f32 %v2942_v23, %v2862_v16 }
 0x5a9   :  { %v2954_v49 = vmul.f32 0.70710677, %v2948_v18  ;;  %v2952_v36 = vmul.f32 0.5, %v2948_v18  ;;  %v3007_v18 = vld [vmem:[%s6549_s7 + $0x10] sm:$0xff] }
 0x5aa   :  { %v2953_v51 = vmul.f32 0.70710677, %v2943_v43  ;;  %v2951_v47 = vmul.f32 0.5, %v2943_v43  ;;  %v3008_v43 = vld [vmem:[%s6549_s7 + $0x18] sm:$0xff] }
 0x5ab   :  { %v2956_v53 = vand.u32 2147483647, %v2954_v49  ;;  %vm2996_vm6 = vcmp.ge.f32.partialorder %v2954_v49, 0.0  ;;  %v3006_v49 = vld [vmem:[%s6549_s7 + $0x8] sm:$0xff] }
 0x5ac   :  { %v2955_v34 = vand.u32 2147483647, %v2953_v51  ;;  %vm2995_vm3 = vcmp.ge.f32.partialorder %v2953_v51, 0.0  ;;  %v3009_v51 = vld [vmem:[%s6549_s7 + $0x20] sm:$0xff] }
 0x5ad   :  { %v2958_v3 = vmul.f32 0.3275911, %v2956_v53  ;;  %v2984_v50 = vsub.f32 0.0, %v2956_v53 }
 0x5ae   :  { %v2957_v41 = vmul.f32 0.3275911, %v2955_v34  ;;  %v2983_v10 = vsub.f32 0.0, %v2955_v34 }
 0x5af   :  { %v2960_v20 = vadd.f32 1.0, %v2958_v3  ;;  %v2986_v14 = vmul.f32 %v2984_v50, %v2956_v53  ;;  %v3011_v3 = vld [vmem:[%s6549_s7 + $0x30] sm:$0xff] }
 0x5b0   :  { %v2959_v31 = vadd.f32 1.0, %v2957_v41  ;;  %v2985_v15 = vmul.f32 %v2983_v10, %v2955_v34  ;;  %v3010_v34 = vld [vmem:[%s6549_s7 + $0x28] sm:$0xff]  ;;  %v3012_v41 = vld [vmem:[%s6549_s7 + $0x38] sm:$0xff]  ;;  %v3015_v50 = vld [vmem:[%s6549_s7 + $0x50] sm:$0xff] }
 0x5b1   :  { %4857 = vrcp.f32 %v2960_v20  ;;  %v2989_v24 = vmul.f32 1.442695, %v2986_v14  ;;  %v3013_v20 = vld [vmem:[%s6549_s7 + $0x40] sm:$0xff]  ;;  %v3016_v10 = vld [vmem:[%s6549_s7 + $0x58] sm:$0xff]  ;;  %v3032_v14 = vpop.permute.xlu1 %3031 }
 0x5b2   :  { %4859 = vrcp.f32 %v2959_v31  ;;  %v2987_v12 = vmul.f32 1.442695, %v2985_v15  ;;  %v3014_v31 = vld [vmem:[%s6549_s7 + $0x48] sm:$0xff] }
 0x5b3   :  { %4861 = vpow2.f32 %v2989_v24 }
 0x5b4   :  { %4863 = vpow2.f32 %v2987_v12 }
 0x5bb   :  { %v4858_v40 = vpop.eup %4857 }
 0x5bc   :  { %v4860_v38 = vpop.eup %4859  ;;  %v2966_v2 = vmul.f32 1.0614054, %v4858_v40 }
 0x5bd   :  { %v2965_v1 = vmul.f32 1.0614054, %v4860_v38  ;;  %v4862_v32 = vpop.eup %4861 }
 0x5be   :  { %v2968_v0 = vadd.f32 -1.4531521, %v2966_v2  ;;  %v4864_v30 = vpop.eup %4863  ;;  %v3042_v2 = vpop.permute.xlu1 %3041 }
 0x5bf   :  { %v2967_v62 = vadd.f32 -1.4531521, %v2965_v1 }
 0x5c0   :  { %v2970_v44 = vmul.f32 %v4858_v40, %v2968_v0 }
 0x5c1   :  { %v2969_v54 = vmul.f32 %v4860_v38, %v2967_v62 }
 0x5c2   :  { %v2972_v39 = vadd.f32 1.4214138, %v2970_v44  ;;  %v3052_v44 = vpop.permute.xlu1 %3051 }
 0x5c3   :  { %v2971_v42 = vadd.f32 1.4214138, %v2969_v54 }
 0x5c4   :  { %v2974_v63 = vmul.f32 %v4858_v40, %v2972_v39 }
 0x5c5   :  { %v2973_v25 = vmul.f32 %v4860_v38, %v2971_v42 }
 0x5c6   :  { %v2976_v60 = vadd.f32 -0.28449672, %v2974_v63 }
 0x5c7   :  { %v2975_v5 = vadd.f32 -0.28449672, %v2973_v25 }
 0x5c8   :  { %v2978_v55 = vmul.f32 %v4858_v40, %v2976_v60 }
 0x5c9   :  { %v2977_v57 = vmul.f32 %v4860_v38, %v2975_v5 }
 0x5ca   :  { %v2980_v21 = vadd.f32 0.2548296, %v2978_v55 }
 0x5cb   :  { %v2979_v6 = vadd.f32 0.2548296, %v2977_v57 }
 0x5cc   :  { %v2982_v61 = vmul.f32 %v4858_v40, %v2980_v21  ;;  %v3037_v40 = vpop.permute.xlu0 %3036  ;;  %v3062_v21 = vpop.permute.xlu1 %3061 }
 0x5cd   :  { %v2981_v17 = vmul.f32 %v4860_v38, %v2979_v6 }
 0x5ce   :  { %v2992_v27 = vmul.f32 %v4862_v32, %v2982_v61 }
 0x5cf   :  { %v2991_v19 = vmul.f32 %v4864_v30, %v2981_v17 }
 0x5d0   :  { %v2994_v58 = vsub.f32 1.0, %v2992_v27  ;;  %v3047_v38 = vpop.permute.xlu0 %3046 }
 0x5d1   :  { %v2993_v8 = vsub.f32 1.0, %v2991_v19 }
 0x5d2   :  { %v2998_v33 = vsub.f32 0.0, %v2994_v58 }
 0x5d3   :  { %v2997_v45 = vsub.f32 0.0, %v2993_v8 }
 0x5d4   :  { %v3000_v4 = vsel %vm2996_vm6, %v2994_v58, %v2998_v33  ;;  %v3057_v24 = vpop.permute.xlu0 %3056 }
 0x5d5   :  { %v3002_v22 = vadd.f32 1.0, %v3000_v4  ;;  %v2999_v59 = vsel %vm2995_vm3, %v2993_v8, %v2997_v45  ;;  %v3072_v4 = vpop.permute.xlu1 %3071 }
 0x5d6   :  { %v3001_v52 = vadd.f32 1.0, %v2999_v59 }
 0x5d7   :  { %v3004_v16 = vmul.f32 %v3002_v22, %v2952_v36 }
 0x5d8   :  { %v3003_v23 = vmul.f32 %v3001_v52, %v2951_v47  ;;  %v3067_v5 = vpop.permute.xlu0 %3066 }
 0x5da   :  { %v4549_v53 = vpack.c.bf16 %v3004_v16, %v3003_v23 }
 0x5dc   :  { %4551 = vmatprep.subr.msk.bf16.mxu1 %vm4550_vm7, %v4549_v53  ;;  %v3077_v8 = vpop.permute.xlu0 %3076 }
 0x5dd   :  { %4554 = vmatpush3.bf16.msk.msra.mxu1 %vm4550_vm7, %v4549_v53 }
 0x5e0   :  { %4476 = vmatmul.mubr.msk.f32.vlgmr.msra.gmra.mrb[14].mxu1 %vm3089_vm2, %v3006_v49 }
 0x5e1   :  { %4478 = vmatprep.mubr.msk.f32.mxu1 %vm3089_vm2, %v3007_v18 }
 0x5e4   :  { %4479 = vmatmul.mubr.msk.f32.gmra.mrb[16].mxu1 %vm3089_vm2, %v3008_v43 }
 0x5e5   :  { %4481 = vmatprep.mubr.msk.f32.mxu1 %vm3089_vm2, %v3009_v51  ;;  %v3087_v51 = vpop.permute.xlu0 %3086 }
 0x5e8   :  { %4482 = vmatmul.mubr.msk.f32.gmra.mrb[18].mxu1 %vm3089_vm2, %v3010_v34 }
 0x5e9   :  { %4484 = vmatprep.mubr.msk.f32.mxu1 %vm3089_vm2, %v3011_v3 }
 0x5ec   :  { %4485 = vmatmul.mubr.msk.f32.gmra.mrb[20].mxu1 %vm3089_vm2, %v3012_v41 }
 0x5ed   :  { %4487 = vmatprep.mubr.msk.f32.mxu1 %vm3089_vm2, %v3013_v20  ;;  %v3082_v20 = vpop.permute.xlu1 %3081 }
 0x5f0   :  { %4488 = vmatmul.mubr.msk.f32.gmra.mrb[22].mxu1 %vm3089_vm2, %v3014_v31 }
 0x5f1   :  { %4490 = vmatprep.mubr.msk.f32.mxu1 %vm3089_vm2, %v3015_v50 }
 0x5f4   :  { %4491 = vmatmul.mubr.msk.f32.gmra.mrb[24].mxu1 %vm3089_vm2, %v3016_v10 }
 0x6b3   :  { %v4477_v15 = vpop.f32.mrb[14].mxu1 }
 0x6b4   :  { %v3202_v1 = vadd.f32 %v4477_v15, %v3037_v40  ;;  %v3196_v0 = vpop.f32.mrb[15].mxu1 }
 0x6b5   :  { %v3197_v62 = vadd.f32 %v3196_v0, %v3032_v14 }
 0x6b6   :  { %v4140_v12 = vmul.f32 -1.442695, %v3202_v1 }
 0x6b7   :  { %v4139_v54 = vmul.f32 -1.442695, %v3197_v62  ;;  %v4480_v39 = vpop.f32.mrb[16].mxu1 }
 0x6b8   :  { %4865 = vpow2.f32 %v4140_v12  ;;  %v3212_v42 = vadd.f32 %v4480_v39, %v3047_v38  ;;  %v3206_v63 = vpop.f32.mrb[17].mxu1 }
 0x6b9   :  { %4867 = vpow2.f32 %v4139_v54  ;;  %v3207_v25 = vadd.f32 %v3206_v63, %v3042_v2 }
 0x6ba   :  { %v4142_v60 = vmul.f32 -1.442695, %v3212_v42 }
 0x6bb   :  { %v4141_v55 = vmul.f32 -1.442695, %v3207_v25  ;;  %v4483_v57 = vpop.f32.mrb[18].mxu1 }
 0x6bc   :  { %4869 = vpow2.f32 %v4142_v60  ;;  %v3222_v6 = vadd.f32 %v4483_v57, %v3057_v24  ;;  %v3216_v61 = vpop.f32.mrb[19].mxu1 }
 0x6bd   :  { %v3217_v32 = vadd.f32 %v3216_v61, %v3052_v44  ;;  %4871 = vpow2.f32 %v4141_v55  ;;  %v6574_v55 = vmov 1  }
 0x6be   :  { %v4144_v17 = vmul.f32 -1.442695, %v3222_v6 }
 0x6bf   :  { %v4143_v30 = vmul.f32 -1.442695, %v3217_v32  ;;  %v4486_v27 = vpop.f32.mrb[20].mxu1 }
 0x6c0   :  { %4873 = vpow2.f32 %v4144_v17  ;;  %v3232_v19 = vadd.f32 %v4486_v27, %v3067_v5  ;;  %v3226_v58 = vpop.f32.mrb[21].mxu1 }
 0x6c1   :  { %v3227_v33 = vadd.f32 %v3226_v58, %v3062_v21  ;;  %4875 = vpow2.f32 %v4143_v30  ;;  %v6575_v30 = vmov 0  }
 0x6c2   :  { %v4866_v45 = vpop.eup %4865  ;;  %v4146_v36 = vmul.f32 -1.442695, %v3232_v19 }
 0x6c3   :  { %v4868_v22 = vpop.eup %4867  ;;  %v3292_v59 = vadd.f32 1.0, %v4866_v45  ;;  %v4145_v47 = vmul.f32 -1.442695, %v3227_v33  ;;  %v4489_v52 = vpop.f32.mrb[22].mxu1 }
 0x6c4   :  { %v3291_v16 = vadd.f32 1.0, %v4868_v22  ;;  %4877 = vpow2.f32 %v4146_v36  ;;  %v3242_v23 = vadd.f32 %v4489_v52, %v3077_v8  ;;  %v3236_v53 = vpop.f32.mrb[23].mxu1 }
 0x6c5   :  { %4879 = vrcp.f32 %v3292_v59  ;;  %v3237_v49 = vadd.f32 %v3236_v53, %v3072_v4 }
 0x6c6   :  { %v4870_v18 = vpop.eup %4869  ;;  %4881 = vrcp.f32 %v3291_v16  ;;  %v4148_v43 = vmul.f32 -1.442695, %v3242_v23 }
 0x6c7   :  { %v3294_v34 = vadd.f32 1.0, %v4870_v18  ;;  %4883 = vpow2.f32 %v4145_v47  ;;  %v4147_v3 = vmul.f32 -1.442695, %v3237_v49  ;;  %v4492_v41 = vpop.f32.mrb[24].mxu1  ;;  %v4872_v10 = vpop.eup %4871 }
 0x6c8   :  { %4885 = vpow2.f32 %v4148_v43  ;;  %v3252_v31 = vadd.f32 %v4492_v41, %v3087_v51  ;;  %v3246_v50 = vpop.f32.mrb[25].mxu1  ;;  %v3293_v1 = vadd.f32 1.0, %v4872_v10 }
 0x6c9   :  { %4887 = vrcp.f32 %v3294_v34  ;;  %v3247_v40 = vadd.f32 %v3246_v50, %v3082_v20 }
 0x6ca   :  { %v4874_v14 = vpop.eup %4873  ;;  %v4150_v38 = vmul.f32 -1.442695, %v3252_v31  ;;  %4889 = vpow2.f32 %v4147_v3 }
 0x6cb   :  { %v3296_v2 = vadd.f32 1.0, %v4874_v14  ;;  %v4149_v15 = vmul.f32 -1.442695, %v3247_v40  ;;  %v4876_v0 = vpop.eup %4875 }
 0x6cc   :  { %4891 = vpow2.f32 %v4150_v38  ;;  %v3295_v54 = vadd.f32 1.0, %v4876_v0 }
 0x6cd   :  { %4893 = vrcp.f32 %v3296_v2 }
 0x6ce   :  { %v4878_v24 = vpop.eup %4877  ;;  %4895 = vpow2.f32 %v4149_v15  ;;  %v6381_v15 = vld [vmem:[%s6551_s9] sm:$0xff]  }
 0x6cf   :  { %v4880_v62 = vpop.eup %4879  ;;  %v3298_v44 = vadd.f32 1.0, %v4878_v24  ;;  %4897 = vrcp.f32 %v3293_v1  ;;  %4505 = vmatprep.mubr.msk.bf16.mxu1 %vm2869_vm1, %v6381_v15 }
 0x6d0   :  { %v4882_v12 = vpop.eup %4881  ;;  %3334 = vperm.xlu0 %4719, %v4880_v62  }
 0x6d1   :  { %v4884_v39 = vpop.eup %4883  ;;  %4899 = vrcp.f32 %v3298_v44  ;;  %3329 = vperm.xlu1 %4721, %v4882_v12  }
 0x6d2   :  { %v4886_v42 = vpop.eup %4885  ;;  %4901 = vrcp.f32 %v3295_v54  ;;  %v3297_v60 = vadd.f32 1.0, %v4884_v39 }
 0x6d3   :  { %v4888_v63 = vpop.eup %4887  ;;  %v3300_v25 = vadd.f32 1.0, %v4886_v42 }
 0x6d4   :  { %3344 = vperm.xlu0 %4719, %v4888_v63   ;;  %v4890_v5 = vpop.eup %4889 }
 0x6d5   :  { %4903 = vrcp.f32 %v3300_v25  ;;  %4722 = vset.pattern.permute.xlu1 %v6574_v55  ;;  %v3299_v61 = vadd.f32 1.0, %v4890_v5 }
 0x6d6   :  { %v4892_v57 = vpop.eup %4891  ;;  %3631 = vperm.xlu1 %4722, %v4882_v12   ;;  %4905 = vrcp.f32 %v3297_v60 }
 0x6d7   :  { %v4894_v21 = vpop.eup %4893  ;;  %v3302_v6 = vadd.f32 1.0, %v4892_v57 }
 0x6d8   :  { %3354 = vperm.xlu0 %4719, %v4894_v21   ;;  %v4896_v32 = vpop.eup %4895 }
 0x6d9   :  { %4907 = vrcp.f32 %v3302_v6  ;;  %v4898_v17 = vpop.eup %4897  ;;  %v3301_v19 = vadd.f32 1.0, %v4896_v32 }
 0x6da   :  { %4723 = vset.pattern.permute.xlu1 %v6575_v30  ;;  %4909 = vrcp.f32 %v3299_v61 }
 0x6db   :  { %v4900_v27 = vpop.eup %4899  ;;  %3339 = vperm.xlu1 %4723, %v4898_v17   ;;  %4911 = vrcp.f32 %v3301_v19 }
 0x6dc   :  { %3364 = vperm.xlu0 %4719, %v4900_v27   ;;  %v4902_v58 = vpop.eup %4901 }
 0x6df   :  { %v4904_v8 = vpop.eup %4903  ;;  %3349 = vperm.xlu1 %4723, %v4902_v58  }
 0x6e0   :  { %3374 = vperm.xlu0 %4719, %v4904_v8   ;;  %v4906_v33 = vpop.eup %4905 }
 0x6e3   :  { %v4908_v45 = vpop.eup %4907  ;;  %3359 = vperm.xlu1 %4723, %v4906_v33  }
 0x6e4   :  { %3384 = vperm.xlu0 %4719, %v4908_v45   ;;  %v4910_v4 = vpop.eup %4909 }
 0x6e5   :  { %v4912_v36 = vpop.eup %4911 }
 0x6e7   :  { %3369 = vperm.xlu1 %4723, %v4910_v4  }
 0x6e8   :  { %4724 = vset.pattern.permute.xlu0 %v6574_v55 }
 0x6e9   :  { %3635 = vperm.xlu0 %4724, %v4880_v62  }
 0x6eb   :  { %3379 = vperm.xlu1 %4723, %v4912_v36  }
 0x6ed   :  { %3647 = vperm.xlu0 %4724, %v4902_v58  }
 0x6ef   :  { %4725 = vset.pattern.permute.xlu1 %v6574_v55 }
 0x6f0   :  { %3639 = vperm.xlu1 %4725, %v4898_v17  }
 0x6f1   :  { %3655 = vperm.xlu0 %4724, %v4906_v33  }
 0x6f4   :  { %3643 = vperm.xlu1 %4725, %v4888_v63  }
 0x6f5   :  { %3663 = vperm.xlu0 %4724, %v4910_v4  }
 0x6f8   :  { %3651 = vperm.xlu1 %4725, %v4894_v21  }
 0x6f9   :  { %3671 = vperm.xlu0 %4724, %v4912_v36  }
 0x6fc   :  { %3659 = vperm.xlu1 %4725, %v4900_v27  }
 0x6fd   :  { %4726 = vset.pattern.permute.xlu0 %v6575_v30 }
 0x700   :  { %3667 = vperm.xlu1 %4725, %v4904_v8  }
 0x704   :  { %3675 = vperm.xlu1 %4725, %v4908_v45  }
 0x708   :  { %4727 = vset.pattern.permute.xlu1 %v6575_v30 }
 0x74f   :  { %v3335_v22 = vpop.permute.xlu0 %3334 }
 0x750   :  { %v3388_v59 = vmul.f32 %v3335_v22, %v6137_v46  ;;  %v3330_v47 = vpop.permute.xlu1 %3329 }
 0x751   :  { %v3387_v52 = vmul.f32 %v3330_v47, %v6123_v35 }
 0x753   :  { %v3399_v16 = vpack.c.bf16 %v3388_v59, %v3387_v52  ;;  %v3345_v23 = vpop.permute.xlu0 %3344 }
 0x754   :  { %v3390_v43 = vmul.f32 %v3345_v23, %v6108_v48 }
 0x755   :  { %3449 = vrot.lane.b32.xlu0 %v3399_v16, %s6573_s30  ;;  %v3632_v53 = vpop.permute.xlu1 %3631 }
 0x756   :  { %v3678_v42 = vmul.f32 %v3632_v53, %v6123_v35 }
 0x757   :  { %v3355_v49 = vpop.permute.xlu0 %3354 }
 0x758   :  { %v3392_v20 = vmul.f32 %v3355_v49, %v6187_v37 }
 0x75a   :  { %v3340_v18 = vpop.permute.xlu1 %3339 }
 0x75b   :  { %v3389_v51 = vmul.f32 %v3340_v18, %v6088_v13  ;;  %v3365_v34 = vpop.permute.xlu0 %3364 }
 0x75c   :  { %v3394_v14 = vmul.f32 %v3365_v34, %v6169_v9 }
 0x75d   :  { %v3400_v3 = vpack.c.bf16 %v3390_v43, %v3389_v51 }
 0x75e   :  { %v3350_v41 = vpop.permute.xlu1 %3349 }
 0x75f   :  { %v3391_v31 = vmul.f32 %v3350_v41, %v6180_v56  ;;  %v3375_v50 = vpop.permute.xlu0 %3374  ;;  %3451 = vrot.lane.b32.xlu1 %v3400_v3, %s6573_s30 }
 0x760   :  { %v3396_v24 = vmul.f32 %v3375_v50, %v6221_v26 }
 0x761   :  { %v3401_v10 = vpack.c.bf16 %v3392_v20, %v3391_v31 }
 0x762   :  { %v3360_v40 = vpop.permute.xlu1 %3359 }
 0x763   :  { %v3393_v38 = vmul.f32 %v3360_v40, %v6153_v11  ;;  %v3385_v2 = vpop.permute.xlu0 %3384  ;;  %3453 = vrot.lane.b32.xlu0 %v3401_v10, %s6573_s30 }
 0x764   :  { %v3398_v63 = vmul.f32 %v3385_v2, %v6211_v29 }
 0x765   :  { %v3402_v1 = vpack.c.bf16 %v3394_v14, %v3393_v38 }
 0x766   :  { %v3370_v0 = vpop.permute.xlu1 %3369 }
 0x767   :  { %v3395_v62 = vmul.f32 %v3370_v0, %v6203_v7  ;;  %3455 = vrot.lane.b32.xlu1 %v3402_v1, %s6573_s30 }
 0x768   :  { %v3636_v44 = vpop.permute.xlu0 %3635 }
 0x769   :  { %v3403_v12 = vpack.c.bf16 %v3396_v24, %v3395_v62  ;;  %v3679_v54 = vmul.f32 %v3636_v44, %v6137_v46 }
 0x76a   :  { %v3380_v39 = vpop.permute.xlu1 %3379 }
 0x76b   :  { %v3397_v25 = vmul.f32 %v3380_v39, %v6195_v28  ;;  %3457 = vrot.lane.b32.xlu0 %v3403_v12, %s6573_s30  ;;  %v3690_v60 = vpack.c.bf16 %v3679_v54, %v3678_v42 }
 0x76c   :  { %v3648_v57 = vpop.permute.xlu0 %3647 }
 0x76d   :  { %v3404_v5 = vpack.c.bf16 %v3398_v63, %v3397_v25  ;;  %v3682_v30 = vmul.f32 %v3648_v57, %v6180_v56 }
 0x76f   :  { %3702 = vrot.lane.b32.xlu0 %v3690_v60, %s4996_s3  ;;  %3459 = vrot.lane.b32.xlu1 %v3404_v5, %s6573_s30  ;;  %v3640_v21 = vpop.permute.xlu1 %3639 }
 0x770   :  { %v3680_v46 = vmul.f32 %v3640_v21, %v6088_v13  ;;  %v3656_v35 = vpop.permute.xlu0 %3655 }
 0x771   :  { %v3684_v33 = vmul.f32 %v3656_v35, %v6153_v11  ;;  %v3409_v11 = vld [vmem:[%s6552_s10] sm:$0xff] }
 0x773   :  { %v3644_v6 = vpop.permute.xlu1 %3643 }
 0x774   :  { %v3681_v61 = vmul.f32 %v3644_v6, %v6108_v48  ;;  %v3664_v58 = vpop.permute.xlu0 %3663 }
 0x775   :  { %v3686_v4 = vmul.f32 %v3664_v58, %v6203_v7  ;;  %v3410_v7 = vld [vmem:[%s6552_s10 + $0x8] sm:$0xff] }
 0x776   :  { %v3691_v32 = vpack.c.bf16 %v3681_v61, %v3680_v46 }
 0x777   :  { %v3652_v17 = vpop.permute.xlu1 %3651 }
 0x778   :  { %v3683_v27 = vmul.f32 %v3652_v17, %v6187_v37  ;;  %3704 = vrot.lane.b32.xlu1 %v3691_v32, %s4996_s3  ;;  %v3672_v56 = vpop.permute.xlu0 %3671 }
 0x779   :  { %v3688_v59 = vmul.f32 %v3672_v56, %v6195_v28  ;;  %v3412_v28 = vld [vmem:[%s6552_s10 + $0x18] sm:$0xff] }
 0x77a   :  { %v3692_v19 = vpack.c.bf16 %v3683_v27, %v3682_v30 }
 0x77b   :  { %v3660_v8 = vpop.permute.xlu1 %3659 }
 0x77c   :  { %v3685_v45 = vmul.f32 %v3660_v8, %v6169_v9  ;;  %3706 = vrot.lane.b32.xlu0 %v3692_v19, %s4996_s3 }
 0x77e   :  { %v3693_v13 = vpack.c.bf16 %v3685_v45, %v3684_v33 }
 0x77f   :  { %v3668_v48 = vpop.permute.xlu1 %3667 }
 0x780   :  { %v3687_v36 = vmul.f32 %v3668_v48, %v6221_v26  ;;  %3708 = vrot.lane.b32.xlu1 %v3693_v13, %s4996_s3 }
 0x782   :  { %v3694_v37 = vpack.c.bf16 %v3687_v36, %v3686_v4 }
 0x783   :  { %v3676_v22 = vpop.permute.xlu1 %3675 }
 0x784   :  { %v3689_v47 = vmul.f32 %v3676_v22, %v6211_v29  ;;  %3710 = vrot.lane.b32.xlu0 %v3694_v37, %s4996_s3  ;;  %v3411_v29 = vld [vmem:[%s6552_s10 + $0x10] sm:$0xff] }
 0x786   :  { %v3695_v9 = vpack.c.bf16 %v3689_v47, %v3688_v59 }
 0x788   :  { %3712 = vrot.lane.b32.xlu1 %v3695_v9, %s4996_s3  ;;  %3415 = vperm.xlu0 %4726, %v3409_v11  }
 0x78c   :  { %3420 = vperm.xlu1 %4727, %v3410_v7   ;;  %3430 = vperm.xlu0 %4726, %v3412_v28  }
 0x790   :  { %3425 = vperm.xlu1 %4727, %v3411_v29   ;;  %4728 = vset.pattern.permute.xlu0 %v6574_v55  ;;  %v4784_v55 = vld [vmem:[%s6551_s9 + $0x8] sm:$0xff]   ;;  %s4998_s9 = smov 16  }
 0x7c7   :  { %v3450_v26 = vpop.permute.xlu0 %3449 }
 0x7c8   :  { %4493 = vmatprep.subr.bf16.mxu1 %v3450_v26 }
 0x7c9   :  { %4494 = vmatpush3.bf16.msra.mxu1 %v3450_v26 }
 0x7d1   :  { %v3452_v52 = vpop.permute.xlu1 %3451 }
 0x7d2   :  { %4495 = vmatprep.subr.bf16.mxu1 %v3452_v52 }
 0x7d3   :  { %4496 = vmatpush3.bf16.msra.mxu1 %v3452_v52 }
 0x7d5   :  { %v3454_v16 = vpop.permute.xlu0 %3453 }
 0x7d6   :  { %4497 = vmatprep.subr.bf16.mxu1 %v3454_v16 }
 0x7d7   :  { %4498 = vmatpush3.bf16.msra.mxu1 %v3454_v16 }
 0x7d9   :  { %v3456_v23 = vpop.permute.xlu1 %3455 }
 0x7da   :  { %4499 = vmatprep.subr.bf16.mxu1 %v3456_v23 }
 0x7db   :  { %4500 = vmatpush3.bf16.msra.mxu1 %v3456_v23 }
 0x7dd   :  { %v3458_v53 = vpop.permute.xlu0 %3457 }
 0x7de   :  { %4501 = vmatprep.subr.bf16.mxu1 %v3458_v53 }
 0x7df   :  { %4502 = vmatpush3.bf16.msra.mxu1 %v3458_v53 }
 0x7e1   :  { %v3460_v49 = vpop.permute.xlu1 %3459  ;;  %v3703_v18 = vpop.permute.xlu0 %3702 }
 0x7e2   :  { %4503 = vmatprep.subr.bf16.mxu1 %v3460_v49 }
 0x7e3   :  { %4504 = vmatpush3.bf16.msra.mxu1 %v3460_v49 }
 0x7e4   :  { %4509 = vmatprep.subr.bf16.mxu1 %v3703_v18 }
 0x7e6   :  { %4506 = vmatmul.mubr.msk.bf16.vlgmr.msra.gmra.mrb[28].mxu1 %vm2869_vm1, %v4784_v55 }
 0x7e7   :  { %4510 = vmatpush3.bf16.msra.mxu1 %v3703_v18  ;;  %4521 = vmatprep.mubr.msk.bf16.mxu1 %vm2869_vm1, %v6381_v15 }
 0x7ea   :  { %v3705_v43 = vpop.permute.xlu1 %3704 }
 0x7eb   :  { %4511 = vmatprep.subr.bf16.mxu1 %v3705_v43 }
 0x7ec   :  { %4512 = vmatpush3.bf16.msra.mxu1 %v3705_v43 }
 0x7ee   :  { %v3707_v51 = vpop.permute.xlu0 %3706 }
 0x7ef   :  { %4513 = vmatprep.subr.bf16.mxu1 %v3707_v51 }
 0x7f0   :  { %4514 = vmatpush3.bf16.msra.mxu1 %v3707_v51 }
 0x7f2   :  { %v3709_v34 = vpop.permute.xlu1 %3708 }
 0x7f3   :  { %4515 = vmatprep.subr.bf16.mxu1 %v3709_v34 }
 0x7f4   :  { %4516 = vmatpush3.bf16.msra.mxu1 %v3709_v34 }
 0x7f6   :  { %v3711_v3 = vpop.permute.xlu0 %3710 }
 0x7f7   :  { %4517 = vmatprep.subr.bf16.mxu1 %v3711_v3 }
 0x7f8   :  { %4518 = vmatpush3.bf16.msra.mxu1 %v3711_v3 }
 0x7fa   :  { %v3713_v41 = vpop.permute.xlu1 %3712 }
 0x7fb   :  { %4519 = vmatprep.subr.bf16.mxu1 %v3713_v41 }
 0x7fc   :  { %4520 = vmatpush3.bf16.msra.mxu1 %v3713_v41 }
 0x7ff   :  { %4522 = vmatmul.mubr.msk.bf16.vlgmr.msra.gmra.mrb[32].mxu1 %vm2869_vm1, %v4784_v55 }
 0x807   :  { %v6442_v2 = vpop.permute.xlu0 %3415 }
 0x80b   :  { %v6438_v40 = vpop.permute.xlu1 %3420  ;;  %v6458_v63 = vpop.permute.xlu0 %3430 }
 0x80f   :  { %v6440_v14 = vpop.permute.xlu1 %3425 }
 0x8b9   :  { %v6430_v20 = vpop.f32.mrb[28].mxu1 }
 0x8ba   :  { %v6432_v31 = vpop.f32.mrb[29].mxu1 }
 0x8bb   :  { %v6434_v50 = vpop.f32.mrb[30].mxu1 }
 0x8bc   :  { %v6436_v10 = vpop.f32.mrb[31].mxu1 }
 0x8d2   :  { %v4523_v38 = vpop.f32.mrb[32].mxu1 }
 0x8d3   :  { %v6445_v15 = vadd.f32 %v4523_v38, %v6440_v14  ;;  %v3754_v1 = vpop.f32.mrb[33].mxu1 }
 0x8d4   :  { %v6448_v0 = vadd.f32 %v3754_v1, %v6442_v2  ;;  %v4524_v24 = vpop.f32.mrb[34].mxu1 }
 0x8d5   :  { %v6451_v62 = vmul.f32 0.70710677, %v6445_v15  ;;  %v3757_v12 = vpop.f32.mrb[35].mxu1  ;;  %v6461_v5 = vadd.f32 %v4524_v24, %v6458_v63 }
 0x8d6   :  { %v6454_v44 = vmul.f32 0.70710677, %v6448_v0  ;;  %v6467_v6 = vadd.f32 %v3757_v12, %v6438_v40 }
 0x8d7   :  { %v3779_v54 = vand.u32 2147483647, %v6451_v62  ;;  %v6464_v21 = vmul.f32 0.70710677, %v6461_v5  ;;  %vm3859_vm8 = vcmp.ge.f32.partialorder %v6451_v62, 0.0 }
 0x8d8   :  { %v3777_v39 = vand.u32 2147483647, %v6454_v44  ;;  %v6471_v32 = vmul.f32 0.70710677, %v6467_v6  ;;  %vm3857_vm9 = vcmp.ge.f32.partialorder %v6454_v44, 0.0 }
 0x8d9   :  { %v3783_v42 = vmul.f32 0.3275911, %v3779_v54  ;;  %v3780_v46 = vand.u32 2147483647, %v6464_v21  ;;  %v3835_v61 = vsub.f32 0.0, %v3779_v54  ;;  %vm3860_vm10 = vcmp.ge.f32.partialorder %v6464_v21, 0.0 }
 0x8da   :  { %v3781_v25 = vmul.f32 0.3275911, %v3777_v39  ;;  %v3833_v17 = vsub.f32 0.0, %v3777_v39  ;;  %v3778_v27 = vand.u32 2147483647, %v6471_v32  ;;  %vm3858_vm11 = vcmp.ge.f32.partialorder %v6471_v32, 0.0 }
 0x8db   :  { %v3787_v60 = vadd.f32 1.0, %v3783_v42  ;;  %v3784_v35 = vmul.f32 0.3275911, %v3780_v46  ;;  %v3839_v58 = vmul.f32 %v3835_v61, %v3779_v54  ;;  %v3836_v11 = vsub.f32 0.0, %v3780_v46 }
 0x8dc   :  { %v3785_v57 = vadd.f32 1.0, %v3781_v25  ;;  %v3837_v45 = vmul.f32 %v3833_v17, %v3777_v39  ;;  %v3782_v48 = vmul.f32 0.3275911, %v3778_v27  ;;  %v3834_v49 = vsub.f32 0.0, %v3778_v27 }
 0x8dd   :  { %4913 = vrcp.f32 %v3787_v60  ;;  %v3788_v30 = vadd.f32 1.0, %v3784_v35  ;;  %v3845_v36 = vmul.f32 1.442695, %v3839_v58  ;;  %v3840_v52 = vmul.f32 %v3836_v11, %v3780_v46 }
 0x8de   :  { %4915 = vrcp.f32 %v3785_v57  ;;  %v3786_v37 = vadd.f32 1.0, %v3782_v48  ;;  %v3841_v59 = vmul.f32 1.442695, %v3837_v45  ;;  %v3838_v1 = vmul.f32 %v3834_v49, %v3778_v27 }
 0x8df   :  { %4917 = vrcp.f32 %v3788_v30  ;;  %v3847_v51 = vmul.f32 1.442695, %v3840_v52  ;;  %v6488_v21 = vadd.f32 %v6430_v20, %v6440_v14  ;;  %v6504_v20 = vadd.f32 %v6434_v50, %v6458_v63 }
 0x8e0   :  { %4919 = vrcp.f32 %v3786_v37  ;;  %v3843_v35 = vmul.f32 1.442695, %v3838_v1 }
 0x8e1   :  { %4921 = vpow2.f32 %v3845_v36 }
 0x8e2   :  { %4923 = vpow2.f32 %v3841_v59 }
 0x8e3   :  { %4925 = vpow2.f32 %v3847_v51 }
 0x8e4   :  { %4927 = vpow2.f32 %v3843_v35 }
 0x8e7   :  { %v4914_v19 = vpop.eup %4913 }
 0x8e8   :  { %v4916_v8 = vpop.eup %4915  ;;  %v3799_v33 = vmul.f32 1.0614054, %v4914_v19 }
 0x8e9   :  { %v3797_v13 = vmul.f32 1.0614054, %v4916_v8  ;;  %v4918_v29 = vpop.eup %4917 }
 0x8ea   :  { %v3803_v4 = vadd.f32 -1.4531521, %v3799_v33  ;;  %v3800_v23 = vmul.f32 1.0614054, %v4918_v29  ;;  %v4920_v41 = vpop.eup %4919 }
 0x8eb   :  { %v3801_v56 = vadd.f32 -1.4531521, %v3797_v13  ;;  %v3798_v54 = vmul.f32 1.0614054, %v4920_v41  ;;  %v4922_v39 = vpop.eup %4921 }
 0x8ec   :  { %v3807_v22 = vmul.f32 %v4914_v19, %v3803_v4  ;;  %v3804_v18 = vadd.f32 -1.4531521, %v3800_v23  ;;  %v4924_v25 = vpop.eup %4923 }
 0x8ed   :  { %v3805_v47 = vmul.f32 %v4916_v8, %v3801_v56  ;;  %v3802_v46 = vadd.f32 -1.4531521, %v3798_v54  ;;  %v3769_v56 = vmul.f32 0.5, %v6448_v0 }
 0x8ee   :  { %v3811_v9 = vadd.f32 1.4214138, %v3807_v22  ;;  %v3808_v3 = vmul.f32 %v4918_v29, %v3804_v18 }
 0x8ef   :  { %v3809_v7 = vadd.f32 1.4214138, %v3805_v47  ;;  %v3806_v58 = vmul.f32 %v4920_v41, %v3802_v46  ;;  %v4926_v47 = vpop.eup %4925 }
 0x8f0   :  { %v3815_v28 = vmul.f32 %v4914_v19, %v3811_v9  ;;  %v3812_v12 = vadd.f32 1.4214138, %v3808_v3  ;;  %v4928_v23 = vpop.eup %4927  ;;  %v3772_v3 = vmul.f32 0.5, %v6461_v5 }
 0x8f1   :  { %v3813_v26 = vmul.f32 %v4916_v8, %v3809_v7  ;;  %v3810_v48 = vadd.f32 1.4214138, %v3806_v58 }
 0x8f2   :  { %v3819_v16 = vadd.f32 -0.28449672, %v3815_v28  ;;  %v3816_v57 = vmul.f32 %v4918_v29, %v3812_v12  ;;  %v6500_v12 = vadd.f32 %v6436_v10, %v6438_v40 }
 0x8f3   :  { %v3817_v53 = vadd.f32 -0.28449672, %v3813_v26  ;;  %v3771_v26 = vmul.f32 0.5, %v6445_v15  ;;  %v3770_v15 = vmul.f32 0.5, %v6467_v6  ;;  %v6494_v6 = vmul.f32 0.70710677, %v6488_v21 }
 0x8f4   :  { %v3823_v55 = vmul.f32 %v4914_v19, %v3819_v16  ;;  %v3820_v30 = vadd.f32 -0.28449672, %v3816_v57  ;;  %v6507_v14 = vmul.f32 0.70710677, %v6500_v12 }
 0x8f5   :  { %v3821_v43 = vmul.f32 %v4916_v8, %v3817_v53  ;;  %v3532_v5 = vand.u32 2147483647, %v6494_v6  ;;  %vm3612_vm13 = vcmp.ge.f32.partialorder %v6494_v6, 0.0 }
 0x8f6   :  { %v3827_v34 = vadd.f32 0.2548296, %v3823_v55  ;;  %v3824_v13 = vmul.f32 %v4918_v29, %v3820_v30  ;;  %vm3611_vm15 = vcmp.ge.f32.partialorder %v6507_v14, 0.0 }
 0x8f7   :  { %v3825_v38 = vadd.f32 0.2548296, %v3821_v43 }
 0x8f8   :  { %v3831_v24 = vmul.f32 %v4914_v19, %v3827_v34  ;;  %v3828_v19 = vadd.f32 0.2548296, %v3824_v13 }
 0x8f9   :  { %v3829_v42 = vmul.f32 %v4916_v8, %v3825_v38  ;;  %v3814_v8 = vmul.f32 %v4920_v41, %v3810_v48  ;;  %v6484_v38 = vadd.f32 %v6432_v31, %v6442_v2  ;;  %v3536_v31 = vmul.f32 0.3275911, %v3532_v5 }
 0x8fa   :  { %v3851_v60 = vmul.f32 %v4922_v39, %v3831_v24  ;;  %v3832_v22 = vmul.f32 %v4918_v29, %v3828_v19  ;;  %v6510_v39 = vmul.f32 0.70710677, %v6504_v20 }
 0x8fb   :  { %v3849_v61 = vmul.f32 %v4924_v25, %v3829_v42  ;;  %v3818_v59 = vadd.f32 -0.28449672, %v3814_v8  ;;  %v6491_v32 = vmul.f32 0.70710677, %v6484_v38  ;;  %v3540_v54 = vadd.f32 1.0, %v3536_v31 }
 0x8fc   :  { %v3855_v17 = vsub.f32 1.0, %v3851_v60  ;;  %v3852_v7 = vmul.f32 %v4926_v47, %v3832_v22  ;;  %v3531_v42 = vand.u32 2147483647, %v6507_v14  ;;  %v3533_v10 = vand.u32 2147483647, %v6510_v39 }
 0x8fd   :  { %v3853_v33 = vsub.f32 1.0, %v3849_v61  ;;  %v3822_v28 = vmul.f32 %v4920_v41, %v3818_v59  ;;  %v3530_v1 = vand.u32 2147483647, %v6491_v32  ;;  %vm3610_vm12 = vcmp.ge.f32.partialorder %v6491_v32, 0.0 }
 0x8fe   :  { %v3863_v45 = vsub.f32 0.0, %v3855_v17  ;;  %v3856_v44 = vsub.f32 1.0, %v3852_v7  ;;  %v3535_v40 = vmul.f32 0.3275911, %v3531_v42  ;;  %v3537_v60 = vmul.f32 0.3275911, %v3533_v10 }
 0x8ff   :  { %v3861_v27 = vsub.f32 0.0, %v3853_v33  ;;  %v3826_v52 = vadd.f32 0.2548296, %v3822_v28  ;;  %v3534_v24 = vmul.f32 0.3275911, %v3530_v1  ;;  %v3586_v13 = vsub.f32 0.0, %v3530_v1 }
 0x900   :  { %v3867_v4 = vsel %vm3859_vm8, %v3855_v17, %v3863_v45  ;;  %v3864_v0 = vsub.f32 0.0, %v3856_v44  ;;  %v3539_v57 = vadd.f32 1.0, %v3535_v40  ;;  %v3541_v63 = vadd.f32 1.0, %v3537_v60 }
 0x901   :  { %v3865_v36 = vsel %vm3857_vm9, %v3853_v33, %v3861_v27  ;;  %v3871_v11 = vadd.f32 1.0, %v3867_v4  ;;  %v3830_v16 = vmul.f32 %v4920_v41, %v3826_v52  ;;  %v3538_v2 = vadd.f32 1.0, %v3534_v24 }
 0x902   :  { %v3869_v37 = vadd.f32 1.0, %v3865_v36  ;;  %v3868_v55 = vsel %vm3860_vm10, %v3856_v44, %v3864_v0  ;;  %v3588_v4 = vsub.f32 0.0, %v3532_v5  ;;  %v3590_v36 = vmul.f32 %v3586_v13, %v3530_v1 }
 0x903   :  { %v3875_v62 = vmul.f32 %v3871_v11, %v3771_v26  ;;  %v3850_v53 = vmul.f32 %v4928_v23, %v3830_v16  ;;  %v3872_v51 = vadd.f32 1.0, %v3868_v55  ;;  %4929 = vrcp.f32 %v3538_v2 }
 0x904   :  { %v3873_v9 = vmul.f32 %v3869_v37, %v3769_v56  ;;  %4931 = vrcp.f32 %v3540_v54  ;;  %v3592_v47 = vmul.f32 %v3588_v4, %v3532_v5  ;;  %v3594_v11 = vmul.f32 1.442695, %v3590_v36 }
 0x905   :  { %v3854_v49 = vsub.f32 1.0, %v3850_v53  ;;  %v3876_v41 = vmul.f32 %v3872_v51, %v3772_v3  ;;  %4933 = vrcp.f32 %v3539_v57  ;;  %v3587_v53 = vsub.f32 0.0, %v3531_v42 }
 0x906   :  { %3881 = vrot.lane.b32.xlu1 %v3873_v9, %s4998_s9  ;;  %4935 = vrcp.f32 %v3541_v63  ;;  %v3598_v52 = vmul.f32 1.442695, %v3592_v47  ;;  %v3522_v13 = vmul.f32 0.5, %v6484_v38  ;;  %vm3613_vm1 = vcmp.ge.f32.partialorder %v6510_v39, 0.0 }
 0x907   :  { %v3862_v29 = vsub.f32 0.0, %v3854_v49  ;;  %4937 = vpow2.f32 %v3594_v11 }
 0x908   :  { %4939 = vpow2.f32 %v3598_v52  ;;  %v3525_v52 = vmul.f32 0.5, %v6504_v20 }
 0x909   :  { %v3866_v18 = vsel %vm3858_vm11, %v3854_v49, %v3862_v29 }
 0x90a   :  { %3885 = vrot.lane.b32.xlu1 %v3875_v62, %s4998_s9  ;;  %v3870_v43 = vadd.f32 1.0, %v3866_v18  ;;  %v3589_v18 = vsub.f32 0.0, %v3533_v10 }
 0x90c   :  { %v3874_v34 = vmul.f32 %v3870_v43, %v3770_v15  ;;  %v3591_v15 = vmul.f32 %v3587_v53, %v3531_v42  ;;  %v3593_v1 = vmul.f32 %v3589_v18, %v3533_v10 }
 0x90d   :  { %v4930_v25 = vpop.eup %4929 }
 0x90e   :  { %3883 = vrot.lane.b32.xlu0 %v3874_v34, %s4998_s9  ;;  %v3550_v46 = vmul.f32 1.0614054, %v4930_v25  ;;  %v4932_v50 = vpop.eup %4931  ;;  %v3596_v5 = vmul.f32 1.442695, %v3591_v15  ;;  %v3600_v60 = vmul.f32 1.442695, %v3593_v1 }
 0x90f   :  { %v3552_v61 = vmul.f32 1.0614054, %v4932_v50  ;;  %v4934_v58 = vpop.eup %4933 }
 0x910   :  { %v3554_v35 = vadd.f32 -1.4531521, %v3550_v46  ;;  %v3551_v48 = vmul.f32 1.0614054, %v4934_v58  ;;  %v4936_v27 = vpop.eup %4935  ;;  %4941 = vpow2.f32 %v3596_v5 }
 0x911   :  { %v3556_v17 = vadd.f32 -1.4531521, %v3552_v61  ;;  %v3553_v56 = vmul.f32 1.0614054, %v4936_v27  ;;  %v4938_v43 = vpop.eup %4937  ;;  %4943 = vpow2.f32 %v3600_v60 }
 0x912   :  { %3887 = vrot.lane.b32.xlu0 %v3876_v41, %s4998_s9  ;;  %v3558_v30 = vmul.f32 %v4930_v25, %v3554_v35  ;;  %v3555_v37 = vadd.f32 -1.4531521, %v3551_v48  ;;  %v4940_v24 = vpop.eup %4939 }
 0x913   :  { %v3560_v33 = vmul.f32 %v4932_v50, %v3556_v17  ;;  %v3557_v9 = vadd.f32 -1.4531521, %v3553_v56 }
 0x914   :  { %v3562_v45 = vadd.f32 1.4214138, %v3558_v30  ;;  %v3559_v7 = vmul.f32 %v4934_v58, %v3555_v37 }
 0x915   :  { %v3564_v19 = vadd.f32 1.4214138, %v3560_v33  ;;  %v3561_v62 = vmul.f32 %v4936_v27, %v3557_v9  ;;  %v3523_v9 = vmul.f32 0.5, %v6500_v12 }
 0x916   :  { %v3566_v8 = vmul.f32 %v4930_v25, %v3562_v45  ;;  %v3563_v44 = vadd.f32 1.4214138, %v3559_v7 }
 0x917   :  { %v3568_v22 = vmul.f32 %v4932_v50, %v3564_v19  ;;  %v3565_v0 = vadd.f32 1.4214138, %v3561_v62 }
 0x918   :  { %v3570_v59 = vadd.f32 -0.28449672, %v3566_v8  ;;  %v3567_v49 = vmul.f32 %v4934_v58, %v3563_v44 }
 0x919   :  { %v3572_v28 = vadd.f32 -0.28449672, %v3568_v22  ;;  %v3569_v51 = vmul.f32 %v4936_v27, %v3565_v0 }
 0x91a   :  { %v3574_v26 = vmul.f32 %v4930_v25, %v3570_v59  ;;  %v3571_v34 = vadd.f32 -0.28449672, %v3567_v49  ;;  %v4942_v10 = vpop.eup %4941 }
 0x91b   :  { %v3576_v16 = vmul.f32 %v4932_v50, %v3572_v28  ;;  %v3573_v31 = vadd.f32 -0.28449672, %v3569_v51  ;;  %v4944_v48 = vpop.eup %4943 }
 0x91c   :  { %v3578_v23 = vadd.f32 0.2548296, %v3574_v26  ;;  %v3575_v2 = vmul.f32 %v4934_v58, %v3571_v34 }
 0x91d   :  { %v3580_v29 = vadd.f32 0.2548296, %v3576_v16  ;;  %v3577_v57 = vmul.f32 %v4936_v27, %v3573_v31 }
 0x91e   :  { %v3582_v55 = vmul.f32 %v4930_v25, %v3578_v23  ;;  %v3579_v46 = vadd.f32 0.2548296, %v3575_v2 }
 0x91f   :  { %v3584_v3 = vmul.f32 %v4932_v50, %v3580_v29  ;;  %v3581_v42 = vadd.f32 0.2548296, %v3577_v57 }
 0x920   :  { %v3602_v41 = vmul.f32 %v4938_v43, %v3582_v55  ;;  %v3583_v61 = vmul.f32 %v4934_v58, %v3579_v46  ;;  %v3524_v58 = vmul.f32 0.5, %v6488_v21 }
 0x921   :  { %v3604_v54 = vmul.f32 %v4940_v24, %v3584_v3  ;;  %v3585_v30 = vmul.f32 %v4936_v27, %v3581_v42 }
 0x922   :  { %v3606_v40 = vsub.f32 1.0, %v3602_v41  ;;  %v3603_v33 = vmul.f32 %v4942_v10, %v3583_v61 }
 0x923   :  { %v3608_v63 = vsub.f32 1.0, %v3604_v54  ;;  %v3605_v4 = vmul.f32 %v4944_v48, %v3585_v30 }
 0x924   :  { %v3614_v25 = vsub.f32 0.0, %v3606_v40  ;;  %v3607_v36 = vsub.f32 1.0, %v3603_v33 }
 0x925   :  { %v3616_v50 = vsub.f32 0.0, %v3608_v63  ;;  %v3609_v37 = vsub.f32 1.0, %v3605_v4 }
 0x926   :  { %v3618_v35 = vsel %vm3610_vm12, %v3606_v40, %v3614_v25  ;;  %v3615_v27 = vsub.f32 0.0, %v3607_v36 }
 0x927   :  { %v3622_v17 = vadd.f32 1.0, %v3618_v35  ;;  %v3620_v45 = vsel %vm3612_vm13, %v3608_v63, %v3616_v50  ;;  %v3617_v38 = vsub.f32 0.0, %v3609_v37 }
 0x928   :  { %v3624_v19 = vadd.f32 1.0, %v3620_v45  ;;  %v3619_v47 = vsel %vm3611_vm15, %v3607_v36, %v3615_v27 }
 0x929   :  { %v3626_v8 = vmul.f32 %v3622_v17, %v3522_v13  ;;  %v3623_v11 = vadd.f32 1.0, %v3619_v47  ;;  %v3621_v21 = vsel %vm3613_vm1, %v3609_v37, %v3617_v38 }
 0x92a   :  { %v3628_v6 = vmul.f32 %v3624_v19, %v3524_v58  ;;  %v3625_v7 = vadd.f32 1.0, %v3621_v21 }
 0x92b   :  { %v3627_v28 = vmul.f32 %v3623_v11, %v3523_v9 }
 0x92c   :  { %v3629_v14 = vmul.f32 %v3625_v7, %v3525_v52 }
 0x978   :  { %v3882_v32 = vpop.permute.xlu1 %3881 }
 0x979   :  { %v3893_v56 = vsel %vm2722_vm0, %v3626_v8, %v3882_v32 }
 0x97a   :  { %3898 = vst.msk [vmem:[#allocation2] sm:$0xff] %vm3897_vm14, %v3893_v56 }
 0x97c   :  { %v3886_v22 = vpop.permute.xlu1 %3885 }
 0x97d   :  { %v3895_v59 = vsel %vm2722_vm0, %v3628_v6, %v3886_v22 }
 0x97e   :  { %3900 = vst.msk [vmem:[#allocation2 + $0x10] sm:$0xff] %vm3897_vm14, %v3895_v59 }
 0x980   :  { %v3884_v26 = vpop.permute.xlu0 %3883 }
 0x981   :  { %v3894_v62 = vsel %vm2722_vm0, %v3627_v28, %v3884_v26 }
 0x982   :  { %3899 = vst.msk [vmem:[#allocation2 + $0x8] sm:$0xff] %vm3897_vm14, %v3894_v62 }
 0x984   :  { %v3888_v44 = vpop.permute.xlu0 %3887 }
 0x985   :  { %v3896_v39 = vsel %vm2722_vm0, %v3629_v14, %v3888_v44 }
 0x986   :  { %3901 = vst.msk [vmem:[#allocation2 + $0x18] sm:$0xff] %vm3897_vm14, %v3896_v39 }
 0x987   :  { %4956 = shalt.err (!%p4953_p4)
}
 0x988   :  { %s4957_s28 = scalar_lea.hbm %s6553_s11, 512 }
 0x989   :  { %p4958_p5 = scmp.ne.s32.totalorder %s6553_s11, %s4957_s28  ;;  %p4961_p6 = scmp.lt.u32.totalorder %s4957_s28, %s6553_s11 }
 0x98b   :  { %p4963_p7 = pnand %p4961_p6, %p4958_p5 }
 0x98d   :  { %4966 = shalt.err (!%p4963_p7)
}
 0x98e   :  { %s5000_s13 = smov 128   ;;  %s5001_s19 = smov 8  }
 0x98f   :  { %3913 = dma.vmem_to_hbm [thread:$0]  %s3908_s17, 512, %s6553_s11, [#allocation3], %s5000_s13, %s5000_s13, %s5001_s19  }
 0x990   :  { %4967 = dma.done.wait [#allocation3], 512  }
 0x991   :  { %4968 = vsyncadd [#allocation3], 4294966784 }
 0x992   :  { %3917 = vsyncpa [#allocation3], 1 }

</bundles_post_ra>
